<compile_context>
chip_gen: v6e
topology: v6e:2x2x1
jax: 0.10.0
libtpu: 0.0.40
codegen_flags: <defaults>
</compile_context>

<pallas_src>
import functools

import jax
import jax.numpy as jnp
from jax.experimental import pallas as pl
from jax.experimental.pallas import tpu as pltpu

EPS = 1e-3      # BatchNorm2d(eps=0.001)
_LANE = 128


def _vmem_budget_bytes():
    """~60% of per-core VMEM (v5e/v6e: 128 MiB, v7x: 64 MiB); safe default."""
    try:
        cap = int(pltpu.get_tpu_info().vmem_capacity_bytes)
    except Exception:
        cap = 64 * 1024 * 1024
    return int(cap * 6 // 10)


# ----------------------------- fused single pass -----------------------------
def _fused_kernel(xa_ref, xb_ref, w_ref, gamma_ref, beta_ref, out_ref,
                  sum_ref, sq_ref, *, inv_m):
    """grid=(N,): per step compute y = W @ (xa+xb) for one batch image, store it
    (un-normalized) into the VMEM-resident output and accumulate per-channel
    sum / sum-of-squares; at the last step fold BN into y*scale+shift in place."""
    n = pl.program_id(0)

    @pl.when(n == 0)
    def _():
        sum_ref[...] = jnp.zeros_like(sum_ref)
        sq_ref[...] = jnp.zeros_like(sq_ref)

    x = xa_ref[...] + xb_ref[...]                                    # (Cin, HW)
    y = jnp.dot(w_ref[...], x, preferred_element_type=jnp.float32)   # (Cout, HW)
    out_ref[n] = y.astype(out_ref.dtype)

    sum_ref[...] += jnp.sum(y, axis=1, keepdims=True)                # (Cout, 1)
    sq_ref[...] += jnp.sum(y * y, axis=1, keepdims=True)             # (Cout, 1)

    @pl.when(n == pl.num_programs(0) - 1)
    def _():
        mean = sum_ref[...] * inv_m
        var = jnp.maximum(sq_ref[...] * inv_m - mean * mean, 0.0)    # biased var
        inv_std = jax.lax.rsqrt(var + EPS)
        scale = gamma_ref[...] * inv_std                             # (Cout, 1)
        shift = beta_ref[...] - mean * scale                         # (Cout, 1)
        out_ref[...] = (out_ref[...] * scale[None]
                        + shift[None]).astype(out_ref.dtype)


# ----------------------- streaming two-pass fallback -------------------------
def _stats_kernel(xa_ref, xb_ref, s_ref, g_ref, *, hw, tile_m):
    """Pass 1: accumulate input-side moments s = sum_cols(x) and G = x x^T with
    x = xa + xb; sum_y and sum_y^2 are recovered in the wrapper as W s and
    diag(W G W^T) -- Cout/Cin less MXU work than forming y, and no weight read."""
    first = jnp.logical_and(pl.program_id(0) == 0, pl.program_id(1) == 0)

    @pl.when(first)
    def _():
        s_ref[...] = jnp.zeros_like(s_ref)
        g_ref[...] = jnp.zeros_like(g_ref)

    x = (xa_ref[...] + xb_ref[...]).astype(jnp.float32)              # (Cin, tile_m)
    if hw % tile_m != 0:
        # Only the last M-tile has padded columns; mask built from a (1, tile_m)
        # iota (no-op select on every other tile).
        col = pl.program_id(1) * tile_m + jax.lax.broadcasted_iota(
            jnp.int32, (1, tile_m), 1)
        x = jnp.where(col < hw, x, 0.0)

    s_ref[...] += jnp.sum(x, axis=1, keepdims=True)                  # (Cin, 1)
    g_ref[...] += jax.lax.dot_general(                               # (Cin, Cin)
        x, x, (((1,), (1,)), ((), ())), preferred_element_type=jnp.float32)


def _apply_kernel(xa_ref, xb_ref, w_ref, scale_ref, shift_ref, o_ref):
    """Pass 2: y = W @ (xa+xb), then the folded BN affine, one M-tile per step."""
    x = xa_ref[...] + xb_ref[...]                                    # (Cin, tile_m)
    y = jnp.dot(w_ref[...], x, preferred_element_type=jnp.float32)   # (Cout, tile_m)
    o_ref[...] = (y * scale_ref[...] + shift_ref[...]).astype(o_ref.dtype)


# ----------------------------------- wrapper ---------------------------------
def add_conv1x1_bn(x130, x115, weight, gamma, beta, *, compute_dtype=None,
                   tile_m=None, force_two_pass=False):
    """x130, x115: (N, Cin, H, W); weight: (Cout, Cin[,1,1]); gamma/beta: (Cout,).
    Returns BatchNorm2d(Conv1x1(x130 + x115)) in training mode (batch statistics,
    biased variance, affine), shape (N, Cout, H, W)."""
    N, Cin, H, W = x130.shape
    Cout = weight.shape[0]
    HW = H * W
    inv_m = 1.0 / float(N * HW)

    cdt = (jnp.dtype(compute_dtype) if compute_dtype is not None
           else jnp.result_type(x130.dtype, x115.dtype, weight.dtype))
    isz = jnp.dtype(cdt).itemsize

    # Pure reshapes -- element order stays NCHW, no transposes anywhere.
    xa = x130.reshape(N, Cin, HW).astype(cdt)
    xb = x115.reshape(N, Cin, HW).astype(cdt)
    w = weight.reshape(Cout, Cin).astype(cdt)
    gamma32 = gamma.astype(jnp.float32)
    beta32 = beta.astype(jnp.float32)

    budget = _vmem_budget_bytes()
    # Fused-path VMEM estimate: resident output + f32 y/x temporaries +
    # double-buffered xa/xb blocks + weight + small per-channel vectors.
    fused_bytes = (N * Cout * HW * isz + Cout * HW * 4 + Cin * HW * 4
                   + 2 * 2 * Cin * HW * isz + Cout * Cin * isz + 4 * Cout * 4)

    if not force_two_pass and fused_bytes <= budget:
        out = pl.pallas_call(
            functools.partial(_fused_kernel, inv_m=inv_m),
            out_shape=jax.ShapeDtypeStruct((N, Cout, HW), cdt),
            grid=(N,),
            in_specs=[
                pl.BlockSpec((None, Cin, HW), lambda n: (n, 0, 0)),
                pl.BlockSpec((None, Cin, HW), lambda n: (n, 0, 0)),
                pl.BlockSpec((Cout, Cin), lambda n: (0, 0)),
                pl.BlockSpec((Cout, 1), lambda n: (0, 0)),
                pl.BlockSpec((Cout, 1), lambda n: (0, 0)),
            ],
            out_specs=pl.BlockSpec((N, Cout, HW), lambda n: (0, 0, 0)),
            scratch_shapes=[pltpu.VMEM((Cout, 1), jnp.float32),
                            pltpu.VMEM((Cout, 1), jnp.float32)],
            compiler_params=pltpu.CompilerParams(
                dimension_semantics=("arbitrary",),
                vmem_limit_bytes=budget),
        )(xa, xb, w, gamma32.reshape(Cout, 1), beta32.reshape(Cout, 1))
        return out.reshape(N, Cout, H, W)

    # --------------- two-pass streaming path (large problems) ----------------
    if tile_m is None:
        if HW <= 2048:
            tile_m = HW
        else:
            # Lane-aligned tile sized so pass-2's double-buffered streams
            # (xa, xb, out tiles) fit half the budget.
            per_col = 2 * (2 * Cin * isz + Cout * isz)
            tile_m = max(_LANE,
                         min(4096, budget // 2 // per_col) // _LANE * _LANE)
    n_mt = pl.cdiv(HW, tile_m)

    x_spec = pl.BlockSpec((None, Cin, tile_m), lambda n, mt: (n, 0, mt))
    vec_spec = pl.BlockSpec((Cout, 1), lambda n, mt: (0, 0))

    # Pass 1: input-side moments only (no Cout-sized matmul, no weight read).
    s, g = pl.pallas_call(
        functools.partial(_stats_kernel, hw=HW, tile_m=tile_m),
        out_shape=(jax.ShapeDtypeStruct((Cin, 1), jnp.float32),
                   jax.ShapeDtypeStruct((Cin, Cin), jnp.float32)),
        grid=(N, n_mt),
        in_specs=[x_spec, x_spec],
        out_specs=(pl.BlockSpec((Cin, 1), lambda n, mt: (0, 0)),
                   pl.BlockSpec((Cin, Cin), lambda n, mt: (0, 0))),
        compiler_params=pltpu.CompilerParams(
            dimension_semantics=("arbitrary", "arbitrary"),
            vmem_limit_bytes=budget),
    )(xa, xb)
    # TODO(synk): on v7x, split pass-1 M-tiles across the 2 TensorCores
    # (leading "parallel" axis with per-core partial s/G, reduced here).

    # Fold BN into one affine from the input-side moments (tiny XLA math).
    wf = w.astype(jnp.float32)
    sum_y = wf @ s.reshape(Cin)                        # (Cout,)
    sq_y = jnp.sum((wf @ g) * wf, axis=1)              # diag(W G W^T), (Cout,)
    mean = sum_y * inv_m
    var = jnp.maximum(sq_y * inv_m - mean * mean, 0.0)
    inv_std = jax.lax.rsqrt(var + EPS)
    scale = (gamma32 * inv_std).reshape(Cout, 1)
    shift = (beta32 - mean * gamma32 * inv_std).reshape(Cout, 1)

    # Pass 2: recompute y tile-by-tile and apply the folded affine.
    out = pl.pallas_call(
        _apply_kernel,
        out_shape=jax.ShapeDtypeStruct((N, Cout, HW), cdt),
        grid=(N, n_mt),
        in_specs=[x_spec, x_spec,
                  pl.BlockSpec((Cout, Cin), lambda n, mt: (0, 0)),
                  vec_spec, vec_spec],
        out_specs=pl.BlockSpec((None, Cout, tile_m), lambda n, mt: (n, 0, mt)),
        compiler_params=pltpu.CompilerParams(
            dimension_semantics=("parallel", "parallel"),
            vmem_limit_bytes=budget),
    )(xa, xb, w, scale, shift)
    return out.reshape(N, Cout, H, W)


def _reference(x130, x115, weight, gamma, beta):
    Cout, Cin = weight.shape[0], x130.shape[1]
    x = (x130 + x115).astype(jnp.float32)
    y = jnp.einsum("oc,nchw->nohw",
                   weight.reshape(Cout, Cin).astype(jnp.float32), x)
    mean = y.mean(axis=(0, 2, 3), keepdims=True)
    var = y.var(axis=(0, 2, 3), keepdims=True)     # biased, matches BN forward
    yn = (y - mean) * jax.lax.rsqrt(var + EPS)
    return yn * gamma.reshape(1, Cout, 1, 1) + beta.reshape(1, Cout, 1, 1)


if __name__ == "__main__":
    key = jax.random.PRNGKey(0)
    k1, k2, k3, k4, k5 = jax.random.split(key, 5)

    # Small shapes consistent with the module (channel sizes fixed by the conv).
    N, Cin, Cout, H, W = 2, 48, 288, 16, 16

    x130 = jax.random.normal(k1, (N, Cin, H, W), dtype=jnp.float32)
    x115 = jax.random.normal(k2, (N, Cin, H, W), dtype=jnp.float32)
    conv_w = jax.random.normal(k3, (Cout, Cin, 1, 1), dtype=jnp.float32) * 0.05
    gamma = 1.0 + 0.1 * jax.random.normal(k4, (Cout,), dtype=jnp.float32)
    beta = 0.1 * jax.random.normal(k5, (Cout,), dtype=jnp.float32)

    ref = _reference(x130, x115, conv_w, gamma, beta)

    # Default path: single fused kernel with the output resident in VMEM.
    out = add_conv1x1_bn(x130, x115, conv_w, gamma, beta)
    jax.block_until_ready(out)
    assert out.shape == (N, Cout, H, W)
    err = float(jnp.max(jnp.abs(out - ref)))
    assert jnp.allclose(out, ref, atol=2e-2, rtol=2e-2), err

    # Streaming two-pass fallback: multi-tile grid with a masked partial tile.
    x130s = jax.random.normal(k1, (N, Cin, 12, 12), dtype=jnp.float32)
    x115s = jax.random.normal(k2, (N, Cin, 12, 12), dtype=jnp.float32)
    refs = _reference(x130s, x115s, conv_w, gamma, beta)
    outs = add_conv1x1_bn(x130s, x115s, conv_w, gamma, beta,
                          force_two_pass=True, tile_m=128)
    jax.block_until_ready(outs)
    errs = float(jnp.max(jnp.abs(outs - refs)))
    assert jnp.allclose(outs, refs, atol=2e-2, rtol=2e-2), errs

    print("KERNEL_OK")
</pallas_src>

<mosaic_0001>
module attributes {stable_mosaic.version = 11 : i64} {
  func.func @_fused_kernel(%arg0: i32, %arg1: memref<1x48x256xf32, #tpu.memory_space<vmem>>, %arg2: memref<1x48x256xf32, #tpu.memory_space<vmem>>, %arg3: memref<288x48xf32, #tpu.memory_space<vmem>>, %arg4: memref<288x1xf32, #tpu.memory_space<vmem>>, %arg5: memref<288x1xf32, #tpu.memory_space<vmem>>, %arg6: memref<2x288x256xf32, #tpu.memory_space<vmem>>, %arg7: memref<288x1xf32, #tpu.memory_space<vmem>>, %arg8: memref<288x1xf32, #tpu.memory_space<vmem>>) attributes {dimension_semantics = [#tpu.dimension_semantics<arbitrary>], iteration_bounds = array<i64: 2>, scalar_prefetch = 0 : i64, scratch_operands = 2 : i64, tpu.core_type = #tpu.core_type<tc>, window_params = [{transform_indices = @transform_0, window_bounds = array<i64: 1, 48, 256>}, {transform_indices = @transform_1, window_bounds = array<i64: 1, 48, 256>}, {pipeline_mode = #tpu.pipeline_mode<synchronous>, transform_indices = @transform_2, window_bounds = array<i64: 288, 48>}, {pipeline_mode = #tpu.pipeline_mode<synchronous>, transform_indices = @transform_3, window_bounds = array<i64: 288, 1>}, {pipeline_mode = #tpu.pipeline_mode<synchronous>, transform_indices = @transform_4, window_bounds = array<i64: 288, 1>}, {pipeline_mode = #tpu.pipeline_mode<synchronous>, transform_indices = @transform_5, window_bounds = array<i64: 2, 288, 256>}]} {
    %c0_i32 = arith.constant 0 : i32
    %0 = arith.cmpi eq, %arg0, %c0_i32 : i32
    %1 = arith.extui %0 : i1 to i32
    %c0_i32_0 = arith.constant 0 : i32
    %2 = arith.cmpi ne, %1, %c0_i32_0 : i32
    scf.if %2 {
      %cst_21 = arith.constant 0.000000e+00 : f32
      %28 = vector.broadcast %cst_21 : f32 to vector<288x1xf32>
      %c0_22 = arith.constant 0 : index
      %c0_23 = arith.constant 0 : index
      %29 = vector.load %arg7[%c0_22, %c0_23] : memref<288x1xf32, #tpu.memory_space<vmem>>, vector<288x1xf32>
      tpu.vector_store %arg7[%c0_22, %c0_23], %28 {strides = array<i32>} : memref<288x1xf32, #tpu.memory_space<vmem>>, vector<288x1xf32>,
      %cst_24 = arith.constant 0.000000e+00 : f32
      %30 = vector.broadcast %cst_24 : f32 to vector<288x1xf32>
      %c0_25 = arith.constant 0 : index
      %c0_26 = arith.constant 0 : index
      %31 = vector.load %arg8[%c0_25, %c0_26] : memref<288x1xf32, #tpu.memory_space<vmem>>, vector<288x1xf32>
      tpu.vector_store %arg8[%c0_25, %c0_26], %30 {strides = array<i32>} : memref<288x1xf32, #tpu.memory_space<vmem>>, vector<288x1xf32>,
    } else {
    }
    %c0 = arith.constant 0 : index
    %c0_1 = arith.constant 0 : index
    %c0_2 = arith.constant 0 : index
    %3 = vector.load %arg1[%c0, %c0_1, %c0_2] : memref<1x48x256xf32, #tpu.memory_space<vmem>>, vector<1x48x256xf32>
    %4 = vector.shape_cast %3 : vector<1x48x256xf32> to vector<48x256xf32>
    %c0_3 = arith.constant 0 : index
    %c0_4 = arith.constant 0 : index
    %c0_5 = arith.constant 0 : index
    %5 = vector.load %arg2[%c0_3, %c0_4, %c0_5] : memref<1x48x256xf32, #tpu.memory_space<vmem>>, vector<1x48x256xf32>
    %6 = vector.shape_cast %5 : vector<1x48x256xf32> to vector<48x256xf32>
    %7 = arith.addf %4, %6 : vector<48x256xf32>
    %c0_6 = arith.constant 0 : index
    %c0_7 = arith.constant 0 : index
    %8 = vector.load %arg3[%c0_6, %c0_7] : memref<288x48xf32, #tpu.memory_space<vmem>>, vector<288x48xf32>
    %cst = arith.constant dense<0.000000e+00> : vector<288x256xf32>
    %9 = tpu.matmul %8, %7, %cst {dimension_numbers = #tpu.dot_dimension_numbers<[1], [0], [0], [1], [0, 0, 1, 1], [], []>} : vector<288x48xf32>, vector<48x256xf32>, vector<288x256xf32> -> vector<288x256xf32>
    %10 = arith.index_cast %arg0 : i32 to index
    %c0_8 = arith.constant 0 : index
    %c0_9 = arith.constant 0 : index
    %11 = vector.load %arg6[%10, %c0_8, %c0_9] : memref<2x288x256xf32, #tpu.memory_space<vmem>>, vector<1x288x256xf32>
    %12 = vector.shape_cast %11 : vector<1x288x256xf32> to vector<288x256xf32>
    %13 = vector.shape_cast %9 : vector<288x256xf32> to vector<1x288x256xf32>
    tpu.vector_store %arg6[%10, %c0_8, %c0_9], %13 {strides = array<i32>} : memref<2x288x256xf32, #tpu.memory_space<vmem>>, vector<1x288x256xf32>,
    %c0_10 = arith.constant 0 : index
    %c0_11 = arith.constant 0 : index
    %14 = vector.load %arg7[%c0_10, %c0_11] : memref<288x1xf32, #tpu.memory_space<vmem>>, vector<288x1xf32>
    %cst_12 = arith.constant dense<0.000000e+00> : vector<288xf32>
    %15 = vector.multi_reduction <add>, %9, %cst_12 [1] : vector<288x256xf32> to vector<288xf32>
    %16 = vector.shape_cast %15 : vector<288xf32> to vector<288x1xf32>
    %17 = arith.addf %14, %16 : vector<288x1xf32>
    %c0_13 = arith.constant 0 : index
    %c0_14 = arith.constant 0 : index
    %18 = vector.load %arg7[%c0_13, %c0_14] : memref<288x1xf32, #tpu.memory_space<vmem>>, vector<288x1xf32>
    tpu.vector_store %arg7[%c0_13, %c0_14], %17 {strides = array<i32>} : memref<288x1xf32, #tpu.memory_space<vmem>>, vector<288x1xf32>,
    %c0_15 = arith.constant 0 : index
    %c0_16 = arith.constant 0 : index
    %19 = vector.load %arg8[%c0_15, %c0_16] : memref<288x1xf32, #tpu.memory_space<vmem>>, vector<288x1xf32>
    %20 = arith.mulf %9, %9 : vector<288x256xf32>
    %cst_17 = arith.constant dense<0.000000e+00> : vector<288xf32>
    %21 = vector.multi_reduction <add>, %20, %cst_17 [1] : vector<288x256xf32> to vector<288xf32>
    %22 = vector.shape_cast %21 : vector<288xf32> to vector<288x1xf32>
    %23 = arith.addf %19, %22 : vector<288x1xf32>
    %c0_18 = arith.constant 0 : index
    %c0_19 = arith.constant 0 : index
    %24 = vector.load %arg8[%c0_18, %c0_19] : memref<288x1xf32, #tpu.memory_space<vmem>>, vector<288x1xf32>
    tpu.vector_store %arg8[%c0_18, %c0_19], %23 {strides = array<i32>} : memref<288x1xf32, #tpu.memory_space<vmem>>, vector<288x1xf32>,
    %c1_i32 = arith.constant 1 : i32
    %25 = arith.cmpi eq, %arg0, %c1_i32 : i32
    %26 = arith.extui %25 : i1 to i32
    %c0_i32_20 = arith.constant 0 : i32
    %27 = arith.cmpi ne, %26, %c0_i32_20 : i32
    scf.if %27 {
      %c0_21 = arith.constant 0 : index
      %c0_22 = arith.constant 0 : index
      %28 = vector.load %arg7[%c0_21, %c0_22] : memref<288x1xf32, #tpu.memory_space<vmem>>, vector<288x1xf32>
      %cst_23 = arith.constant 0.001953125 : f32
      %29 = vector.broadcast %cst_23 : f32 to vector<288x1xf32>
      %30 = arith.mulf %28, %29 : vector<288x1xf32>
      %c0_24 = arith.constant 0 : index
      %c0_25 = arith.constant 0 : index
      %31 = vector.load %arg8[%c0_24, %c0_25] : memref<288x1xf32, #tpu.memory_space<vmem>>, vector<288x1xf32>
      %cst_26 = arith.constant 0.001953125 : f32
      %32 = vector.broadcast %cst_26 : f32 to vector<288x1xf32>
      %33 = arith.mulf %31, %32 : vector<288x1xf32>
      %34 = arith.mulf %30, %30 : vector<288x1xf32>
      %35 = arith.subf %33, %34 : vector<288x1xf32>
      %cst_27 = arith.constant 0.000000e+00 : f32
      %36 = vector.broadcast %cst_27 : f32 to vector<288x1xf32>
      %37 = arith.maximumf %35, %36 : vector<288x1xf32>
      %cst_28 = arith.constant 1.000000e-03 : f32
      %38 = vector.broadcast %cst_28 : f32 to vector<288x1xf32>
      %39 = arith.addf %37, %38 : vector<288x1xf32>
      %40 = math.rsqrt %39 : vector<288x1xf32>
      %c0_29 = arith.constant 0 : index
      %c0_30 = arith.constant 0 : index
      %41 = vector.load %arg4[%c0_29, %c0_30] : memref<288x1xf32, #tpu.memory_space<vmem>>, vector<288x1xf32>
      %42 = arith.mulf %41, %40 : vector<288x1xf32>
      %c0_31 = arith.constant 0 : index
      %c0_32 = arith.constant 0 : index
      %43 = vector.load %arg5[%c0_31, %c0_32] : memref<288x1xf32, #tpu.memory_space<vmem>>, vector<288x1xf32>
      %44 = arith.mulf %30, %42 : vector<288x1xf32>
      %45 = arith.subf %43, %44 : vector<288x1xf32>
      %c0_33 = arith.constant 0 : index
      %c0_34 = arith.constant 0 : index
      %c0_35 = arith.constant 0 : index
      %46 = vector.load %arg6[%c0_33, %c0_34, %c0_35] : memref<2x288x256xf32, #tpu.memory_space<vmem>>, vector<2x288x256xf32>
      %47 = vector.shape_cast %42 : vector<288x1xf32> to vector<1x288x1xf32>
      %48 = vector.broadcast %47 : vector<1x288x1xf32> to vector<2x288x256xf32>
      %49 = arith.mulf %46, %48 : vector<2x288x256xf32>
      %50 = vector.shape_cast %45 : vector<288x1xf32> to vector<1x288x1xf32>
      %51 = vector.broadcast %50 : vector<1x288x1xf32> to vector<2x288x256xf32>
      %52 = arith.addf %49, %51 : vector<2x288x256xf32>
      %c0_36 = arith.constant 0 : index
      %c0_37 = arith.constant 0 : index
      %c0_38 = arith.constant 0 : index
      %53 = vector.load %arg6[%c0_36, %c0_37, %c0_38] : memref<2x288x256xf32, #tpu.memory_space<vmem>>, vector<2x288x256xf32>
      tpu.vector_store %arg6[%c0_36, %c0_37, %c0_38], %52 {strides = array<i32>} : memref<2x288x256xf32, #tpu.memory_space<vmem>>, vector<2x288x256xf32>,
    } else {
    }
    return
  }
  func.func @transform_0(%arg0: i32) -> (i32, i32, i32) {
    %c0_i32 = arith.constant 0 : i32
    %c0_i32_0 = arith.constant 0 : i32
    %c0_i32_1 = arith.constant 0 : i32
    return %arg0, %c0_i32, %c0_i32_0 : i32, i32, i32
  }
  func.func @transform_1(%arg0: i32) -> (i32, i32, i32) {
    %c0_i32 = arith.constant 0 : i32
    %c0_i32_0 = arith.constant 0 : i32
    %c0_i32_1 = arith.constant 0 : i32
    return %arg0, %c0_i32, %c0_i32_0 : i32, i32, i32
  }
  func.func @transform_2(%arg0: i32) -> (i32, i32) {
    %c0_i32 = arith.constant 0 : i32
    %c0_i32_0 = arith.constant 0 : i32
    %c0_i32_1 = arith.constant 0 : i32
    return %c0_i32, %c0_i32_0 : i32, i32
  }
  func.func @transform_3(%arg0: i32) -> (i32, i32) {
    %c0_i32 = arith.constant 0 : i32
    %c0_i32_0 = arith.constant 0 : i32
    %c0_i32_1 = arith.constant 0 : i32
    return %c0_i32, %c0_i32_0 : i32, i32
  }
  func.func @transform_4(%arg0: i32) -> (i32, i32) {
    %c0_i32 = arith.constant 0 : i32
    %c0_i32_0 = arith.constant 0 : i32
    %c0_i32_1 = arith.constant 0 : i32
    return %c0_i32, %c0_i32_0 : i32, i32
  }
  func.func @transform_5(%arg0: i32) -> (i32, i32, i32) {
    %c0_i32 = arith.constant 0 : i32
    %c0_i32_0 = arith.constant 0 : i32
    %c0_i32_1 = arith.constant 0 : i32
    %c0_i32_2 = arith.constant 0 : i32
    return %c0_i32, %c0_i32_0, %c0_i32_1 : i32, i32, i32
  }
}

</mosaic_0001>

<bundles_post_ra>
// kernel: tpu_custom_call.1
= control target key start
LH: loop header
LB: loop body
LE: loop exit
PB: predicated region body
PF: predicated region fallthrough
CT: control target
= control target key end

     0   :  { %10 = vsyncpa [#allocation5], 0  ;;  %s3085_s18 = smov 0   ;;  %s4739_s0 = inlined_call_operand.vmem [shape: f32[2,48,256], index: 0, kind: input, shape index: {}]   ;;  %s4740_s1 = inlined_call_operand.vmem [shape: f32[2,48,256], index: 1, kind: input, shape index: {}]   ;;  %s4741_s2 = inlined_call_operand.vmem [shape: f32[288,48], index: 2, kind: input, shape index: {}]   ;;  %s4742_s3 = inlined_call_operand.vmem [shape: f32[288,1], index: 3, kind: input, shape index: {}]   ;;  %s4743_s4 = inlined_call_operand.vmem [shape: f32[288,1], index: 4, kind: input, shape index: {}]   ;;  %s4744_s5 = inlined_call_operand.hbm [shape: f32[2,288,256], index: 5, kind: output, shape index: {}]  }
   0x1 LB: > { %s3091_s19 = sadd.s32 4294967295, %s3047_s18   ;;  %p2859_p0 = scmp.ge.s32.totalorder %s3047_s18, 1  ;;  %s3047_s18 = sphi %s3085_s18, %s16_s18  }
   0x2   : > { %p193_p1 = scmp.lt.s32.totalorder %s3047_s18, 3 }
   0x4   : > { %p194_p2 = pnand %p2859_p0, %p193_p1 }
   0x5   : > { %p221_p3 = scmp.lt.s32.totalorder (!%p194_p2), %s3091_s19, 1  ;;  %p2862_p4 = scmp.ne.s32.totalorder (!%p194_p2), %s3091_s19, 0 }
   0x6   : > { %197 = sbr.rel (%p194_p2) target bundleno = 877 (0x36d), region = 40 }
   0xb   : > { %s222_s20 = scalar_select %p221_p3, %s3091_s19, 1 }
   0xc   : > { %234 = sbr.rel (%p2862_p4) target bundleno = 54 (0x36), region = 44 }
   0xd   : > { %s2918_s21 = smul.u32 96, %s222_s20 }
   0xf   : > { %s3100_s24 = scalar_lea.vmem %s4739_s0, %s2918_s21  ;;  %s3105_s27 = scalar_lea.vmem %s4740_s1, %s2918_s21 }
  0x11   : > { %vm235_vm0 = vcmask 7168   ;;  %v3049_v0 = vmov 0.0  }
  0x12   : > { %236 = vst.msk [vmem:[#allocation2] sm:$0xff] %vm235_vm0, %v3049_v0  ;;  %237 = vst.msk [vmem:[#allocation2 + $0x8] sm:$0xff] %vm235_vm0, %v3049_v0 }
  0x13   : > { %238 = vst.msk [vmem:[#allocation2 + $0x10] sm:$0xff] %vm235_vm0, %v3049_v0  ;;  %239 = vst.msk [vmem:[#allocation2 + $0x18] sm:$0xff] %vm235_vm0, %v3049_v0 }
  0x14   : > { %240 = vst.msk [vmem:[#allocation2 + $0x20] sm:$0xff] %vm235_vm0, %v3049_v0  ;;  %241 = vst.msk [vmem:[#allocation2 + $0x28] sm:$0xff] %vm235_vm0, %v3049_v0 }
  0x15   : > { %242 = vst.msk [vmem:[#allocation2 + $0x30] sm:$0xff] %vm235_vm0, %v3049_v0  ;;  %243 = vst.msk [vmem:[#allocation2 + $0x38] sm:$0xff] %vm235_vm0, %v3049_v0 }
  0x16   : > { %244 = vst.msk [vmem:[#allocation2 + $0x40] sm:$0xff] %vm235_vm0, %v3049_v0  ;;  %245 = vst.msk [vmem:[#allocation2 + $0x48] sm:$0xff] %vm235_vm0, %v3049_v0 }
  0x17   : > { %246 = vst.msk [vmem:[#allocation2 + $0x50] sm:$0xff] %vm235_vm0, %v3049_v0  ;;  %247 = vst.msk [vmem:[#allocation2 + $0x58] sm:$0xff] %vm235_vm0, %v3049_v0 }
  0x18   : > { %248 = vst.msk [vmem:[#allocation2 + $0x60] sm:$0xff] %vm235_vm0, %v3049_v0  ;;  %249 = vst.msk [vmem:[#allocation2 + $0x68] sm:$0xff] %vm235_vm0, %v3049_v0 }
  0x19   : > { %250 = vst.msk [vmem:[#allocation2 + $0x70] sm:$0xff] %vm235_vm0, %v3049_v0  ;;  %251 = vst.msk [vmem:[#allocation2 + $0x78] sm:$0xff] %vm235_vm0, %v3049_v0 }
  0x1a   : > { %252 = vst.msk [vmem:[#allocation2 + $0x80] sm:$0xff] %vm235_vm0, %v3049_v0  ;;  %253 = vst.msk [vmem:[#allocation2 + $0x88] sm:$0xff] %vm235_vm0, %v3049_v0 }
  0x1b   : > { %254 = vst.msk [vmem:[#allocation2 + $0x90] sm:$0xff] %vm235_vm0, %v3049_v0  ;;  %255 = vst.msk [vmem:[#allocation2 + $0x98] sm:$0xff] %vm235_vm0, %v3049_v0 }
  0x1c   : > { %256 = vst.msk [vmem:[#allocation2 + $0xa0] sm:$0xff] %vm235_vm0, %v3049_v0  ;;  %257 = vst.msk [vmem:[#allocation2 + $0xa8] sm:$0xff] %vm235_vm0, %v3049_v0 }
  0x1d   : > { %258 = vst.msk [vmem:[#allocation2 + $0xb0] sm:$0xff] %vm235_vm0, %v3049_v0  ;;  %259 = vst.msk [vmem:[#allocation2 + $0xb8] sm:$0xff] %vm235_vm0, %v3049_v0 }
  0x1e   : > { %260 = vst.msk [vmem:[#allocation2 + $0xc0] sm:$0xff] %vm235_vm0, %v3049_v0  ;;  %261 = vst.msk [vmem:[#allocation2 + $0xc8] sm:$0xff] %vm235_vm0, %v3049_v0 }
  0x1f   : > { %262 = vst.msk [vmem:[#allocation2 + $0xd0] sm:$0xff] %vm235_vm0, %v3049_v0  ;;  %263 = vst.msk [vmem:[#allocation2 + $0xd8] sm:$0xff] %vm235_vm0, %v3049_v0 }
  0x20   : > { %264 = vst.msk [vmem:[#allocation2 + $0xe0] sm:$0xff] %vm235_vm0, %v3049_v0  ;;  %265 = vst.msk [vmem:[#allocation2 + $0xe8] sm:$0xff] %vm235_vm0, %v3049_v0 }
  0x21   : > { %266 = vst.msk [vmem:[#allocation2 + $0xf0] sm:$0xff] %vm235_vm0, %v3049_v0  ;;  %267 = vst.msk [vmem:[#allocation2 + $0xf8] sm:$0xff] %vm235_vm0, %v3049_v0 }
  0x22   : > { %268 = vst.msk [vmem:[#allocation2 + $0x100] sm:$0xff] %vm235_vm0, %v3049_v0  ;;  %269 = vst.msk [vmem:[#allocation2 + $0x108] sm:$0xff] %vm235_vm0, %v3049_v0 }
  0x23   : > { %270 = vst.msk [vmem:[#allocation2 + $0x110] sm:$0xff] %vm235_vm0, %v3049_v0  ;;  %271 = vst.msk [vmem:[#allocation2 + $0x118] sm:$0xff] %vm235_vm0, %v3049_v0 }
  0x24   : > { %272 = vst.msk [vmem:[#allocation3] sm:$0xff] %vm235_vm0, %v3049_v0  ;;  %273 = vst.msk [vmem:[#allocation3 + $0x8] sm:$0xff] %vm235_vm0, %v3049_v0 }
  0x25   : > { %274 = vst.msk [vmem:[#allocation3 + $0x10] sm:$0xff] %vm235_vm0, %v3049_v0  ;;  %275 = vst.msk [vmem:[#allocation3 + $0x18] sm:$0xff] %vm235_vm0, %v3049_v0 }
  0x26   : > { %276 = vst.msk [vmem:[#allocation3 + $0x20] sm:$0xff] %vm235_vm0, %v3049_v0  ;;  %277 = vst.msk [vmem:[#allocation3 + $0x28] sm:$0xff] %vm235_vm0, %v3049_v0 }
  0x27   : > { %278 = vst.msk [vmem:[#allocation3 + $0x30] sm:$0xff] %vm235_vm0, %v3049_v0  ;;  %279 = vst.msk [vmem:[#allocation3 + $0x38] sm:$0xff] %vm235_vm0, %v3049_v0 }
  0x28   : > { %280 = vst.msk [vmem:[#allocation3 + $0x40] sm:$0xff] %vm235_vm0, %v3049_v0  ;;  %281 = vst.msk [vmem:[#allocation3 + $0x48] sm:$0xff] %vm235_vm0, %v3049_v0 }
  0x29   : > { %282 = vst.msk [vmem:[#allocation3 + $0x50] sm:$0xff] %vm235_vm0, %v3049_v0  ;;  %283 = vst.msk [vmem:[#allocation3 + $0x58] sm:$0xff] %vm235_vm0, %v3049_v0 }
  0x2a   : > { %284 = vst.msk [vmem:[#allocation3 + $0x60] sm:$0xff] %vm235_vm0, %v3049_v0  ;;  %285 = vst.msk [vmem:[#allocation3 + $0x68] sm:$0xff] %vm235_vm0, %v3049_v0 }
  0x2b   : > { %286 = vst.msk [vmem:[#allocation3 + $0x70] sm:$0xff] %vm235_vm0, %v3049_v0  ;;  %287 = vst.msk [vmem:[#allocation3 + $0x78] sm:$0xff] %vm235_vm0, %v3049_v0 }
  0x2c   : > { %288 = vst.msk [vmem:[#allocation3 + $0x80] sm:$0xff] %vm235_vm0, %v3049_v0  ;;  %289 = vst.msk [vmem:[#allocation3 + $0x88] sm:$0xff] %vm235_vm0, %v3049_v0 }
  0x2d   : > { %290 = vst.msk [vmem:[#allocation3 + $0x90] sm:$0xff] %vm235_vm0, %v3049_v0  ;;  %291 = vst.msk [vmem:[#allocation3 + $0x98] sm:$0xff] %vm235_vm0, %v3049_v0 }
  0x2e   : > { %292 = vst.msk [vmem:[#allocation3 + $0xa0] sm:$0xff] %vm235_vm0, %v3049_v0  ;;  %293 = vst.msk [vmem:[#allocation3 + $0xa8] sm:$0xff] %vm235_vm0, %v3049_v0 }
  0x2f   : > { %294 = vst.msk [vmem:[#allocation3 + $0xb0] sm:$0xff] %vm235_vm0, %v3049_v0  ;;  %295 = vst.msk [vmem:[#allocation3 + $0xb8] sm:$0xff] %vm235_vm0, %v3049_v0 }
  0x30   : > { %296 = vst.msk [vmem:[#allocation3 + $0xc0] sm:$0xff] %vm235_vm0, %v3049_v0  ;;  %297 = vst.msk [vmem:[#allocation3 + $0xc8] sm:$0xff] %vm235_vm0, %v3049_v0 }
  0x31   : > { %298 = vst.msk [vmem:[#allocation3 + $0xd0] sm:$0xff] %vm235_vm0, %v3049_v0  ;;  %299 = vst.msk [vmem:[#allocation3 + $0xd8] sm:$0xff] %vm235_vm0, %v3049_v0 }
  0x32   : > { %300 = vst.msk [vmem:[#allocation3 + $0xe0] sm:$0xff] %vm235_vm0, %v3049_v0  ;;  %301 = vst.msk [vmem:[#allocation3 + $0xe8] sm:$0xff] %vm235_vm0, %v3049_v0 }
  0x33   : > { %302 = vst.msk [vmem:[#allocation3 + $0xf0] sm:$0xff] %vm235_vm0, %v3049_v0  ;;  %303 = vst.msk [vmem:[#allocation3 + $0xf8] sm:$0xff] %vm235_vm0, %v3049_v0 }
  0x34   : > { %304 = vst.msk [vmem:[#allocation3 + $0x100] sm:$0xff] %vm235_vm0, %v3049_v0  ;;  %305 = vst.msk [vmem:[#allocation3 + $0x108] sm:$0xff] %vm235_vm0, %v3049_v0 }
  0x35   : > { %306 = vst.msk [vmem:[#allocation3 + $0x110] sm:$0xff] %vm235_vm0, %v3049_v0  ;;  %307 = vst.msk [vmem:[#allocation3 + $0x118] sm:$0xff] %vm235_vm0, %v3049_v0 }
  0x36 PF: > { %v319_v1 = vld [vmem:[%s3100_s24 + $0x58] sm:$0xff]  ;;  %v318_v3 = vld [vmem:[%s3100_s24 + $0x50] sm:$0xff]  ;;  %v317_v6 = vld [vmem:[%s3100_s24 + $0x48] sm:$0xff]  ;;  %v3050_v8 = vmov 0.0   ;;  %vm380_vm1 = vcmask 392192   ;;  %s2905_s6 = smul.u32 576, %s3091_s19 }
  0x37   : > { %v331_v2 = vld [vmem:[%s3105_s27 + $0x58] sm:$0xff]  ;;  %v330_v5 = vld [vmem:[%s3105_s27 + $0x50] sm:$0xff]  ;;  %v329_v7 = vld [vmem:[%s3105_s27 + $0x48] sm:$0xff]  ;;  %553 = vmatprep.mubr.f32.mxu0 %v3050_v8  ;;  %661 = vmatprep.mubr.f32.mxu1 %v3050_v8  ;;  %vm1025_vm2 = vcmask 7168   ;;  %p2900_p5 = scmp.ne.s32.totalorder %s3091_s19, 1 }
  0x38   : > { %v343_v4 = vadd.f32 %v331_v2, %v319_v1  ;;  %v342_v9 = vadd.f32 %v330_v5, %v318_v3  ;;  %v341_v10 = vadd.f32 %v329_v7, %v317_v6  ;;  %v316_v11 = vld [vmem:[%s3100_s24 + $0x40] sm:$0xff]  ;;  %v315_v13 = vld [vmem:[%s3100_s24 + $0x38] sm:$0xff]  ;;  %v314_v16 = vld [vmem:[%s3100_s24 + $0x30] sm:$0xff]  ;;  %s3457_s7 = scalar_lea.vmem [#allocation4], %s2905_s6 }
  0x39   : > { %v328_v12 = vld [vmem:[%s3105_s27 + $0x40] sm:$0xff]  ;;  %v327_v15 = vld [vmem:[%s3105_s27 + $0x38] sm:$0xff]  ;;  %v326_v17 = vld [vmem:[%s3105_s27 + $0x30] sm:$0xff] }
  0x3a   : > { %509 = vmatprep.subr.mxu0 %v343_v4  ;;  %2906 = vmatprep.subr.mxu1 %v343_v4  ;;  %v340_v14 = vadd.f32 %v328_v12, %v316_v11  ;;  %v339_v18 = vadd.f32 %v327_v15, %v315_v13  ;;  %v338_v19 = vadd.f32 %v326_v17, %v314_v16  ;;  %v313_v20 = vld [vmem:[%s3100_s24 + $0x28] sm:$0xff]  ;;  %v312_v22 = vld [vmem:[%s3100_s24 + $0x20] sm:$0xff]  ;;  %v311_v25 = vld [vmem:[%s3100_s24 + $0x18] sm:$0xff] }
  0x3b   : > { %510 = vmatpush1.msra.mxu0 %v342_v9  ;;  %2912 = vmatpush1.msra.mxu1 %v342_v9  ;;  %v325_v21 = vld [vmem:[%s3105_s27 + $0x28] sm:$0xff]  ;;  %v324_v24 = vld [vmem:[%s3105_s27 + $0x20] sm:$0xff]  ;;  %v323_v26 = vld [vmem:[%s3105_s27 + $0x18] sm:$0xff] }
  0x3c   : > { %511 = vmatprep.subr.mxu0 %v341_v10  ;;  %2907 = vmatprep.subr.mxu1 %v341_v10  ;;  %v337_v23 = vadd.f32 %v325_v21, %v313_v20  ;;  %v336_v27 = vadd.f32 %v324_v24, %v312_v22  ;;  %v310_v28 = vld [vmem:[%s3100_s24 + $0x10] sm:$0xff]  ;;  %v309_v30 = vld [vmem:[%s3100_s24 + $0x8] sm:$0xff]  ;;  %v335_v31 = vadd.f32 %v323_v26, %v311_v25  ;;  %v308_v33 = vld [vmem:[%s3100_s24] sm:$0xff] }
  0x3d   : > { %512 = vmatpush1.msra.mxu0 %v340_v14  ;;  %2913 = vmatpush1.msra.mxu1 %v340_v14  ;;  %v322_v29 = vld [vmem:[%s3105_s27 + $0x10] sm:$0xff]  ;;  %v321_v32 = vld [vmem:[%s3105_s27 + $0x8] sm:$0xff]  ;;  %v320_v34 = vld [vmem:[%s3105_s27] sm:$0xff] }
  0x3e   : > { %513 = vmatprep.subr.mxu0 %v339_v18  ;;  %2908 = vmatprep.subr.mxu1 %v339_v18  ;;  %v334_v35 = vadd.f32 %v322_v29, %v310_v28  ;;  %v333_v36 = vadd.f32 %v321_v32, %v309_v30  ;;  %v332_v37 = vadd.f32 %v320_v34, %v308_v33  ;;  %v344_v38 = vld [vmem:[%s4741_s2] sm:$0xff]  ;;  %v362_v39 = vld [vmem:[%s4741_s2 + $0x90] sm:$0xff]  ;;  %v345_v40 = vld [vmem:[%s4741_s2 + $0x8] sm:$0xff] }
  0x3f   : > { %514 = vmatpush1.msra.mxu0 %v338_v19  ;;  %2914 = vmatpush1.msra.mxu1 %v338_v19  ;;  %v363_v41 = vld [vmem:[%s4741_s2 + $0x98] sm:$0xff]  ;;  %v346_v42 = vld [vmem:[%s4741_s2 + $0x10] sm:$0xff]  ;;  %v364_v43 = vld [vmem:[%s4741_s2 + $0xa0] sm:$0xff] }
  0x40   : > { %515 = vmatprep.subr.mxu0 %v337_v23  ;;  %2909 = vmatprep.subr.mxu1 %v337_v23  ;;  %v347_v44 = vld [vmem:[%s4741_s2 + $0x18] sm:$0xff]  ;;  %v365_v45 = vld [vmem:[%s4741_s2 + $0xa8] sm:$0xff]  ;;  %v348_v46 = vld [vmem:[%s4741_s2 + $0x20] sm:$0xff] }
  0x41   : > { %516 = vmatpush1.msra.mxu0 %v336_v27  ;;  %2915 = vmatpush1.msra.mxu1 %v336_v27  ;;  %v366_v47 = vld [vmem:[%s4741_s2 + $0xb0] sm:$0xff]  ;;  %v349_v48 = vld [vmem:[%s4741_s2 + $0x28] sm:$0xff]  ;;  %v367_v49 = vld [vmem:[%s4741_s2 + $0xb8] sm:$0xff] }
  0x42   : > { %517 = vmatprep.subr.mxu0 %v335_v31  ;;  %2910 = vmatprep.subr.mxu1 %v335_v31  ;;  %v350_v50 = vld [vmem:[%s4741_s2 + $0x30] sm:$0xff]  ;;  %v368_v51 = vld [vmem:[%s4741_s2 + $0xc0] sm:$0xff]  ;;  %v351_v52 = vld [vmem:[%s4741_s2 + $0x38] sm:$0xff] }
  0x43   : > { %518 = vmatpush1.msra.mxu0 %v334_v35  ;;  %2916 = vmatpush1.msra.mxu1 %v334_v35  ;;  %v369_v53 = vld [vmem:[%s4741_s2 + $0xc8] sm:$0xff]  ;;  %v352_v54 = vld [vmem:[%s4741_s2 + $0x40] sm:$0xff]  ;;  %v370_v55 = vld [vmem:[%s4741_s2 + $0xd0] sm:$0xff] }
  0x44   : > { %519 = vmatprep.subr.mxu0 %v333_v36  ;;  %2911 = vmatprep.subr.mxu1 %v333_v36  ;;  %v353_v56 = vld [vmem:[%s4741_s2 + $0x48] sm:$0xff]  ;;  %v371_v57 = vld [vmem:[%s4741_s2 + $0xd8] sm:$0xff]  ;;  %v354_v58 = vld [vmem:[%s4741_s2 + $0x50] sm:$0xff] }
  0x45   : > { %520 = vmatpush1.msra.mxu0 %v332_v37  ;;  %2917 = vmatpush1.msra.mxu1 %v332_v37  ;;  %v372_v59 = vld [vmem:[%s4741_s2 + $0xe0] sm:$0xff]  ;;  %v355_v60 = vld [vmem:[%s4741_s2 + $0x58] sm:$0xff]  ;;  %v373_v61 = vld [vmem:[%s4741_s2 + $0xe8] sm:$0xff] }
  0x46   : > { %2863 = vmatmul.mubr.msk.f32.vlgmr.msra.gmra.mxu0 %vm380_vm1, %v344_v38  ;;  %2881 = vmatmul.mubr.msk.f32.vlgmr.msra.gmra.mxu1 %vm380_vm1, %v362_v39  ;;  %v356_v62 = vld [vmem:[%s4741_s2 + $0x60] sm:$0xff]  ;;  %v374_v63 = vld [vmem:[%s4741_s2 + $0xf0] sm:$0xff]  ;;  %v357_v0 = vld [vmem:[%s4741_s2 + $0x68] sm:$0xff] }
  0x47   : > { %559 = vmatprep.mubr.f32.mxu0 %v3050_v8  ;;  %667 = vmatprep.mubr.f32.mxu1 %v3050_v8  ;;  %v375_v1 = vld [vmem:[%s4741_s2 + $0xf8] sm:$0xff]  ;;  %v358_v2 = vld [vmem:[%s4741_s2 + $0x70] sm:$0xff]  ;;  %v376_v3 = vld [vmem:[%s4741_s2 + $0x100] sm:$0xff] }
  0x48   : > { %v359_v4 = vld [vmem:[%s4741_s2 + $0x78] sm:$0xff]  ;;  %v377_v5 = vld [vmem:[%s4741_s2 + $0x108] sm:$0xff]  ;;  %v360_v6 = vld [vmem:[%s4741_s2 + $0x80] sm:$0xff] }
  0x49   : > { %v378_v7 = vld [vmem:[%s4741_s2 + $0x110] sm:$0xff]  ;;  %v361_v9 = vld [vmem:[%s4741_s2 + $0x88] sm:$0xff]  ;;  %v379_v10 = vld [vmem:[%s4741_s2 + $0x118] sm:$0xff] }
  0x4a   : > { %2864 = vmatmul.mubr.msk.f32.gmra.mxu0 %vm380_vm1, %v345_v40  ;;  %2882 = vmatmul.mubr.msk.f32.gmra.mxu1 %vm380_vm1, %v363_v41 }
  0x4b   : > { %565 = vmatprep.mubr.f32.mxu0 %v3050_v8  ;;  %673 = vmatprep.mubr.f32.mxu1 %v3050_v8 }
  0x4e   : > { %2865 = vmatmul.mubr.msk.f32.gmra.mxu0 %vm380_vm1, %v346_v42  ;;  %2883 = vmatmul.mubr.msk.f32.gmra.mxu1 %vm380_vm1, %v364_v43 }
  0x4f   : > { %571 = vmatprep.mubr.f32.mxu0 %v3050_v8  ;;  %679 = vmatprep.mubr.f32.mxu1 %v3050_v8 }
  0x52   : > { %2866 = vmatmul.mubr.msk.f32.gmra.mxu0 %vm380_vm1, %v347_v44  ;;  %2884 = vmatmul.mubr.msk.f32.gmra.mxu1 %vm380_vm1, %v365_v45 }
  0x53   : > { %577 = vmatprep.mubr.f32.mxu0 %v3050_v8  ;;  %685 = vmatprep.mubr.f32.mxu1 %v3050_v8 }
  0x56   : > { %2867 = vmatmul.mubr.msk.f32.gmra.mxu0 %vm380_vm1, %v348_v46  ;;  %2885 = vmatmul.mubr.msk.f32.gmra.mxu1 %vm380_vm1, %v366_v47 }
  0x57   : > { %583 = vmatprep.mubr.f32.mxu0 %v3050_v8  ;;  %691 = vmatprep.mubr.f32.mxu1 %v3050_v8 }
  0x5a   : > { %2868 = vmatmul.mubr.msk.f32.gmra.mxu0 %vm380_vm1, %v349_v48  ;;  %2886 = vmatmul.mubr.msk.f32.gmra.mxu1 %vm380_vm1, %v367_v49 }
  0x5b   : > { %589 = vmatprep.mubr.f32.mxu0 %v3050_v8  ;;  %697 = vmatprep.mubr.f32.mxu1 %v3050_v8 }
  0x5e   : > { %2869 = vmatmul.mubr.msk.f32.gmra.mxu0 %vm380_vm1, %v350_v50  ;;  %2887 = vmatmul.mubr.msk.f32.gmra.mxu1 %vm380_vm1, %v368_v51 }
  0x5f   : > { %595 = vmatprep.mubr.f32.mxu0 %v3050_v8  ;;  %703 = vmatprep.mubr.f32.mxu1 %v3050_v8 }
  0x62   : > { %2870 = vmatmul.mubr.msk.f32.gmra.mxu0 %vm380_vm1, %v351_v52  ;;  %2888 = vmatmul.mubr.msk.f32.gmra.mxu1 %vm380_vm1, %v369_v53 }
  0x63   : > { %601 = vmatprep.mubr.f32.mxu0 %v3050_v8  ;;  %709 = vmatprep.mubr.f32.mxu1 %v3050_v8 }
  0x66   : > { %2871 = vmatmul.mubr.msk.f32.gmra.mxu0 %vm380_vm1, %v352_v54  ;;  %2889 = vmatmul.mubr.msk.f32.gmra.mxu1 %vm380_vm1, %v370_v55 }
  0x67   : > { %607 = vmatprep.mubr.f32.mxu0 %v3050_v8  ;;  %715 = vmatprep.mubr.f32.mxu1 %v3050_v8 }
  0x6a   : > { %2872 = vmatmul.mubr.msk.f32.gmra.mxu0 %vm380_vm1, %v353_v56  ;;  %2890 = vmatmul.mubr.msk.f32.gmra.mxu1 %vm380_vm1, %v371_v57 }
  0x6b   : > { %613 = vmatprep.mubr.f32.mxu0 %v3050_v8  ;;  %721 = vmatprep.mubr.f32.mxu1 %v3050_v8 }
  0x6e   : > { %2873 = vmatmul.mubr.msk.f32.gmra.mxu0 %vm380_vm1, %v354_v58  ;;  %2891 = vmatmul.mubr.msk.f32.gmra.mxu1 %vm380_vm1, %v372_v59 }
  0x6f   : > { %619 = vmatprep.mubr.f32.mxu0 %v3050_v8  ;;  %727 = vmatprep.mubr.f32.mxu1 %v3050_v8 }
  0x72   : > { %2874 = vmatmul.mubr.msk.f32.gmra.mxu0 %vm380_vm1, %v355_v60  ;;  %2892 = vmatmul.mubr.msk.f32.gmra.mxu1 %vm380_vm1, %v373_v61 }
  0x73   : > { %625 = vmatprep.mubr.f32.mxu0 %v3050_v8  ;;  %733 = vmatprep.mubr.f32.mxu1 %v3050_v8 }
  0x76   : > { %2875 = vmatmul.mubr.msk.f32.gmra.mxu0 %vm380_vm1, %v356_v62  ;;  %2893 = vmatmul.mubr.msk.f32.gmra.mxu1 %vm380_vm1, %v374_v63 }
  0x77   : > { %631 = vmatprep.mubr.f32.mxu0 %v3050_v8  ;;  %739 = vmatprep.mubr.f32.mxu1 %v3050_v8 }
  0x7a   : > { %2876 = vmatmul.mubr.msk.f32.gmra.mxu0 %vm380_vm1, %v357_v0  ;;  %2894 = vmatmul.mubr.msk.f32.gmra.mxu1 %vm380_vm1, %v375_v1 }
  0x7b   : > { %637 = vmatprep.mubr.f32.mxu0 %v3050_v8  ;;  %745 = vmatprep.mubr.f32.mxu1 %v3050_v8 }
  0x7e   : > { %2877 = vmatmul.mubr.msk.f32.gmra.mxu0 %vm380_vm1, %v358_v2  ;;  %2895 = vmatmul.mubr.msk.f32.gmra.mxu1 %vm380_vm1, %v376_v3 }
  0x7f   : > { %643 = vmatprep.mubr.f32.mxu0 %v3050_v8  ;;  %751 = vmatprep.mubr.f32.mxu1 %v3050_v8 }
  0x82   : > { %2878 = vmatmul.mubr.msk.f32.gmra.mxu0 %vm380_vm1, %v359_v4  ;;  %2896 = vmatmul.mubr.msk.f32.gmra.mxu1 %vm380_vm1, %v377_v5 }
  0x83   : > { %649 = vmatprep.mubr.f32.mxu0 %v3050_v8  ;;  %757 = vmatprep.mubr.f32.mxu1 %v3050_v8 }
  0x86   : > { %2879 = vmatmul.mubr.msk.f32.gmra.mxu0 %vm380_vm1, %v360_v6  ;;  %2897 = vmatmul.mubr.msk.f32.gmra.mxu1 %vm380_vm1, %v378_v7 }
  0x87   : > { %655 = vmatprep.mubr.f32.mxu0 %v3050_v8  ;;  %763 = vmatprep.mubr.f32.mxu1 %v3050_v8 }
  0x8a   : > { %2880 = vmatmul.mubr.msk.f32.gmra.mxu0 %vm380_vm1, %v361_v9  ;;  %2898 = vmatmul.mubr.msk.f32.gmra.mxu1 %vm380_vm1, %v379_v10 }
 0x106   : > { %v555_v11 = vpop.f32.mrf.mxu0  ;;  %v663_v12 = vpop.f32.mrf.mxu1 }
 0x107   : > { %773 = vst [vmem:[%s3457_s7] sm:$0xff] %v555_v11  ;;  %809 = vst [vmem:[%s3457_s7 + $0x120] sm:$0xff] %v663_v12  ;;  %v1098_v20 = vmul.f32 %v555_v11, %v555_v11  ;;  %v1134_v35 = vmul.f32 %v663_v12, %v663_v12 }
 0x108   : > { %v557_v8 = vpop.f32.mrf.mxu0  ;;  %v665_v13 = vpop.f32.mrf.mxu1 }
 0x109   : > { %774 = vst [vmem:[%s3457_s7 + $0x8] sm:$0xff] %v557_v8  ;;  %810 = vst [vmem:[%s3457_s7 + $0x128] sm:$0xff] %v665_v13  ;;  %v881_v14 = vadd.f32 %v557_v8, %v555_v11  ;;  %v935_v19 = vadd.f32 %v665_v13, %v663_v12  ;;  %v1099_v22 = vmul.f32 %v557_v8, %v557_v8 }
 0x10a   : > { %v561_v15 = vpop.f32.mrf.mxu0  ;;  %v669_v16 = vpop.f32.mrf.mxu1  ;;  %v1135_v31 = vmul.f32 %v665_v13, %v665_v13 }
 0x10b   : > { %775 = vst [vmem:[%s3457_s7 + $0x10] sm:$0xff] %v561_v15  ;;  %811 = vst [vmem:[%s3457_s7 + $0x130] sm:$0xff] %v669_v16  ;;  %882 = vadd.xlane.f32.xlu0 %v881_v14  ;;  %v1100_v23 = vmul.f32 %v561_v15, %v561_v15  ;;  %v1170_v29 = vadd.f32 %v1099_v22, %v1098_v20  ;;  %v1136_v36 = vmul.f32 %v669_v16, %v669_v16 }
 0x10c   : > { %v563_v17 = vpop.f32.mrf.mxu0  ;;  %v671_v18 = vpop.f32.mrf.mxu1  ;;  %v1224_v39 = vadd.f32 %v1135_v31, %v1134_v35 }
 0x10d   : > { %776 = vst [vmem:[%s3457_s7 + $0x18] sm:$0xff] %v563_v17  ;;  %812 = vst [vmem:[%s3457_s7 + $0x138] sm:$0xff] %v671_v18  ;;  %v938_v21 = vadd.f32 %v671_v18, %v669_v16  ;;  %v1101_v24 = vmul.f32 %v563_v17, %v563_v17  ;;  %v1137_v32 = vmul.f32 %v671_v18, %v671_v18 }
 0x10e   : > { %v567_v25 = vpop.f32.mrf.mxu0  ;;  %v675_v26 = vpop.f32.mrf.mxu1  ;;  %v884_v45 = vadd.f32 %v563_v17, %v561_v15 }
 0x10f   : > { %939 = vadd.xlane.f32.xlu1 %v938_v21  ;;  %936 = vadd.xlane.f32.xlu0 %v935_v19  ;;  %777 = vst [vmem:[%s3457_s7 + $0x20] sm:$0xff] %v567_v25  ;;  %813 = vst [vmem:[%s3457_s7 + $0x140] sm:$0xff] %v675_v26  ;;  %v1173_v30 = vadd.f32 %v1101_v24, %v1100_v23  ;;  %v1227_v40 = vadd.f32 %v1137_v32, %v1136_v36 }
 0x110   : > { %v569_v27 = vpop.f32.mrf.mxu0  ;;  %v677_v28 = vpop.f32.mrf.mxu1  ;;  %v1102_v53 = vmul.f32 %v567_v25, %v567_v25  ;;  %v1138_v57 = vmul.f32 %v675_v26, %v675_v26 }
 0x111   : > { %778 = vst [vmem:[%s3457_s7 + $0x28] sm:$0xff] %v569_v27  ;;  %814 = vst [vmem:[%s3457_s7 + $0x148] sm:$0xff] %v677_v28  ;;  %v887_v46 = vadd.f32 %v569_v27, %v567_v25  ;;  %v941_v51 = vadd.f32 %v677_v28, %v675_v26  ;;  %v1103_v54 = vmul.f32 %v569_v27, %v569_v27 }
 0x112   : > { %v573_v33 = vpop.f32.mrf.mxu0  ;;  %v3471_v34 = vpop.f32.mrf.mxu1  ;;  %v1139_v58 = vmul.f32 %v677_v28, %v677_v28 }
 0x113   : > { %1171 = vadd.xlane.f32.xlu0 %v1170_v29  ;;  %1174 = vadd.xlane.f32.xlu1 %v1173_v30  ;;  %779 = vst [vmem:[%s3457_s7 + $0x30] sm:$0xff] %v573_v33  ;;  %815 = vst [vmem:[%s3457_s7 + $0x150] sm:$0xff] %v3471_v34  ;;  %v1176_v61 = vadd.f32 %v1103_v54, %v1102_v53  ;;  %v1104_v63 = vmul.f32 %v573_v33, %v573_v33 }
 0x114   : > { %v575_v37 = vpop.f32.mrf.mxu0  ;;  %v683_v38 = vpop.f32.mrf.mxu1  ;;  %v1230_v5 = vadd.f32 %v1139_v58, %v1138_v57  ;;  %v1140_v7 = vmul.f32 %v3471_v34, %v3471_v34 }
 0x115   : > { %780 = vst [vmem:[%s3457_s7 + $0x38] sm:$0xff] %v575_v37  ;;  %816 = vst [vmem:[%s3457_s7 + $0x158] sm:$0xff] %v683_v38  ;;  %v890_v52 = vadd.f32 %v575_v37, %v573_v33  ;;  %v944_v62 = vadd.f32 %v683_v38, %v3471_v34  ;;  %v1105_v0 = vmul.f32 %v575_v37, %v575_v37 }
 0x116   : > { %v3478_v41 = vpop.f32.mrf.mxu0  ;;  %v3480_v42 = vpop.f32.mrf.mxu1  ;;  %v1141_v9 = vmul.f32 %v683_v38, %v683_v38 }
 0x117   : > { %1225 = vadd.xlane.f32.xlu0 %v1224_v39  ;;  %1228 = vadd.xlane.f32.xlu1 %v1227_v40  ;;  %781 = vst [vmem:[%s3457_s7 + $0x40] sm:$0xff] %v3478_v41  ;;  %817 = vst [vmem:[%s3457_s7 + $0x160] sm:$0xff] %v3480_v42  ;;  %v1179_v6 = vadd.f32 %v1105_v0, %v1104_v63  ;;  %v1106_v21 = vmul.f32 %v3478_v41, %v3478_v41 }
 0x118   : > { %v3486_v43 = vpop.f32.mrf.mxu0  ;;  %v3488_v44 = vpop.f32.mrf.mxu1  ;;  %v1233_v13 = vadd.f32 %v1141_v9, %v1140_v7  ;;  %v1142_v25 = vmul.f32 %v3480_v42, %v3480_v42 }
 0x119   : > { %782 = vst [vmem:[%s3457_s7 + $0x48] sm:$0xff] %v3486_v43  ;;  %818 = vst [vmem:[%s3457_s7 + $0x168] sm:$0xff] %v3488_v44  ;;  %v893_v14 = vadd.f32 %v3486_v43, %v3478_v41  ;;  %v947_v19 = vadd.f32 %v3488_v44, %v3480_v42  ;;  %v1107_v22 = vmul.f32 %v3486_v43, %v3486_v43 }
 0x11a   : > { %v3494_v47 = vpop.f32.mrf.mxu0  ;;  %v3496_v48 = vpop.f32.mrf.mxu1  ;;  %v1143_v26 = vmul.f32 %v3488_v44, %v3488_v44 }
 0x11b   : > { %885 = vadd.xlane.f32.xlu0 %v884_v45  ;;  %888 = vadd.xlane.f32.xlu1 %v887_v46  ;;  %783 = vst [vmem:[%s3457_s7 + $0x50] sm:$0xff] %v3494_v47  ;;  %819 = vst [vmem:[%s3457_s7 + $0x170] sm:$0xff] %v3496_v48  ;;  %v1182_v29 = vadd.f32 %v1107_v22, %v1106_v21  ;;  %v1108_v31 = vmul.f32 %v3494_v47, %v3494_v47 }
 0x11c   : > { %v3502_v49 = vpop.f32.mrf.mxu0  ;;  %v3504_v50 = vpop.f32.mrf.mxu1  ;;  %v1236_v37 = vadd.f32 %v1143_v26, %v1142_v25  ;;  %v1144_v39 = vmul.f32 %v3496_v48, %v3496_v48 }
 0x11d   : > { %784 = vst [vmem:[%s3457_s7 + $0x58] sm:$0xff] %v3502_v49  ;;  %820 = vst [vmem:[%s3457_s7 + $0x178] sm:$0xff] %v3504_v50  ;;  %v896_v20 = vadd.f32 %v3502_v49, %v3494_v47  ;;  %v950_v30 = vadd.f32 %v3504_v50, %v3496_v48  ;;  %v1109_v32 = vmul.f32 %v3502_v49, %v3502_v49 }
 0x11e   : > { %v3510_v55 = vpop.f32.mrf.mxu0  ;;  %v3512_v56 = vpop.f32.mrf.mxu1  ;;  %v1145_v40 = vmul.f32 %v3504_v50, %v3504_v50 }
 0x11f   : > { %942 = vadd.xlane.f32.xlu0 %v941_v51  ;;  %891 = vadd.xlane.f32.xlu1 %v890_v52  ;;  %785 = vst [vmem:[%s3457_s7 + $0x60] sm:$0xff] %v3510_v55  ;;  %821 = vst [vmem:[%s3457_s7 + $0x180] sm:$0xff] %v3512_v56  ;;  %v1185_v38 = vadd.f32 %v1109_v32, %v1108_v31  ;;  %v1110_v49 = vmul.f32 %v3510_v55, %v3510_v55 }
 0x120   : > { %v3518_v59 = vpop.f32.mrf.mxu0  ;;  %v3520_v60 = vpop.f32.mrf.mxu1  ;;  %v1239_v45 = vadd.f32 %v1145_v40, %v1144_v39 }
 0x121   : > { %786 = vst [vmem:[%s3457_s7 + $0x68] sm:$0xff] %v3518_v59  ;;  %822 = vst [vmem:[%s3457_s7 + $0x188] sm:$0xff] %v3520_v60  ;;  %v899_v46 = vadd.f32 %v3518_v59, %v3510_v55  ;;  %v1111_v50 = vmul.f32 %v3518_v59, %v3518_v59  ;;  %v953_v53 = vadd.f32 %v3520_v60, %v3512_v56 }
 0x122   : > { %v3527_v1 = vpop.f32.mrf.mxu0  ;;  %v3529_v2 = vpop.f32.mrf.mxu1  ;;  %v1146_v59 = vmul.f32 %v3512_v56, %v3512_v56 }
 0x123   : > { %1177 = vadd.xlane.f32.xlu0 %v1176_v61  ;;  %945 = vadd.xlane.f32.xlu1 %v944_v62  ;;  %787 = vst [vmem:[%s3457_s7 + $0x70] sm:$0xff] %v3527_v1  ;;  %823 = vst [vmem:[%s3457_s7 + $0x190] sm:$0xff] %v3529_v2  ;;  %v1188_v58 = vadd.f32 %v1111_v50, %v1110_v49  ;;  %v1147_v61 = vmul.f32 %v3520_v60, %v3520_v60 }
 0x124   : > { %v3535_v3 = vpop.f32.mrf.mxu0  ;;  %v3537_v4 = vpop.f32.mrf.mxu1 }
 0x125   : > { %788 = vst [vmem:[%s3457_s7 + $0x78] sm:$0xff] %v3535_v3  ;;  %824 = vst [vmem:[%s3457_s7 + $0x198] sm:$0xff] %v3537_v4  ;;  %v902_v54 = vadd.f32 %v3535_v3, %v3527_v1  ;;  %v1113_v56 = vmul.f32 %v3535_v3, %v3535_v3  ;;  %v1148_v3 = vmul.f32 %v3529_v2, %v3529_v2 }
 0x126   : > { %v3545_v10 = vpop.f32.mrf.mxu0  ;;  %v3547_v11 = vpop.f32.mrf.mxu1  ;;  %v1242_v21 = vadd.f32 %v1147_v61, %v1146_v59 }
 0x127   : > { %1231 = vadd.xlane.f32.xlu0 %v1230_v5  ;;  %1180 = vadd.xlane.f32.xlu1 %v1179_v6  ;;  %789 = vst [vmem:[%s3457_s7 + $0x80] sm:$0xff] %v3545_v10  ;;  %825 = vst [vmem:[%s3457_s7 + $0x1a0] sm:$0xff] %v3547_v11  ;;  %v956_v5 = vadd.f32 %v3537_v4, %v3529_v2  ;;  %v1112_v6 = vmul.f32 %v3527_v1, %v3527_v1 }
 0x128   : > { %v3553_v12 = vpop.f32.mrf.mxu0  ;;  %v3555_v8 = vpop.f32.mrf.mxu1  ;;  %v1114_v49 = vmul.f32 %v3545_v10, %v3545_v10 }
 0x129   : > { %790 = vst [vmem:[%s3457_s7 + $0x88] sm:$0xff] %v3553_v12  ;;  %826 = vst [vmem:[%s3457_s7 + $0x1a8] sm:$0xff] %v3555_v8  ;;  %v1191_v22 = vadd.f32 %v1113_v56, %v1112_v6  ;;  %v905_v31 = vadd.f32 %v3553_v12, %v3545_v10  ;;  %v959_v61 = vadd.f32 %v3555_v8, %v3547_v11 }
 0x12a   : > { %v3563_v15 = vpop.f32.mrf.mxu0  ;;  %v3565_v16 = vpop.f32.mrf.mxu1  ;;  %v1115_v10 = vmul.f32 %v3553_v12, %v3553_v12  ;;  %v1150_v12 = vmul.f32 %v3547_v11, %v3547_v11 }
 0x12b   : > { %1234 = vadd.xlane.f32.xlu1 %v1233_v13  ;;  %894 = vadd.xlane.f32.xlu0 %v893_v14  ;;  %791 = vst [vmem:[%s3457_s7 + $0x90] sm:$0xff] %v3563_v15  ;;  %827 = vst [vmem:[%s3457_s7 + $0x1b0] sm:$0xff] %v3565_v16  ;;  %v1149_v13 = vmul.f32 %v3537_v4, %v3537_v4  ;;  %v1152_v11 = vmul.f32 %v3565_v16, %v3565_v16 }
 0x12c   : > { %v3571_v17 = vpop.f32.mrf.mxu0  ;;  %v3573_v18 = vpop.f32.mrf.mxu1 }
 0x12d   : > { %792 = vst [vmem:[%s3457_s7 + $0x98] sm:$0xff] %v3571_v17  ;;  %828 = vst [vmem:[%s3457_s7 + $0x1b8] sm:$0xff] %v3573_v18 }
 0x12e   : > { %v3587_v23 = vpop.f32.mrf.mxu0  ;;  %v3589_v24 = vpop.f32.mrf.mxu1 }
 0x12f   : > { %948 = vadd.xlane.f32.xlu0 %v947_v19  ;;  %897 = vadd.xlane.f32.xlu1 %v896_v20  ;;  %793 = vst [vmem:[%s3457_s7 + $0xa0] sm:$0xff] %v3587_v23  ;;  %829 = vst [vmem:[%s3457_s7 + $0x1c0] sm:$0xff] %v3589_v24 }
 0x130   : > { %v3599_v27 = vpop.f32.mrf.mxu0  ;;  %v3601_v28 = vpop.f32.mrf.mxu1 }
 0x131   : > { %794 = vst [vmem:[%s3457_s7 + $0xa8] sm:$0xff] %v3599_v27  ;;  %830 = vst [vmem:[%s3457_s7 + $0x1c8] sm:$0xff] %v3601_v28 }
 0x132   : > { %v3613_v33 = vpop.f32.mrf.mxu0  ;;  %v3615_v34 = vpop.f32.mrf.mxu1 }
 0x133   : > { %1183 = vadd.xlane.f32.xlu0 %v1182_v29  ;;  %951 = vadd.xlane.f32.xlu1 %v950_v30  ;;  %795 = vst [vmem:[%s3457_s7 + $0xb0] sm:$0xff] %v3613_v33  ;;  %831 = vst [vmem:[%s3457_s7 + $0x1d0] sm:$0xff] %v3615_v34  ;;  %v1245_v30 = vadd.f32 %v1149_v13, %v1148_v3 }
 0x134   : > { %v3621_v35 = vpop.f32.mrf.mxu0  ;;  %v3623_v36 = vpop.f32.mrf.mxu1 }
 0x135   : > { %796 = vst [vmem:[%s3457_s7 + $0xb8] sm:$0xff] %v3621_v35  ;;  %832 = vst [vmem:[%s3457_s7 + $0x1d8] sm:$0xff] %v3623_v36 }
 0x136   : > { %v3633_v41 = vpop.f32.mrf.mxu0  ;;  %v3635_v42 = vpop.f32.mrf.mxu1 }
 0x137   : > { %1237 = vadd.xlane.f32.xlu0 %v1236_v37  ;;  %1186 = vadd.xlane.f32.xlu1 %v1185_v38  ;;  %797 = vst [vmem:[%s3457_s7 + $0xc0] sm:$0xff] %v3633_v41  ;;  %833 = vst [vmem:[%s3457_s7 + $0x1e0] sm:$0xff] %v3635_v42 }
 0x138   : > { %v3641_v43 = vpop.f32.mrf.mxu0  ;;  %v3643_v44 = vpop.f32.mrf.mxu1 }
 0x139   : > { %798 = vst [vmem:[%s3457_s7 + $0xc8] sm:$0xff] %v3641_v43  ;;  %834 = vst [vmem:[%s3457_s7 + $0x1e8] sm:$0xff] %v3643_v44 }
 0x13a   : > { %v3651_v47 = vpop.f32.mrf.mxu0  ;;  %v3653_v48 = vpop.f32.mrf.mxu1 }
 0x13b   : > { %1240 = vadd.xlane.f32.xlu1 %v1239_v45  ;;  %900 = vadd.xlane.f32.xlu0 %v899_v46  ;;  %799 = vst [vmem:[%s3457_s7 + $0xd0] sm:$0xff] %v3651_v47  ;;  %835 = vst [vmem:[%s3457_s7 + $0x1f0] sm:$0xff] %v3653_v48 }
 0x13c   : > { %v3663_v51 = vpop.f32.mrf.mxu0  ;;  %v3665_v52 = vpop.f32.mrf.mxu1 }
 0x13d   : > { %800 = vst [vmem:[%s3457_s7 + $0xd8] sm:$0xff] %v3663_v51  ;;  %836 = vst [vmem:[%s3457_s7 + $0x1f8] sm:$0xff] %v3665_v52 }
 0x13e   : > { %v3675_v57 = vpop.f32.mrf.mxu0  ;;  %v3677_v55 = vpop.f32.mrf.mxu1 }
 0x13f   : > { %954 = vadd.xlane.f32.xlu0 %v953_v53  ;;  %903 = vadd.xlane.f32.xlu1 %v902_v54  ;;  %801 = vst [vmem:[%s3457_s7 + $0xe0] sm:$0xff] %v3675_v57  ;;  %837 = vst [vmem:[%s3457_s7 + $0x200] sm:$0xff] %v3677_v55  ;;  %v1162_v0 = vmul.f32 %v3677_v55, %v3677_v55 }
 0x140   : > { %v3687_v62 = vpop.f32.mrf.mxu0  ;;  %v3689_v63 = vpop.f32.mrf.mxu1 }
 0x141   : > { %802 = vst [vmem:[%s3457_s7 + $0xe8] sm:$0xff] %v3687_v62  ;;  %838 = vst [vmem:[%s3457_s7 + $0x208] sm:$0xff] %v3689_v63  ;;  %v1163_v60 = vmul.f32 %v3689_v63, %v3689_v63 }
 0x142   : > { %v3705_v7 = vpop.f32.mrf.mxu0  ;;  %v3707_v9 = vpop.f32.mrf.mxu1 }
 0x143   : > { %1189 = vadd.xlane.f32.xlu0 %v1188_v58  ;;  %957 = vadd.xlane.f32.xlu1 %v956_v5  ;;  %803 = vst [vmem:[%s3457_s7 + $0xf0] sm:$0xff] %v3705_v7  ;;  %839 = vst [vmem:[%s3457_s7 + $0x210] sm:$0xff] %v3707_v9  ;;  %v3713_v1 = vadd.f32 %v1163_v60, %v1162_v0  ;;  %v1164_v20 = vmul.f32 %v3707_v9, %v3707_v9 }
 0x144   : > { %v3719_v14 = vpop.f32.mrf.mxu0  ;;  %v3721_v19 = vpop.f32.mrf.mxu1  ;;  %v908_v0 = vadd.f32 %v3571_v17, %v3563_v15 }
 0x145   : > { %804 = vst [vmem:[%s3457_s7 + $0xf8] sm:$0xff] %v3719_v14  ;;  %840 = vst [vmem:[%s3457_s7 + $0x218] sm:$0xff] %v3721_v19  ;;  %v1165_v2 = vmul.f32 %v3721_v19, %v3721_v19 }
 0x146   : > { %v651_v25 = vpop.f32.mrf.mxu0  ;;  %v759_v4 = vpop.f32.mrf.mxu1 }
 0x147   : > { %1243 = vadd.xlane.f32.xlu0 %v1242_v21  ;;  %1192 = vadd.xlane.f32.xlu1 %v1191_v22  ;;  %805 = vst [vmem:[%s3457_s7 + $0x100] sm:$0xff] %v651_v25  ;;  %841 = vst [vmem:[%s3457_s7 + $0x220] sm:$0xff] %v759_v4  ;;  %v3733_v26 = vadd.f32 %v1165_v2, %v1164_v20  ;;  %v1130_v29 = vmul.f32 %v651_v25, %v651_v25 }
 0x148   : > { %v653_v32 = vpop.f32.mrf.mxu0  ;;  %v761_v37 = vpop.f32.mrf.mxu1  ;;  %v1166_v38 = vmul.f32 %v759_v4, %v759_v4  ;;  %v1151_v2 = vmul.f32 %v3555_v8, %v3555_v8  ;;  %v1153_v8 = vmul.f32 %v3573_v18, %v3573_v18 }
 0x149   : > { %806 = vst [vmem:[%s3457_s7 + $0x108] sm:$0xff] %v653_v32  ;;  %842 = vst [vmem:[%s3457_s7 + $0x228] sm:$0xff] %v761_v37  ;;  %v3739_v39 = vadd.f32 %v653_v32, %v651_v25  ;;  %v3741_v40 = vadd.f32 %v761_v37, %v759_v4  ;;  %v1131_v45 = vmul.f32 %v653_v32, %v653_v32 }
 0x14a   : > { %v1167_v46 = vmul.f32 %v761_v37, %v761_v37  ;;  %v657_v50 = vpop.f32.mrf.mxu0  ;;  %v765_v53 = vpop.f32.mrf.mxu1  ;;  %v1194_v25 = vadd.f32 %v1115_v10, %v1114_v49  ;;  %v962_v4 = vadd.f32 %v3573_v18, %v3565_v16  ;;  %v1251_v37 = vadd.f32 %v1153_v8, %v1152_v11 }
 0x14b   : > { %1246 = vadd.xlane.f32.xlu1 %v1245_v30  ;;  %906 = vadd.xlane.f32.xlu0 %v905_v31  ;;  %807 = vst [vmem:[%s3457_s7 + $0x110] sm:$0xff] %v657_v50  ;;  %843 = vst [vmem:[%s3457_s7 + $0x230] sm:$0xff] %v765_v53  ;;  %v3747_v54 = vadd.f32 %v1131_v45, %v1130_v29  ;;  %v1132_v59 = vmul.f32 %v657_v50, %v657_v50 }
 0x14c   : > { %v3749_v58 = vadd.f32 %v1167_v46, %v1166_v38  ;;  %v659_v5 = vpop.f32.mrf.mxu0  ;;  %v767_v6 = vpop.f32.mrf.mxu1  ;;  %v1168_v56 = vmul.f32 %v765_v53, %v765_v53  ;;  %v1116_v29 = vmul.f32 %v3563_v15, %v3563_v15  ;;  %v1117_v30 = vmul.f32 %v3571_v17, %v3571_v17 }
 0x14d   : > { %808 = vst [vmem:[%s3457_s7 + $0x118] sm:$0xff] %v659_v5  ;;  %v1133_v60 = vmul.f32 %v659_v5, %v659_v5  ;;  %844 = vst [vmem:[%s3457_s7 + $0x238] sm:$0xff] %v767_v6  ;;  %v1169_v3 = vmul.f32 %v767_v6, %v767_v6  ;;  %v3759_v13 = vadd.f32 %v659_v5, %v657_v50 }
 0x14e   : > { %v3761_v20 = vadd.f32 %v767_v6, %v765_v53  ;;  %v1248_v31 = vadd.f32 %v1151_v2, %v1150_v12  ;;  %v1197_v32 = vadd.f32 %v1117_v30, %v1116_v29  ;;  %v911_v38 = vadd.f32 %v3599_v27, %v3587_v23 }
 0x14f   : > { %960 = vadd.xlane.f32.xlu0 %v959_v61  ;;  %909 = vadd.xlane.f32.xlu1 %v908_v0  ;;  %v3763_v21 = vadd.f32 %v1133_v60, %v1132_v59  ;;  %v3765_v22 = vadd.f32 %v1169_v3, %v1168_v56  ;;  %v965_v15 = vadd.f32 %v3601_v28, %v3589_v24 }
 0x150   : > { %v914_v17 = vadd.f32 %v3621_v35, %v3613_v33  ;;  %v1118_v16 = vmul.f32 %v3587_v23, %v3587_v23  ;;  %v1119_v18 = vmul.f32 %v3599_v27, %v3599_v27  ;;  %v1154_v45 = vmul.f32 %v3589_v24, %v3589_v24 }
 0x151   : > { %v1155_v46 = vmul.f32 %v3601_v28, %v3601_v28  ;;  %v968_v50 = vadd.f32 %v3623_v36, %v3615_v34  ;;  %v1120_v53 = vmul.f32 %v3613_v33, %v3613_v33  ;;  %v1121_v23 = vmul.f32 %v3621_v35, %v3621_v35 }
 0x152   : > { %v1200_v49 = vadd.f32 %v1119_v18, %v1118_v16  ;;  %v1156_v24 = vmul.f32 %v3615_v34, %v3615_v34  ;;  %v1157_v28 = vmul.f32 %v3623_v36, %v3623_v36  ;;  %v917_v0 = vadd.f32 %v3641_v43, %v3633_v41 }
 0x153   : > { %1195 = vadd.xlane.f32.xlu0 %v1194_v25  ;;  %963 = vadd.xlane.f32.xlu1 %v962_v4  ;;  %v1254_v27 = vadd.f32 %v1155_v46, %v1154_v45  ;;  %v1203_v59 = vadd.f32 %v1121_v23, %v1120_v53  ;;  %v971_v33 = vadd.f32 %v3643_v44, %v3635_v42  ;;  %v865_v45 = vld [vmem:[#allocation2 + $0xa0] sm:$0xff]  ;;  %v848_v46 = vld [vmem:[#allocation2 + $0x18] sm:$0xff] }
 0x154   : > { %v1257_v61 = vadd.f32 %v1157_v28, %v1156_v24  ;;  %v920_v35 = vadd.f32 %v3663_v51, %v3651_v47  ;;  %v1122_v34 = vmul.f32 %v3633_v41, %v3633_v41  ;;  %v1123_v36 = vmul.f32 %v3641_v43, %v3641_v43 }
 0x155   : > { %v1158_v10 = vmul.f32 %v3635_v42, %v3635_v42  ;;  %v1159_v5 = vmul.f32 %v3643_v44, %v3643_v44  ;;  %v974_v56 = vadd.f32 %v3665_v52, %v3653_v48  ;;  %v1124_v60 = vmul.f32 %v3651_v47, %v3651_v47 }
 0x156   : > { %v1206_v6 = vadd.f32 %v1123_v36, %v1122_v34  ;;  %v1125_v41 = vmul.f32 %v3663_v51, %v3663_v51  ;;  %v1160_v42 = vmul.f32 %v3653_v48, %v3653_v48  ;;  %v1161_v44 = vmul.f32 %v3665_v52, %v3665_v52 }
 0x157   : > { %1249 = vadd.xlane.f32.xlu0 %v1248_v31  ;;  %1198 = vadd.xlane.f32.xlu1 %v1197_v32  ;;  %v1260_v43 = vadd.f32 %v1159_v5, %v1158_v10  ;;  %v923_v2 = vadd.f32 %v3687_v62, %v3675_v57  ;;  %v977_v47 = vadd.f32 %v3689_v63, %v3677_v55  ;;  %v1080_v32 = vld [vmem:[#allocation3 + $0x90] sm:$0xff] }
 0x158   : > { %v1209_v3 = vadd.f32 %v1125_v41, %v1124_v60  ;;  %v1263_v12 = vadd.f32 %v1161_v44, %v1160_v42  ;;  %v926_v51 = vadd.f32 %v3719_v14, %v3705_v7  ;;  %v1126_v48 = vmul.f32 %v3675_v57, %v3675_v57  ;;  %v845_v57 = vld [vmem:[#allocation2] sm:$0xff]  ;;  %v867_v42 = vld [vmem:[#allocation2 + $0xb0] sm:$0xff]  ;;  %v850_v44 = vld [vmem:[#allocation2 + $0x28] sm:$0xff] }
 0x159   : > { %v1127_v52 = vmul.f32 %v3687_v62, %v3687_v62  ;;  %v980_v4 = vadd.f32 %v3721_v19, %v3707_v9  ;;  %v1128_v29 = vmul.f32 %v3705_v7, %v3705_v7  ;;  %v1129_v55 = vmul.f32 %v3719_v14, %v3719_v14  ;;  %v864_v9 = vld [vmem:[#allocation2 + $0x98] sm:$0xff]  ;;  %v863_v14 = vld [vmem:[#allocation2 + $0x90] sm:$0xff] }
 0x15b   : > { %1252 = vadd.xlane.f32.xlu1 %v1251_v37  ;;  %912 = vadd.xlane.f32.xlu0 %v911_v38  ;;  %v1212_v25 = vadd.f32 %v1127_v52, %v1126_v48  ;;  %v1215_v63 = vadd.f32 %v1129_v55, %v1128_v29  ;;  %v846_v38 = vld [vmem:[#allocation2 + $0x8] sm:$0xff]  ;;  %v1066_v48 = vld [vmem:[#allocation3 + $0x20] sm:$0xff]  ;;  %v868_v52 = vld [vmem:[#allocation2 + $0xb8] sm:$0xff] }
 0x15f   : > { %966 = vadd.xlane.f32.xlu0 %v965_v15  ;;  %915 = vadd.xlane.f32.xlu1 %v914_v17  ;;  %v847_v15 = vld [vmem:[#allocation2 + $0x10] sm:$0xff] }
 0x163   : > { %1201 = vadd.xlane.f32.xlu0 %v1200_v49  ;;  %969 = vadd.xlane.f32.xlu1 %v968_v50 }
 0x167   : > { %1255 = vadd.xlane.f32.xlu0 %v1254_v27  ;;  %1204 = vadd.xlane.f32.xlu1 %v1203_v59  ;;  %v1064_v27 = vld [vmem:[#allocation3 + $0x10] sm:$0xff]  ;;  %v866_v59 = vld [vmem:[#allocation2 + $0xa8] sm:$0xff] }
 0x16b   : > { %1258 = vadd.xlane.f32.xlu1 %v1257_v61  ;;  %918 = vadd.xlane.f32.xlu0 %v917_v0 }
 0x16f   : > { %972 = vadd.xlane.f32.xlu0 %v971_v33  ;;  %921 = vadd.xlane.f32.xlu1 %v920_v35  ;;  %v1082_v33 = vld [vmem:[#allocation3 + $0xa0] sm:$0xff]  ;;  %v1065_v35 = vld [vmem:[#allocation3 + $0x18] sm:$0xff] }
 0x173   : > { %1207 = vadd.xlane.f32.xlu0 %v1206_v6  ;;  %975 = vadd.xlane.f32.xlu1 %v974_v56  ;;  %v1083_v6 = vld [vmem:[#allocation3 + $0xa8] sm:$0xff]  ;;  %v849_v56 = vld [vmem:[#allocation2 + $0x20] sm:$0xff] }
 0x177   : > { %1261 = vadd.xlane.f32.xlu0 %v1260_v43  ;;  %1210 = vadd.xlane.f32.xlu1 %v1209_v3 }
 0x17b   : > { %1264 = vadd.xlane.f32.xlu1 %v1263_v12  ;;  %924 = vadd.xlane.f32.xlu0 %v923_v2 }
 0x17f   : > { %978 = vadd.xlane.f32.xlu0 %v977_v47  ;;  %927 = vadd.xlane.f32.xlu1 %v926_v51 }
 0x183   : > { %1213 = vadd.xlane.f32.xlu0 %v1212_v25  ;;  %981 = vadd.xlane.f32.xlu1 %v980_v4 }
 0x187   : > { %1267 = vadd.xlane.f32.xlu0 %v3713_v1  ;;  %1216 = vadd.xlane.f32.xlu1 %v1215_v63  ;;  %v1084_v63 = vld [vmem:[#allocation3 + $0xb0] sm:$0xff] }
 0x18b   : > { %1270 = vadd.xlane.f32.xlu1 %v3733_v26  ;;  %930 = vadd.xlane.f32.xlu0 %v3739_v39 }
 0x18f   : > { %984 = vadd.xlane.f32.xlu0 %v3741_v40  ;;  %933 = vadd.xlane.f32.xlu1 %v3759_v13  ;;  %v1062_v40 = vld [vmem:[#allocation3] sm:$0xff]  ;;  %v1063_v13 = vld [vmem:[#allocation3 + $0x8] sm:$0xff] }
 0x193   : > { %1219 = vadd.xlane.f32.xlu0 %v3747_v54  ;;  %987 = vadd.xlane.f32.xlu1 %v3761_v20 }
 0x194   : > { %v883_v62 = vpop.xlane.xlu0 %882 }
 0x195   : > { %v989_v7 = vadd.f32 %v883_v62, %v845_v57  ;;  %v1067_v57 = vld [vmem:[#allocation3 + $0x28] sm:$0xff] }
 0x197   : > { %1026 = vst.msk [vmem:[#allocation2] sm:$0xff] %vm1025_vm2, %v989_v7  ;;  %1273 = vadd.xlane.f32.xlu0 %v3749_v58  ;;  %1222 = vadd.xlane.f32.xlu1 %v3763_v21  ;;  %v1081_v58 = vld [vmem:[#allocation3 + $0x98] sm:$0xff] }
 0x198   : > { %v940_v1 = vpop.xlane.xlu1 %939  ;;  %v937_v19 = vpop.xlane.xlu0 %936 }
 0x199   : > { %v1008_v26 = vadd.f32 %v940_v1, %v864_v9  ;;  %v1007_v39 = vadd.f32 %v937_v19, %v863_v14  ;;  %v1085_v1 = vld [vmem:[#allocation3 + $0xb8] sm:$0xff]  ;;  %v851_v19 = vld [vmem:[#allocation2 + $0x30] sm:$0xff] }
 0x19b   : > { %1045 = vst.msk [vmem:[#allocation2 + $0x98] sm:$0xff] %vm1025_vm2, %v1008_v26  ;;  %1044 = vst.msk [vmem:[#allocation2 + $0x90] sm:$0xff] %vm1025_vm2, %v1007_v39  ;;  %1276 = vadd.xlane.f32.xlu1 %v3765_v22 }
 0x19c   : > { %v1172_v54 = vpop.xlane.xlu0 %1171  ;;  %v1175_v20 = vpop.xlane.xlu1 %1174 }
 0x19d   : > { %v1278_v30 = vadd.f32 %v1172_v54, %v1062_v40  ;;  %v1279_v31 = vadd.f32 %v1175_v20, %v1063_v13  ;;  %v869_v54 = vld [vmem:[#allocation2 + $0xc0] sm:$0xff]  ;;  %v852_v20 = vld [vmem:[#allocation2 + $0x38] sm:$0xff] }
 0x19f   : > { %1314 = vst.msk [vmem:[#allocation3] sm:$0xff] %vm1025_vm2, %v1278_v30  ;;  %1315 = vst.msk [vmem:[#allocation3 + $0x8] sm:$0xff] %vm1025_vm2, %v1279_v31 }
 0x1a0   : > { %v1226_v21 = vpop.xlane.xlu0 %1225  ;;  %v1229_v11 = vpop.xlane.xlu1 %1228 }
 0x1a1   : > { %v1296_v8 = vadd.f32 %v1226_v21, %v1080_v32  ;;  %v1297_v37 = vadd.f32 %v1229_v11, %v1081_v58  ;;  %v1068_v21 = vld [vmem:[#allocation3 + $0x30] sm:$0xff]  ;;  %v870_v11 = vld [vmem:[#allocation2 + $0xc8] sm:$0xff] }
 0x1a3   : > { %1332 = vst.msk [vmem:[#allocation3 + $0x90] sm:$0xff] %vm1025_vm2, %v1296_v8  ;;  %1333 = vst.msk [vmem:[#allocation3 + $0x98] sm:$0xff] %vm1025_vm2, %v1297_v37 }
 0x1a4   : > { %v886_v22 = vpop.xlane.xlu0 %885  ;;  %v889_v17 = vpop.xlane.xlu1 %888 }
 0x1a5   : > { %v990_v16 = vadd.f32 %v886_v22, %v846_v38  ;;  %v991_v18 = vadd.f32 %v889_v17, %v847_v15  ;;  %v1086_v22 = vld [vmem:[#allocation3 + $0xc0] sm:$0xff]  ;;  %v1069_v17 = vld [vmem:[#allocation3 + $0x38] sm:$0xff] }
 0x1a7   : > { %1027 = vst.msk [vmem:[#allocation2 + $0x8] sm:$0xff] %vm1025_vm2, %v990_v16  ;;  %1028 = vst.msk [vmem:[#allocation2 + $0x10] sm:$0xff] %vm1025_vm2, %v991_v18 }
 0x1a8   : > { %v943_v49 = vpop.xlane.xlu0 %942  ;;  %v892_v50 = vpop.xlane.xlu1 %891 }
 0x1a9   : > { %v1009_v53 = vadd.f32 %v943_v49, %v865_v45  ;;  %v992_v23 = vadd.f32 %v892_v50, %v848_v46  ;;  %v1087_v49 = vld [vmem:[#allocation3 + $0xc8] sm:$0xff]  ;;  %v853_v50 = vld [vmem:[#allocation2 + $0x40] sm:$0xff] }
 0x1ab   : > { %1046 = vst.msk [vmem:[#allocation2 + $0xa0] sm:$0xff] %vm1025_vm2, %v1009_v53  ;;  %1029 = vst.msk [vmem:[#allocation2 + $0x18] sm:$0xff] %vm1025_vm2, %v992_v23 }
 0x1ac   : > { %v1178_v24 = vpop.xlane.xlu0 %1177  ;;  %v946_v28 = vpop.xlane.xlu1 %945 }
 0x1ad   : > { %v1280_v61 = vadd.f32 %v1178_v24, %v1064_v27  ;;  %v1010_v0 = vadd.f32 %v946_v28, %v866_v59  ;;  %v871_v24 = vld [vmem:[#allocation2 + $0xd0] sm:$0xff]  ;;  %v854_v28 = vld [vmem:[#allocation2 + $0x48] sm:$0xff] }
 0x1af   : > { %1316 = vst.msk [vmem:[#allocation3 + $0x10] sm:$0xff] %vm1025_vm2, %v1280_v61  ;;  %1047 = vst.msk [vmem:[#allocation2 + $0xa8] sm:$0xff] %vm1025_vm2, %v1010_v0 }
 0x1b0   : > { %v1232_v34 = vpop.xlane.xlu0 %1231  ;;  %v1181_v36 = vpop.xlane.xlu1 %1180 }
 0x1b1   : > { %v1298_v10 = vadd.f32 %v1232_v34, %v1082_v33  ;;  %v1281_v5 = vadd.f32 %v1181_v36, %v1065_v35  ;;  %v1070_v34 = vld [vmem:[#allocation3 + $0x40] sm:$0xff]  ;;  %v872_v36 = vld [vmem:[#allocation2 + $0xd8] sm:$0xff] }
 0x1b3   : > { %1334 = vst.msk [vmem:[#allocation3 + $0xa0] sm:$0xff] %vm1025_vm2, %v1298_v10  ;;  %1317 = vst.msk [vmem:[#allocation3 + $0x18] sm:$0xff] %vm1025_vm2, %v1281_v5 }
 0x1b4   : > { %v1235_v60 = vpop.xlane.xlu1 %1234  ;;  %v895_v41 = vpop.xlane.xlu0 %894 }
 0x1b5   : > { %v1299_v43 = vadd.f32 %v1235_v60, %v1083_v6  ;;  %v993_v3 = vadd.f32 %v895_v41, %v849_v56  ;;  %v1088_v60 = vld [vmem:[#allocation3 + $0xd0] sm:$0xff]  ;;  %v1071_v41 = vld [vmem:[#allocation3 + $0x48] sm:$0xff] }
 0x1b7   : > { %1335 = vst.msk [vmem:[#allocation3 + $0xa8] sm:$0xff] %vm1025_vm2, %v1299_v43  ;;  %1030 = vst.msk [vmem:[#allocation2 + $0x20] sm:$0xff] %vm1025_vm2, %v993_v3 }
 0x1b8   : > { %v949_v12 = vpop.xlane.xlu0 %948  ;;  %v898_v2 = vpop.xlane.xlu1 %897 }
 0x1b9   : > { %v1011_v47 = vadd.f32 %v949_v12, %v867_v42  ;;  %v994_v51 = vadd.f32 %v898_v2, %v850_v44  ;;  %v1089_v12 = vld [vmem:[#allocation3 + $0xd8] sm:$0xff]  ;;  %v855_v2 = vld [vmem:[#allocation2 + $0x50] sm:$0xff] }
 0x1bb   : > { %1048 = vst.msk [vmem:[#allocation2 + $0xb0] sm:$0xff] %vm1025_vm2, %v1011_v47  ;;  %1031 = vst.msk [vmem:[#allocation2 + $0x28] sm:$0xff] %vm1025_vm2, %v994_v51 }
 0x1bc   : > { %v1184_v25 = vpop.xlane.xlu0 %1183  ;;  %v952_v4 = vpop.xlane.xlu1 %951 }
 0x1bd   : > { %v1282_v29 = vadd.f32 %v1184_v25, %v1066_v48  ;;  %v1012_v55 = vadd.f32 %v952_v4, %v868_v52  ;;  %v873_v25 = vld [vmem:[#allocation2 + $0xe0] sm:$0xff]  ;;  %v856_v4 = vld [vmem:[#allocation2 + $0x58] sm:$0xff] }
 0x1bf   : > { %1318 = vst.msk [vmem:[#allocation3 + $0x20] sm:$0xff] %vm1025_vm2, %v1282_v29  ;;  %1049 = vst.msk [vmem:[#allocation2 + $0xb8] sm:$0xff] %vm1025_vm2, %v1012_v55 }
 0x1c0   : > { %v1238_v62 = vpop.xlane.xlu0 %1237  ;;  %v1187_v7 = vpop.xlane.xlu1 %1186 }
 0x1c1   : > { %v1300_v9 = vadd.f32 %v1238_v62, %v1084_v63  ;;  %v1283_v14 = vadd.f32 %v1187_v7, %v1067_v57  ;;  %v1072_v62 = vld [vmem:[#allocation3 + $0x50] sm:$0xff]  ;;  %v874_v7 = vld [vmem:[#allocation2 + $0xe8] sm:$0xff] }
 0x1c3   : > { %1336 = vst.msk [vmem:[#allocation3 + $0xb0] sm:$0xff] %vm1025_vm2, %v1300_v9  ;;  %1319 = vst.msk [vmem:[#allocation3 + $0x28] sm:$0xff] %vm1025_vm2, %v1283_v14 }
 0x1c4   : > { %v1241_v26 = vpop.xlane.xlu1 %1240  ;;  %v901_v39 = vpop.xlane.xlu0 %900 }
 0x1c5   : > { %v1301_v40 = vadd.f32 %v1241_v26, %v1085_v1  ;;  %v995_v13 = vadd.f32 %v901_v39, %v851_v19  ;;  %v1090_v26 = vld [vmem:[#allocation3 + $0xe0] sm:$0xff]  ;;  %v1073_v39 = vld [vmem:[#allocation3 + $0x58] sm:$0xff] }
 0x1c7   : > { %1337 = vst.msk [vmem:[#allocation3 + $0xb8] sm:$0xff] %vm1025_vm2, %v1301_v40  ;;  %1032 = vst.msk [vmem:[#allocation2 + $0x30] sm:$0xff] %vm1025_vm2, %v995_v13 }
 0x1c8   : > { %v955_v30 = vpop.xlane.xlu0 %954  ;;  %v904_v31 = vpop.xlane.xlu1 %903 }
 0x1c9   : > { %v1013_v32 = vadd.f32 %v955_v30, %v869_v54  ;;  %v996_v58 = vadd.f32 %v904_v31, %v852_v20  ;;  %v1091_v30 = vld [vmem:[#allocation3 + $0xe8] sm:$0xff]  ;;  %v857_v31 = vld [vmem:[#allocation2 + $0x60] sm:$0xff] }
 0x1cb   : > { %1050 = vst.msk [vmem:[#allocation2 + $0xc0] sm:$0xff] %vm1025_vm2, %v1013_v32  ;;  %1033 = vst.msk [vmem:[#allocation2 + $0x38] sm:$0xff] %vm1025_vm2, %v996_v58 }
 0x1cc   : > { %v1190_v8 = vpop.xlane.xlu0 %1189  ;;  %v958_v37 = vpop.xlane.xlu1 %957 }
 0x1cd   : > { %v1284_v38 = vadd.f32 %v1190_v8, %v1068_v21  ;;  %v1014_v15 = vadd.f32 %v958_v37, %v870_v11  ;;  %v875_v8 = vld [vmem:[#allocation2 + $0xf0] sm:$0xff]  ;;  %v858_v37 = vld [vmem:[#allocation2 + $0x68] sm:$0xff] }
 0x1cf   : > { %1320 = vst.msk [vmem:[#allocation3 + $0x30] sm:$0xff] %vm1025_vm2, %v1284_v38  ;;  %1051 = vst.msk [vmem:[#allocation2 + $0xc8] sm:$0xff] %vm1025_vm2, %v1014_v15 }
 0x1d0   : > { %v1244_v16 = vpop.xlane.xlu0 %1243  ;;  %v1193_v18 = vpop.xlane.xlu1 %1192 }
 0x1d1   : > { %v1302_v45 = vadd.f32 %v1244_v16, %v1086_v22  ;;  %v1285_v46 = vadd.f32 %v1193_v18, %v1069_v17  ;;  %v1074_v16 = vld [vmem:[#allocation3 + $0x60] sm:$0xff]  ;;  %v876_v18 = vld [vmem:[#allocation2 + $0xf8] sm:$0xff] }
 0x1d3   : > { %1338 = vst.msk [vmem:[#allocation3 + $0xc0] sm:$0xff] %vm1025_vm2, %v1302_v45  ;;  %1321 = vst.msk [vmem:[#allocation3 + $0x38] sm:$0xff] %vm1025_vm2, %v1285_v46 }
 0x1d4   : > { %v1247_v53 = vpop.xlane.xlu1 %1246  ;;  %v907_v23 = vpop.xlane.xlu0 %906 }
 0x1d5   : > { %v1303_v27 = vadd.f32 %v1247_v53, %v1087_v49  ;;  %v997_v59 = vadd.f32 %v907_v23, %v853_v50  ;;  %v1092_v53 = vld [vmem:[#allocation3 + $0xf0] sm:$0xff]  ;;  %v1075_v23 = vld [vmem:[#allocation3 + $0x68] sm:$0xff] }
 0x1d7   : > { %1339 = vst.msk [vmem:[#allocation3 + $0xc8] sm:$0xff] %vm1025_vm2, %v1303_v27  ;;  %1034 = vst.msk [vmem:[#allocation2 + $0x40] sm:$0xff] %vm1025_vm2, %v997_v59 }
 0x1d8   : > { %v961_v61 = vpop.xlane.xlu0 %960  ;;  %v910_v0 = vpop.xlane.xlu1 %909 }
 0x1d9   : > { %v1015_v33 = vadd.f32 %v961_v61, %v871_v24  ;;  %v998_v35 = vadd.f32 %v910_v0, %v854_v28  ;;  %v1093_v61 = vld [vmem:[#allocation3 + $0xf8] sm:$0xff]  ;;  %v859_v0 = vld [vmem:[#allocation2 + $0x70] sm:$0xff] }
 0x1db   : > { %1052 = vst.msk [vmem:[#allocation2 + $0xd0] sm:$0xff] %vm1025_vm2, %v1015_v33  ;;  %1035 = vst.msk [vmem:[#allocation2 + $0x48] sm:$0xff] %vm1025_vm2, %v998_v35 }
 0x1dc   : > { %v1196_v10 = vpop.xlane.xlu0 %1195  ;;  %v964_v5 = vpop.xlane.xlu1 %963 }
 0x1dd   : > { %v1286_v6 = vadd.f32 %v1196_v10, %v1070_v34  ;;  %v1016_v56 = vadd.f32 %v964_v5, %v872_v36  ;;  %v877_v10 = vld [vmem:[#allocation2 + $0x100] sm:$0xff]  ;;  %v860_v5 = vld [vmem:[#allocation2 + $0x78] sm:$0xff] }
 0x1df   : > { %1322 = vst.msk [vmem:[#allocation3 + $0x40] sm:$0xff] %vm1025_vm2, %v1286_v6  ;;  %1053 = vst.msk [vmem:[#allocation2 + $0xd8] sm:$0xff] %vm1025_vm2, %v1016_v56 }
 0x1e0   : > { %v1250_v43 = vpop.xlane.xlu0 %1249  ;;  %v1199_v3 = vpop.xlane.xlu1 %1198 }
 0x1e1   : > { %v1304_v42 = vadd.f32 %v1250_v43, %v1088_v60  ;;  %v1287_v44 = vadd.f32 %v1199_v3, %v1071_v41  ;;  %v1076_v43 = vld [vmem:[#allocation3 + $0x70] sm:$0xff]  ;;  %v878_v3 = vld [vmem:[#allocation2 + $0x108] sm:$0xff] }
 0x1e3   : > { %1340 = vst.msk [vmem:[#allocation3 + $0xd0] sm:$0xff] %vm1025_vm2, %v1304_v42  ;;  %1323 = vst.msk [vmem:[#allocation3 + $0x48] sm:$0xff] %vm1025_vm2, %v1287_v44 }
 0x1e4   : > { %v1253_v47 = vpop.xlane.xlu1 %1252  ;;  %v913_v51 = vpop.xlane.xlu0 %912 }
 0x1e5   : > { %v1305_v48 = vadd.f32 %v1253_v47, %v1089_v12  ;;  %v999_v52 = vadd.f32 %v913_v51, %v855_v2  ;;  %v1094_v47 = vld [vmem:[#allocation3 + $0x100] sm:$0xff]  ;;  %v1077_v51 = vld [vmem:[#allocation3 + $0x78] sm:$0xff] }
 0x1e7   : > { %1341 = vst.msk [vmem:[#allocation3 + $0xd8] sm:$0xff] %vm1025_vm2, %v1305_v48  ;;  %1036 = vst.msk [vmem:[#allocation2 + $0x50] sm:$0xff] %vm1025_vm2, %v999_v52 }
 0x1e8   : > { %v967_v29 = vpop.xlane.xlu0 %966  ;;  %v916_v55 = vpop.xlane.xlu1 %915 }
 0x1e9   : > { %v1017_v63 = vadd.f32 %v967_v29, %v873_v25  ;;  %v1000_v57 = vadd.f32 %v916_v55, %v856_v4  ;;  %v1095_v29 = vld [vmem:[#allocation3 + $0x108] sm:$0xff]  ;;  %v861_v55 = vld [vmem:[#allocation2 + $0x80] sm:$0xff] }
 0x1eb   : > { %1054 = vst.msk [vmem:[#allocation2 + $0xe0] sm:$0xff] %vm1025_vm2, %v1017_v63  ;;  %1037 = vst.msk [vmem:[#allocation2 + $0x58] sm:$0xff] %vm1025_vm2, %v1000_v57 }
 0x1ec   : > { %v1202_v9 = vpop.xlane.xlu0 %1201  ;;  %v970_v14 = vpop.xlane.xlu1 %969 }
 0x1ed   : > { %v1288_v1 = vadd.f32 %v1202_v9, %v1072_v62  ;;  %v1018_v19 = vadd.f32 %v970_v14, %v874_v7  ;;  %v879_v9 = vld [vmem:[#allocation2 + $0x110] sm:$0xff]  ;;  %v862_v14 = vld [vmem:[#allocation2 + $0x88] sm:$0xff] }
 0x1ef   : > { %1324 = vst.msk [vmem:[#allocation3 + $0x50] sm:$0xff] %vm1025_vm2, %v1288_v1  ;;  %1055 = vst.msk [vmem:[#allocation2 + $0xe8] sm:$0xff] %vm1025_vm2, %v1018_v19 }
 0x1f0   : > { %v1256_v40 = vpop.xlane.xlu0 %1255  ;;  %v1205_v13 = vpop.xlane.xlu1 %1204 }
 0x1f1   : > { %v1306_v54 = vadd.f32 %v1256_v40, %v1090_v26  ;;  %v1289_v20 = vadd.f32 %v1205_v13, %v1073_v39  ;;  %v1078_v40 = vld [vmem:[#allocation3 + $0x80] sm:$0xff]  ;;  %v880_v13 = vld [vmem:[#allocation2 + $0x118] sm:$0xff] }
 0x1f3   : > { %1342 = vst.msk [vmem:[#allocation3 + $0xe0] sm:$0xff] %vm1025_vm2, %v1306_v54  ;;  %1325 = vst.msk [vmem:[#allocation3 + $0x58] sm:$0xff] %vm1025_vm2, %v1289_v20 }
 0x1f4   : > { %v1259_v32 = vpop.xlane.xlu1 %1258  ;;  %v919_v58 = vpop.xlane.xlu0 %918 }
 0x1f5   : > { %v1307_v21 = vadd.f32 %v1259_v32, %v1091_v30  ;;  %v1001_v11 = vadd.f32 %v919_v58, %v857_v31  ;;  %v1096_v32 = vld [vmem:[#allocation3 + $0x110] sm:$0xff]  ;;  %v1079_v58 = vld [vmem:[#allocation3 + $0x88] sm:$0xff] }
 0x1f7   : > { %1343 = vst.msk [vmem:[#allocation3 + $0xe8] sm:$0xff] %vm1025_vm2, %v1307_v21  ;;  %1038 = vst.msk [vmem:[#allocation2 + $0x60] sm:$0xff] %vm1025_vm2, %v1001_v11 }
 0x1f8   : > { %v973_v38 = vpop.xlane.xlu0 %972  ;;  %v922_v15 = vpop.xlane.xlu1 %921 }
 0x1f9   : > { %v1019_v22 = vadd.f32 %v973_v38, %v875_v8  ;;  %v1002_v17 = vadd.f32 %v922_v15, %v858_v37  ;;  %v1097_v38 = vld [vmem:[#allocation3 + $0x118] sm:$0xff] }
 0x1fb   : > { %1056 = vst.msk [vmem:[#allocation2 + $0xf0] sm:$0xff] %vm1025_vm2, %v1019_v22  ;;  %1039 = vst.msk [vmem:[#allocation2 + $0x68] sm:$0xff] %vm1025_vm2, %v1002_v17 }
 0x1fc   : > { %v1208_v45 = vpop.xlane.xlu0 %1207  ;;  %v976_v46 = vpop.xlane.xlu1 %975 }
 0x1fd   : > { %v1290_v49 = vadd.f32 %v1208_v45, %v1074_v16  ;;  %v1020_v50 = vadd.f32 %v976_v46, %v876_v18 }
 0x1ff   : > { %1326 = vst.msk [vmem:[#allocation3 + $0x60] sm:$0xff] %vm1025_vm2, %v1290_v49  ;;  %1057 = vst.msk [vmem:[#allocation2 + $0xf8] sm:$0xff] %vm1025_vm2, %v1020_v50 }
 0x200   : > { %v1262_v27 = vpop.xlane.xlu0 %1261  ;;  %v1211_v59 = vpop.xlane.xlu1 %1210 }
 0x201   : > { %v1308_v24 = vadd.f32 %v1262_v27, %v1092_v53  ;;  %v1291_v28 = vadd.f32 %v1211_v59, %v1075_v23 }
 0x203   : > { %1344 = vst.msk [vmem:[#allocation3 + $0xf0] sm:$0xff] %vm1025_vm2, %v1308_v24  ;;  %1327 = vst.msk [vmem:[#allocation3 + $0x68] sm:$0xff] %vm1025_vm2, %v1291_v28 }
 0x204   : > { %v1265_v33 = vpop.xlane.xlu1 %1264  ;;  %v925_v35 = vpop.xlane.xlu0 %924 }
 0x205   : > { %v1309_v34 = vadd.f32 %v1265_v33, %v1093_v61  ;;  %v1003_v36 = vadd.f32 %v925_v35, %v859_v0 }
 0x207   : > { %1345 = vst.msk [vmem:[#allocation3 + $0xf8] sm:$0xff] %vm1025_vm2, %v1309_v34  ;;  %1040 = vst.msk [vmem:[#allocation2 + $0x70] sm:$0xff] %vm1025_vm2, %v1003_v36 }
 0x208   : > { %v979_v6 = vpop.xlane.xlu0 %978  ;;  %v928_v56 = vpop.xlane.xlu1 %927 }
 0x209   : > { %v1021_v60 = vadd.f32 %v979_v6, %v877_v10  ;;  %v1004_v41 = vadd.f32 %v928_v56, %v860_v5 }
 0x20b   : > { %1058 = vst.msk [vmem:[#allocation2 + $0x100] sm:$0xff] %vm1025_vm2, %v1021_v60  ;;  %1041 = vst.msk [vmem:[#allocation2 + $0x78] sm:$0xff] %vm1025_vm2, %v1004_v41 }
 0x20c   : > { %v1214_v42 = vpop.xlane.xlu0 %1213  ;;  %v982_v44 = vpop.xlane.xlu1 %981 }
 0x20d   : > { %v1292_v12 = vadd.f32 %v1214_v42, %v1076_v43  ;;  %v1022_v2 = vadd.f32 %v982_v44, %v878_v3 }
 0x20f   : > { %1328 = vst.msk [vmem:[#allocation3 + $0x70] sm:$0xff] %vm1025_vm2, %v1292_v12  ;;  %1059 = vst.msk [vmem:[#allocation2 + $0x108] sm:$0xff] %vm1025_vm2, %v1022_v2 }
 0x210   : > { %v1268_v48 = vpop.xlane.xlu0 %1267  ;;  %v1217_v52 = vpop.xlane.xlu1 %1216 }
 0x211   : > { %v1310_v25 = vadd.f32 %v1268_v48, %v1094_v47  ;;  %v1293_v4 = vadd.f32 %v1217_v52, %v1077_v51 }
 0x213   : > { %1346 = vst.msk [vmem:[#allocation3 + $0x100] sm:$0xff] %vm1025_vm2, %v1310_v25  ;;  %1329 = vst.msk [vmem:[#allocation3 + $0x78] sm:$0xff] %vm1025_vm2, %v1293_v4 }
 0x214   : > { %v1271_v63 = vpop.xlane.xlu1 %1270  ;;  %v931_v57 = vpop.xlane.xlu0 %930 }
 0x215   : > { %v1311_v62 = vadd.f32 %v1271_v63, %v1095_v29  ;;  %v1005_v7 = vadd.f32 %v931_v57, %v861_v55 }
 0x217   : > { %1347 = vst.msk [vmem:[#allocation3 + $0x108] sm:$0xff] %vm1025_vm2, %v1311_v62  ;;  %1042 = vst.msk [vmem:[#allocation2 + $0x80] sm:$0xff] %vm1025_vm2, %v1005_v7 }
 0x218   : > { %v985_v1 = vpop.xlane.xlu0 %984  ;;  %v934_v19 = vpop.xlane.xlu1 %933 }
 0x219   : > { %v1023_v26 = vadd.f32 %v985_v1, %v879_v9  ;;  %v1006_v39 = vadd.f32 %v934_v19, %v862_v14 }
 0x21b   : > { %1060 = vst.msk [vmem:[#allocation2 + $0x110] sm:$0xff] %vm1025_vm2, %v1023_v26  ;;  %1043 = vst.msk [vmem:[#allocation2 + $0x88] sm:$0xff] %vm1025_vm2, %v1006_v39 }
 0x21c   : > { %v1220_v54 = vpop.xlane.xlu0 %1219  ;;  %v988_v20 = vpop.xlane.xlu1 %987 }
 0x21d   : > { %v1294_v30 = vadd.f32 %v1220_v54, %v1078_v40  ;;  %v1024_v31 = vadd.f32 %v988_v20, %v880_v13 }
 0x21f   : > { %1330 = vst.msk [vmem:[#allocation3 + $0x80] sm:$0xff] %vm1025_vm2, %v1294_v30  ;;  %1061 = vst.msk [vmem:[#allocation2 + $0x118] sm:$0xff] %vm1025_vm2, %v1024_v31 }
 0x220   : > { %v1274_v21 = vpop.xlane.xlu0 %1273  ;;  %v1223_v11 = vpop.xlane.xlu1 %1222 }
 0x221   : > { %v1312_v8 = vadd.f32 %v1274_v21, %v1096_v32  ;;  %v1295_v37 = vadd.f32 %v1223_v11, %v1079_v58 }
 0x223   : > { %1348 = vst.msk [vmem:[#allocation3 + $0x110] sm:$0xff] %vm1025_vm2, %v1312_v8  ;;  %1331 = vst.msk [vmem:[#allocation3 + $0x88] sm:$0xff] %vm1025_vm2, %v1295_v37  ;;  %1353 = sbr.rel (%p2900_p5) target bundleno = 861 (0x35d), region = 48 }
 0x224   : > { %v1277_v15 = vpop.xlane.xlu1 %1276 }
 0x225   : > { %v1313_v22 = vadd.f32 %v1277_v15, %v1097_v38 }
 0x227   : > { %1349 = vst.msk [vmem:[#allocation3 + $0x118] sm:$0xff] %vm1025_vm2, %v1313_v22 }
 0x228   : > { %v1356_v17 = vld [vmem:[#allocation2 + $0x10] sm:$0xff]  ;;  %v3051_v18 = vmov 0   ;;  %v1354_v49 = vld [vmem:[#allocation2] sm:$0xff]  ;;  %v1357_v27 = vld [vmem:[#allocation2 + $0x18] sm:$0xff] }
 0x229   : > { %v1428_v16 = vld [vmem:[#allocation3 + $0x10] sm:$0xff]  ;;  %2940 = vset.pattern.permute.xlu1 %v3051_v18  ;;  %2939 = vset.pattern.permute.xlu0 %v3051_v18  ;;  %v3928_v45 = vmul.f32 0.001953125, %v1356_v17  ;;  %v1426_v50 = vld [vmem:[#allocation3] sm:$0xff]  ;;  %v3930_v53 = vmul.f32 0.001953125, %v1354_v49  ;;  %v1429_v59 = vld [vmem:[#allocation3 + $0x18] sm:$0xff]  ;;  %v3934_v28 = vmul.f32 0.001953125, %v1357_v27 }
 0x22a   : > { %v1464_v46 = vmul.f32 0.001953125, %v1428_v16  ;;  %v1462_v23 = vmul.f32 0.001953125, %v1426_v50  ;;  %v1465_v61 = vmul.f32 0.001953125, %v1429_v59  ;;  %v1355_v0 = vld [vmem:[#allocation2 + $0x8] sm:$0xff]  ;;  %v1358_v43 = vld [vmem:[#allocation2 + $0x20] sm:$0xff]  ;;  %v1361_v47 = vld [vmem:[#allocation2 + $0x38] sm:$0xff] }
 0x22b   : > { %v1500_v24 = vmul.f32 %v3928_v45, %v3928_v45  ;;  %4760 = vst [vmem:[#allocation7_spill] sm:$0xff] %v3934_v28  ;;  %v1427_v33 = vld [vmem:[#allocation3 + $0x8] sm:$0xff]  ;;  %v1498_v35 = vmul.f32 %v3930_v53, %v3930_v53  ;;  %v3938_v34 = vmul.f32 0.001953125, %v1355_v0  ;;  %v1501_v56 = vmul.f32 %v3934_v28, %v3934_v28  ;;  %v1430_v3 = vld [vmem:[#allocation3 + $0x20] sm:$0xff]  ;;  %v1433_v51 = vld [vmem:[#allocation3 + $0x38] sm:$0xff] }
 0x22c   : > { %v1463_v36 = vmul.f32 0.001953125, %v1427_v33  ;;  %v1359_v10 = vld [vmem:[#allocation2 + $0x28] sm:$0xff]  ;;  %v3946_v12 = vmul.f32 0.001953125, %v1358_v43  ;;  %v1466_v2 = vmul.f32 0.001953125, %v1430_v3  ;;  %v3950_v4 = vmul.f32 0.001953125, %v1361_v47  ;;  %v1360_v29 = vld [vmem:[#allocation2 + $0x30] sm:$0xff] }
 0x22d   : > { %v1431_v5 = vld [vmem:[#allocation3 + $0x28] sm:$0xff]  ;;  %v1536_v6 = vsub.f32 %v1464_v46, %v1500_v24  ;;  %v3942_v60 = vmul.f32 0.001953125, %v1359_v10  ;;  %v1534_v42 = vsub.f32 %v1462_v23, %v1498_v35  ;;  %v1499_v44 = vmul.f32 %v3938_v34, %v3938_v34  ;;  %v1432_v19 = vld [vmem:[#allocation3 + $0x30] sm:$0xff]  ;;  %v1362_v8 = vld [vmem:[#allocation2 + $0x40] sm:$0xff] }
 0x22e   : > { %v1467_v41 = vmul.f32 0.001953125, %v1431_v5  ;;  %4762 = vst [vmem:[#allocation9_spill] sm:$0xff] %v3946_v12  ;;  %v1537_v52 = vsub.f32 %v1465_v61, %v1501_v56  ;;  %4763 = vst [vmem:[#allocation10_spill] sm:$0xff] %v3950_v4  ;;  %v1502_v57 = vmul.f32 %v3946_v12, %v3946_v12  ;;  %v1469_v62 = vmul.f32 0.001953125, %v1433_v51  ;;  %v1363_v31 = vld [vmem:[#allocation2 + $0x48] sm:$0xff]  ;;  %v1434_v22 = vld [vmem:[#allocation3 + $0x40] sm:$0xff] }
 0x22f   : > { %4761 = vst [vmem:[#allocation8_spill] sm:$0xff] %v3942_v60  ;;  %v1572_v48 = vmax.f32 %v1536_v6, 0.0  ;;  %v1503_v25 = vmul.f32 %v3942_v60, %v3942_v60  ;;  %v1570_v55 = vmax.f32 %v1534_v42, 0.0  ;;  %v1535_v63 = vsub.f32 %v1463_v36, %v1499_v44  ;;  %v1435_v32 = vld [vmem:[#allocation3 + $0x48] sm:$0xff]  ;;  %v1365_v17 = vld [vmem:[#allocation2 + $0x58] sm:$0xff]  ;;  %v1364_v59 = vld [vmem:[#allocation2 + $0x50] sm:$0xff] }
 0x230   : > { %v1573_v9 = vmax.f32 %v1537_v52, 0.0  ;;  %v1505_v1 = vmul.f32 %v3950_v4, %v3950_v4  ;;  %v1538_v40 = vsub.f32 %v1466_v2, %v1502_v57  ;;  %v3956_v13 = vmul.f32 0.001953125, %v1360_v29  ;;  %v1437_v49 = vld [vmem:[#allocation3 + $0x58] sm:$0xff]  ;;  %v1436_v24 = vld [vmem:[#allocation3 + $0x50] sm:$0xff]  ;;  %v1367_v35 = vld [vmem:[#allocation2 + $0x68] sm:$0xff] }
 0x231   : > { %v1608_v7 = vadd.f32 0.001, %v1572_v48  ;;  %v1539_v14 = vsub.f32 %v1467_v41, %v1503_v25  ;;  %v1606_v26 = vadd.f32 0.001, %v1570_v55  ;;  %v1571_v39 = vmax.f32 %v1535_v63, 0.0  ;;  %v1439_v36 = vld [vmem:[#allocation3 + $0x68] sm:$0xff] }
 0x232   : > { %v1609_v54 = vadd.f32 0.001, %v1573_v9  ;;  %v1541_v30 = vsub.f32 %v1469_v62, %v1505_v1  ;;  %v1574_v21 = vmax.f32 %v1538_v40, 0.0  ;;  %v1468_v11 = vmul.f32 0.001953125, %v1432_v19  ;;  %v1366_v56 = vld [vmem:[#allocation2 + $0x60] sm:$0xff]  ;;  %v1369_v63 = vld [vmem:[#allocation2 + $0x78] sm:$0xff] }
 0x233   : > { %2941 = vrsqrt.f32 %v1608_v7  ;;  %v1575_v20 = vmax.f32 %v1539_v14, 0.0  ;;  %v1607_v58 = vadd.f32 0.001, %v1571_v39  ;;  %v1504_v15 = vmul.f32 %v3956_v13, %v3956_v13  ;;  %v1438_v44 = vld [vmem:[#allocation3 + $0x60] sm:$0xff]  ;;  %v1441_v57 = vld [vmem:[#allocation3 + $0x78] sm:$0xff]  ;;  %v1680_v14 = vld [vmem:[%s4742_s3 + $0x10] sm:$0xff] }
 0x234   : > { %2943 = vrsqrt.f32 %v1606_v26  ;;  %v1577_v38 = vmax.f32 %v1541_v30, 0.0  ;;  %v1610_v16 = vadd.f32 0.001, %v1574_v21  ;;  %v3960_v18 = vmul.f32 0.001953125, %v1363_v31  ;;  %v1678_v40 = vld [vmem:[%s4742_s3] sm:$0xff]  ;;  %v1384_v12 = vld [vmem:[#allocation2 + $0xf0] sm:$0xff] }
 0x235   : > { %2945 = vrsqrt.f32 %v1609_v54  ;;  %v1611_v37 = vadd.f32 0.001, %v1575_v20  ;;  %v1471_v46 = vmul.f32 0.001953125, %v1435_v32  ;;  %v1540_v23 = vsub.f32 %v1468_v11, %v1504_v15  ;;  %v1679_v15 = vld [vmem:[%s4742_s3 + $0x8] sm:$0xff] }
 0x236   : > { %2947 = vrsqrt.f32 %v1607_v58  ;;  %v1613_v50 = vadd.f32 0.001, %v1577_v38  ;;  %v3962_v27 = vmul.f32 0.001953125, %v1362_v8  ;;  %v1507_v61 = vmul.f32 %v3960_v18, %v3960_v18  ;;  %v1681_v58 = vld [vmem:[%s4742_s3 + $0x18] sm:$0xff] }
 0x237   : > { %2949 = vrsqrt.f32 %v1611_v37  ;;  %v1470_v0 = vmul.f32 0.001953125, %v1434_v22  ;;  %v3966_v33 = vmul.f32 0.001953125, %v1365_v17  ;;  %v1576_v10 = vmax.f32 %v1540_v23, 0.0 }
 0x238   : > { %2951 = vrsqrt.f32 %v1610_v16  ;;  %v1506_v5 = vmul.f32 %v3962_v27, %v3962_v27  ;;  %v1473_v6 = vmul.f32 0.001953125, %v1437_v49  ;;  %v1543_v41 = vsub.f32 %v1471_v46, %v1507_v61  ;;  %v1683_v49 = vld [vmem:[%s4742_s3 + $0x28] sm:$0xff] }
 0x239   : > { %2953 = vrsqrt.f32 %v1613_v50  ;;  %v1509_v43 = vmul.f32 %v3966_v33, %v3966_v33  ;;  %v3972_v3 = vmul.f32 0.001953125, %v1364_v59  ;;  %v1472_v42 = vmul.f32 0.001953125, %v1436_v24  ;;  %v1368_v59 = vld [vmem:[#allocation2 + $0x70] sm:$0xff] }
 0x23a   : > { %v1612_v2 = vadd.f32 0.001, %v1576_v10  ;;  %v1542_v47 = vsub.f32 %v1470_v0, %v1506_v5  ;;  %v3974_v51 = vmul.f32 0.001953125, %v1367_v35  ;;  %v1475_v48 = vmul.f32 0.001953125, %v1439_v36  ;;  %v1682_v35 = vld [vmem:[%s4742_s3 + $0x20] sm:$0xff]  ;;  %v1440_v5 = vld [vmem:[#allocation3 + $0x70] sm:$0xff] }
 0x23b   : > { %v1579_v52 = vmax.f32 %v1543_v41, 0.0  ;;  %v1545_v25 = vsub.f32 %v1473_v6, %v1509_v43  ;;  %v1508_v29 = vmul.f32 %v3972_v3, %v3972_v3  ;;  %v3978_v55 = vmul.f32 0.001953125, %v1366_v56  ;;  %v1371_v6 = vld [vmem:[#allocation2 + $0x88] sm:$0xff] }
 0x23c   : > { %2955 = vrsqrt.f32 %v1612_v2  ;;  %v1578_v62 = vmax.f32 %v1542_v47, 0.0  ;;  %v1511_v7 = vmul.f32 %v3974_v51, %v3974_v51  ;;  %v1474_v9 = vmul.f32 0.001953125, %v1438_v44  ;;  %v1443_v44 = vld [vmem:[#allocation3 + $0x88] sm:$0xff] }
 0x23d   : > { %v1615_v1 = vadd.f32 0.001, %v1579_v52  ;;  %v1581_v19 = vmax.f32 %v1545_v25, 0.0  ;;  %v1544_v26 = vsub.f32 %v1472_v42, %v1508_v29  ;;  %v1510_v39 = vmul.f32 %v3978_v55, %v3978_v55  ;;  %v1370_v25 = vld [vmem:[#allocation2 + $0x80] sm:$0xff] }
 0x23e   : > { %v1614_v54 = vadd.f32 0.001, %v1578_v62  ;;  %v1547_v20 = vsub.f32 %v1475_v48, %v1511_v7  ;;  %v3990_v30 = vmul.f32 0.001953125, %v1369_v63  ;;  %v1477_v31 = vmul.f32 0.001953125, %v1441_v57  ;;  %v1442_v29 = vld [vmem:[#allocation3 + $0x80] sm:$0xff] }
 0x23f   : > { %2957 = vrsqrt.f32 %v1615_v1  ;;  %v1617_v21 = vadd.f32 0.001, %v1581_v19  ;;  %v1580_v11 = vmax.f32 %v1544_v26, 0.0  ;;  %v1546_v8 = vsub.f32 %v1474_v9, %v1510_v39  ;;  %v1445_v9 = vld [vmem:[#allocation3 + $0x98] sm:$0xff] }
 0x240   : > { %v2942_v32 = vpop.eup %2941  ;;  %2959 = vrsqrt.f32 %v1614_v54  ;;  %v1583_v22 = vmax.f32 %v1547_v20, 0.0  ;;  %v1513_v17 = vmul.f32 %v3990_v30, %v3990_v30  ;;  %v4021_v52 = vmul.f32 0.001953125, %v1368_v59  ;;  %v1684_v54 = vld [vmem:[%s4742_s3 + $0x30] sm:$0xff] }
 0x241   : > { %v2944_v37 = vpop.eup %2943  ;;  %v1716_v38 = vmul.f32 %v2942_v32, %v1680_v14  ;;  %2961 = vrsqrt.f32 %v1617_v21  ;;  %v1616_v50 = vadd.f32 0.001, %v1580_v11  ;;  %v1582_v23 = vmax.f32 %v1546_v8, 0.0  ;;  %v1372_v14 = vld [vmem:[#allocation2 + $0x90] sm:$0xff]  ;;  %v1375_v21 = vld [vmem:[#allocation2 + $0xa8] sm:$0xff] }
 0x242   : > { %v2946_v16 = vpop.eup %2945  ;;  %v1714_v46 = vmul.f32 %v2944_v37, %v1678_v40  ;;  %v1619_v36 = vadd.f32 0.001, %v1583_v22  ;;  %v1549_v10 = vsub.f32 %v1477_v31, %v1513_v17  ;;  %v1476_v62 = vmul.f32 0.001953125, %v1440_v5  ;;  %v1444_v40 = vld [vmem:[#allocation3 + $0x90] sm:$0xff] }
 0x243   : > { %v2948_v24 = vpop.eup %2947  ;;  %2014 = vperm.xlu1 %2940, %v1716_v38   ;;  %v4004_v61 = vmul.f32 %v1716_v38, %v3928_v45  ;;  %v4006_v0 = vmul.f32 %v2946_v16, %v1681_v58  ;;  %v1685_v45 = vld [vmem:[%s4742_s3 + $0x38] sm:$0xff]  ;;  %2963 = vrsqrt.f32 %v1616_v50  ;;  %v1618_v42 = vadd.f32 0.001, %v1582_v23  ;;  %v1447_v38 = vld [vmem:[#allocation3 + $0xa8] sm:$0xff] }
 0x244   : > { %v2950_v56 = vpop.eup %2949  ;;  %2004 = vperm.xlu0 %2939, %v1714_v46   ;;  %v4012_v41 = vmul.f32 %v1714_v46, %v3930_v53  ;;  %v4014_v43 = vmul.f32 %v2948_v24, %v1679_v15  ;;  %2965 = vrsqrt.f32 %v1619_v36  ;;  %v1585_v48 = vmax.f32 %v1549_v10, 0.0  ;;  %v1373_v53 = vld [vmem:[#allocation2 + $0x98] sm:$0xff]  ;;  %v1687_v23 = vld [vmem:[%s4742_s3 + $0x48] sm:$0xff]  ;;  %v1686_v36 = vld [vmem:[%s4742_s3 + $0x40] sm:$0xff] }
 0x245   : > { %4764 = vst [vmem:[#allocation11_spill] sm:$0xff] %v4004_v61  ;;  %4765 = vst [vmem:[#allocation12_spill] sm:$0xff] %v4006_v0  ;;  %v2952_v2 = vpop.eup %2951  ;;  %v4019_v47 = vmul.f32 %v2950_v56, %v1683_v49  ;;  %2967 = vrsqrt.f32 %v1618_v42  ;;  %v4025_v7 = vmul.f32 0.001953125, %v1371_v6  ;;  %v1512_v26 = vmul.f32 %v4021_v52, %v4021_v52  ;;  %v1374_v49 = vld [vmem:[#allocation2 + $0xa0] sm:$0xff]  ;;  %v1689_v42 = vld [vmem:[%s4742_s3 + $0x58] sm:$0xff] }
 0x246   : > { %4766 = vst [vmem:[#allocation13_spill] sm:$0xff] %v4012_v41  ;;  %v2954_v63 = vpop.eup %2953  ;;  %v4023_v57 = vmul.f32 %v2952_v2, %v1682_v35  ;;  %v1621_v19 = vadd.f32 0.001, %v1585_v48  ;;  %v1479_v39 = vmul.f32 0.001953125, %v1443_v44  ;;  %v4038_v31 = vmul.f32 0.001953125, %v1370_v25  ;;  %v1456_v61 = vld [vmem:[#allocation3 + $0xf0] sm:$0xff] }
 0x247   : > { %4767 = vst [vmem:[#allocation14_spill] sm:$0xff] %v4019_v47  ;;  %2019 = vperm.xlu1 %2940, %v4006_v0   ;;  %v4028_v1 = vmul.f32 %v2954_v63, %v1685_v45  ;;  %v1515_v20 = vmul.f32 %v4025_v7, %v4025_v7  ;;  %v1478_v32 = vmul.f32 0.001953125, %v1442_v29  ;;  %v4040_v58 = vmul.f32 0.001953125, %v1373_v53 }
 0x248   : > { %4768 = vst [vmem:[#allocation15_spill] sm:$0xff] %v4023_v57  ;;  %2009 = vperm.xlu0 %2939, %v4014_v43   ;;  %2969 = vrsqrt.f32 %v1621_v19  ;;  %v1548_v11 = vsub.f32 %v1476_v62, %v1512_v26  ;;  %v1481_v8 = vmul.f32 0.001953125, %v1445_v9  ;;  %v4042_v37 = vmul.f32 0.001953125, %v1372_v14  ;;  %v1446_v14 = vld [vmem:[#allocation3 + $0xa0] sm:$0xff] }
 0x249   : > { %4769 = vst [vmem:[#allocation16_spill] sm:$0xff] %v4028_v1  ;;  %v2956_v15 = vpop.eup %2955  ;;  %v1551_v22 = vsub.f32 %v1479_v39, %v1515_v20  ;;  %v1514_v17 = vmul.f32 %v4038_v31, %v4038_v31  ;;  %v1517_v16 = vmul.f32 %v4040_v58, %v4040_v58  ;;  %v1480_v46 = vmul.f32 0.001953125, %v1444_v40  ;;  %v1688_v39 = vld [vmem:[%s4742_s3 + $0x50] sm:$0xff]  ;;  %v1377_v20 = vld [vmem:[#allocation2 + $0xb8] sm:$0xff] }
 0x24a   : > { %v4049_v50 = vmul.f32 %v2956_v15, %v1684_v54  ;;  %v1584_v59 = vmax.f32 %v1548_v11, 0.0  ;;  %v1516_v24 = vmul.f32 %v4042_v37, %v4042_v37  ;;  %v4056_v35 = vmul.f32 0.001953125, %v1375_v21  ;;  %v1691_v11 = vld [vmem:[%s4742_s3 + $0x68] sm:$0xff] }
 0x24b   : > { %2029 = vperm.xlu1 %2940, %v4019_v47   ;;  %v1587_v10 = vmax.f32 %v1551_v22, 0.0  ;;  %v1550_v5 = vsub.f32 %v1478_v32, %v1514_v17  ;;  %v1553_v6 = vsub.f32 %v1481_v8, %v1517_v16  ;;  %v1483_v56 = vmul.f32 0.001953125, %v1447_v38  ;;  %v1449_v32 = vld [vmem:[#allocation3 + $0xb8] sm:$0xff]  ;;  %v1690_v22 = vld [vmem:[%s4742_s3 + $0x60] sm:$0xff]  ;;  %v1387_v47 = vld [vmem:[#allocation2 + $0x108] sm:$0xff] }
 0x24c   : > { %2024 = vperm.xlu0 %2939, %v4023_v57   ;;  %v2958_v45 = vpop.eup %2957  ;;  %v1620_v44 = vadd.f32 0.001, %v1584_v59  ;;  %v1552_v2 = vsub.f32 %v1480_v46, %v1516_v24  ;;  %v1519_v48 = vmul.f32 %v4056_v35, %v4056_v35  ;;  %v4067_v25 = vmul.f32 0.001953125, %v1374_v49 }
 0x24d   : > { %v2960_v29 = vpop.eup %2959  ;;  %v4069_v53 = vmul.f32 %v2958_v45, %v1687_v23  ;;  %v1623_v63 = vadd.f32 0.001, %v1587_v10  ;;  %v1586_v62 = vmax.f32 %v1550_v5, 0.0  ;;  %v1589_v9 = vmax.f32 %v1553_v6, 0.0  ;;  %v1376_v23 = vld [vmem:[#allocation2 + $0xb0] sm:$0xff]  ;;  %v1379_v6 = vld [vmem:[#allocation2 + $0xc8] sm:$0xff] }
 0x24e   : > { %v2962_v19 = vpop.eup %2961  ;;  %v4072_v26 = vmul.f32 %v2960_v29, %v1686_v36  ;;  %2971 = vrsqrt.f32 %v1620_v44  ;;  %v1588_v40 = vmax.f32 %v1552_v2, 0.0  ;;  %v1555_v54 = vsub.f32 %v1483_v56, %v1519_v48  ;;  %v1448_v5 = vld [vmem:[#allocation3 + $0xb0] sm:$0xff]  ;;  %v1451_v2 = vld [vmem:[#allocation3 + $0xc8] sm:$0xff]  ;;  %v1378_v48 = vld [vmem:[#allocation2 + $0xc0] sm:$0xff] }
 0x24f   : > { %2039 = vperm.xlu1 %2940, %v4028_v1   ;;  %v4078_v21 = vmul.f32 %v2962_v19, %v1689_v42  ;;  %2973 = vrsqrt.f32 %v1623_v63  ;;  %v1622_v8 = vadd.f32 0.001, %v1586_v62  ;;  %v1625_v38 = vadd.f32 0.001, %v1589_v9  ;;  %v1693_v63 = vld [vmem:[%s4742_s3 + $0x78] sm:$0xff] }
 0x250   : > { %2034 = vperm.xlu0 %2939, %v4049_v50   ;;  %v2964_v15 = vpop.eup %2963  ;;  %v1624_v17 = vadd.f32 0.001, %v1588_v40  ;;  %v1591_v16 = vmax.f32 %v1555_v54, 0.0  ;;  %v1482_v46 = vmul.f32 0.001953125, %v1446_v14  ;;  %v1518_v49 = vmul.f32 %v4067_v25, %v4067_v25  ;;  %v1450_v14 = vld [vmem:[#allocation3 + $0xc0] sm:$0xff]  ;;  %v1381_v54 = vld [vmem:[#allocation2 + $0xd8] sm:$0xff] }
 0x251   : > { %v2966_v59 = vpop.eup %2965  ;;  %v4088_v24 = vmul.f32 %v2964_v15, %v1688_v39  ;;  %2975 = vrsqrt.f32 %v1622_v8  ;;  %v4090_v36 = vmul.f32 0.001953125, %v1377_v20  ;;  %v1485_v10 = vmul.f32 0.001953125, %v1449_v32  ;;  %v1453_v15 = vld [vmem:[#allocation3 + $0xd8] sm:$0xff] }
 0x252   : > { %v2968_v56 = vpop.eup %2967  ;;  %v4093_v45 = vmul.f32 %v2966_v59, %v1691_v11  ;;  %2977 = vrsqrt.f32 %v1625_v38  ;;  %v1627_v42 = vadd.f32 0.001, %v1591_v16  ;;  %v1554_v44 = vsub.f32 %v1482_v46, %v1518_v49 }
 0x253   : > { %2049 = vperm.xlu1 %2940, %v4069_v53   ;;  %v4096_v29 = vmul.f32 %v2968_v56, %v1690_v22  ;;  %2979 = vrsqrt.f32 %v1624_v17  ;;  %v1521_v62 = vmul.f32 %v4090_v36, %v4090_v36  ;;  %v4103_v9 = vmul.f32 0.001953125, %v1376_v23  ;;  %v1380_v22 = vld [vmem:[#allocation2 + $0xd0] sm:$0xff]  ;;  %v1383_v56 = vld [vmem:[#allocation2 + $0xe8] sm:$0xff] }
 0x254   : > { %2044 = vperm.xlu0 %2939, %v4072_v26   ;;  %2981 = vrsqrt.f32 %v1627_v42  ;;  %v1590_v19 = vmax.f32 %v1554_v44, 0.0  ;;  %v1484_v39 = vmul.f32 0.001953125, %v1448_v5  ;;  %v4105_v40 = vmul.f32 0.001953125, %v1379_v6  ;;  %v1452_v6 = vld [vmem:[#allocation3 + $0xd0] sm:$0xff] }
 0x255   : > { %v2970_v20 = vpop.eup %2969  ;;  %v1557_v32 = vsub.f32 %v1485_v10, %v1521_v62  ;;  %v1520_v11 = vmul.f32 %v4103_v9, %v4103_v9  ;;  %v1487_v8 = vmul.f32 0.001953125, %v1451_v2  ;;  %v4109_v38 = vmul.f32 0.001953125, %v1378_v48  ;;  %v1692_v48 = vld [vmem:[%s4742_s3 + $0x70] sm:$0xff] }
 0x256   : > { %v4112_v17 = vmul.f32 %v2970_v20, %v1693_v63  ;;  %v1626_v16 = vadd.f32 0.001, %v1590_v19  ;;  %v1523_v46 = vmul.f32 %v4105_v40, %v4105_v40  ;;  %v1486_v49 = vmul.f32 0.001953125, %v1450_v14 }
 0x257   : > { %2059 = vperm.xlu1 %2940, %v4078_v21   ;;  %v1593_v23 = vmax.f32 %v1557_v32, 0.0  ;;  %v1556_v59 = vsub.f32 %v1484_v39, %v1520_v11  ;;  %v1522_v10 = vmul.f32 %v4109_v38, %v4109_v38  ;;  %v4119_v5 = vmul.f32 0.001953125, %v1381_v54  ;;  %v1455_v39 = vld [vmem:[#allocation3 + $0xe8] sm:$0xff] }
 0x258   : > { %2054 = vperm.xlu0 %2939, %v4088_v24   ;;  %2983 = vrsqrt.f32 %v1626_v16  ;;  %v1559_v42 = vsub.f32 %v1487_v8, %v1523_v46  ;;  %v1489_v44 = vmul.f32 0.001953125, %v1453_v15  ;;  %v4121_v2 = vmul.f32 0.001953125, %v1380_v22  ;;  %v1695_v54 = vld [vmem:[%s4742_s3 + $0x88] sm:$0xff] }
 0x259   : > { %v1629_v63 = vadd.f32 0.001, %v1593_v23  ;;  %v1592_v62 = vmax.f32 %v1556_v59, 0.0  ;;  %v1558_v14 = vsub.f32 %v1486_v49, %v1522_v10  ;;  %v1525_v19 = vmul.f32 %v4119_v5, %v4119_v5  ;;  %v1382_v49 = vld [vmem:[#allocation2 + $0xe0] sm:$0xff] }
 0x25a   : > { %v1595_v20 = vmax.f32 %v1559_v42, 0.0  ;;  %v1488_v32 = vmul.f32 0.001953125, %v1452_v6  ;;  %v1524_v11 = vmul.f32 %v4121_v2, %v4121_v2  ;;  %v4134_v8 = vmul.f32 0.001953125, %v1383_v56  ;;  %v1694_v10 = vld [vmem:[%s4742_s3 + $0x80] sm:$0xff] }
 0x25b   : > { %2069 = vperm.xlu1 %2940, %v4093_v45   ;;  %v2972_v15 = vpop.eup %2971  ;;  %2985 = vrsqrt.f32 %v1629_v63  ;;  %v1628_v22 = vadd.f32 0.001, %v1592_v62  ;;  %v1594_v16 = vmax.f32 %v1558_v14, 0.0  ;;  %v1561_v46 = vsub.f32 %v1489_v44, %v1525_v19  ;;  %v1454_v56 = vld [vmem:[#allocation3 + $0xe0] sm:$0xff]  ;;  %v1697_v63 = vld [vmem:[%s4742_s3 + $0x98] sm:$0xff] }
 0x25c   : > { %2064 = vperm.xlu0 %2939, %v4096_v29   ;;  %v2974_v23 = vpop.eup %2973  ;;  %v4137_v59 = vmul.f32 %v2972_v15, %v1692_v48  ;;  %v1631_v6 = vadd.f32 0.001, %v1595_v20  ;;  %v1560_v42 = vsub.f32 %v1488_v32, %v1524_v11  ;;  %v1491_v1 = vmul.f32 0.001953125, %v1455_v39  ;;  %v1696_v48 = vld [vmem:[%s4742_s3 + $0x90] sm:$0xff]  ;;  %v1385_v20 = vld [vmem:[#allocation2 + $0xf8] sm:$0xff] }
 0x25d   : > { %v4142_v4 = vmul.f32 %v2974_v23, %v1695_v54  ;;  %2987 = vrsqrt.f32 %v1628_v22  ;;  %v1630_v44 = vadd.f32 0.001, %v1594_v16  ;;  %v1597_v62 = vmax.f32 %v1561_v46, 0.0  ;;  %v1457_v32 = vld [vmem:[#allocation3 + $0xf8] sm:$0xff]  ;;  %v1699_v22 = vld [vmem:[%s4742_s3 + $0xa8] sm:$0xff] }
 0x25e   : > { %v2976_v14 = vpop.eup %2975  ;;  %2989 = vrsqrt.f32 %v1631_v6  ;;  %v1596_v19 = vmax.f32 %v1560_v42, 0.0  ;;  %v1527_v39 = vmul.f32 %v4134_v8, %v4134_v8  ;;  %v4153_v54 = vmul.f32 0.001953125, %v1382_v49 }
 0x25f   : > { %2079 = vperm.xlu1 %2940, %v4112_v17   ;;  %v2978_v11 = vpop.eup %2977  ;;  %v4156_v15 = vmul.f32 %v2976_v14, %v1694_v10  ;;  %2991 = vrsqrt.f32 %v1630_v44  ;;  %v1633_v16 = vadd.f32 0.001, %v1597_v62  ;;  %v1490_v46 = vmul.f32 0.001953125, %v1454_v56  ;;  %v1459_v62 = vld [vmem:[#allocation3 + $0x108] sm:$0xff]  ;;  %v1386_v56 = vld [vmem:[#allocation2 + $0x100] sm:$0xff] }
 0x260   : > { %4770 = vst [vmem:[#allocation17_spill] sm:$0xff] %v4153_v54  ;;  %2074 = vperm.xlu0 %2939, %v4137_v59   ;;  %v2980_v23 = vpop.eup %2979  ;;  %v4161_v6 = vmul.f32 %v2978_v11, %v1697_v63  ;;  %v1632_v42 = vadd.f32 0.001, %v1596_v19  ;;  %v1563_v49 = vsub.f32 %v1491_v1, %v1527_v39  ;;  %v1526_v57 = vmul.f32 %v4153_v54, %v4153_v54  ;;  %v1458_v39 = vld [vmem:[#allocation3 + $0x100] sm:$0xff] }
 0x261   : > { %v2982_v10 = vpop.eup %2981  ;;  %v4165_v14 = vmul.f32 %v2980_v23, %v1696_v48  ;;  %2993 = vrsqrt.f32 %v1633_v16  ;;  %v4167_v60 = vmul.f32 0.001953125, %v1385_v20  ;;  %v1493_v44 = vmul.f32 0.001953125, %v1457_v32  ;;  %v1698_v48 = vld [vmem:[%s4742_s3 + $0xa0] sm:$0xff] }
 0x262   : > { %v4170_v63 = vmul.f32 %v2982_v10, %v1699_v22  ;;  %2995 = vrsqrt.f32 %v1632_v42  ;;  %v1599_v1 = vmax.f32 %v1563_v49, 0.0  ;;  %v1562_v19 = vsub.f32 %v1490_v46, %v1526_v57  ;;  %v1389_v57 = vld [vmem:[#allocation2 + $0x118] sm:$0xff] }
 0x263   : > { %4771 = vst [vmem:[#allocation18_spill] sm:$0xff] %v4167_v60  ;;  %2089 = vperm.xlu1 %2940, %v4142_v4   ;;  %v1529_v20 = vmul.f32 %v4167_v60, %v4167_v60  ;;  %v4178_v32 = vmul.f32 0.001953125, %v1384_v12  ;;  %v1492_v11 = vmul.f32 0.001953125, %v1456_v61  ;;  %v4180_v16 = vmul.f32 0.001953125, %v1387_v47  ;;  %v1461_v12 = vld [vmem:[#allocation3 + $0x118] sm:$0xff]  ;;  %v1388_v60 = vld [vmem:[#allocation2 + $0x110] sm:$0xff] }
 0x264   : > { %2084 = vperm.xlu0 %2939, %v4156_v15   ;;  %v1635_v22 = vadd.f32 0.001, %v1599_v1  ;;  %v1598_v23 = vmax.f32 %v1562_v19, 0.0  ;;  %v1495_v42 = vmul.f32 0.001953125, %v1459_v62  ;;  %v4182_v49 = vmul.f32 0.001953125, %v1386_v56  ;;  %v1701_v47 = vld [vmem:[%s4742_s3 + $0xb8] sm:$0xff] }
 0x265   : > { %4772 = vst [vmem:[#allocation19_spill] sm:$0xff] %v4178_v32  ;;  %4773 = vst [vmem:[#allocation20_spill] sm:$0xff] %v4180_v16  ;;  %v2984_v46 = vpop.eup %2983  ;;  %v1565_v10 = vsub.f32 %v1493_v44, %v1529_v20  ;;  %v1528_v41 = vmul.f32 %v4178_v32, %v4178_v32  ;;  %v1531_v0 = vmul.f32 %v4180_v16, %v4180_v16  ;;  %v1494_v28 = vmul.f32 0.001953125, %v1458_v39  ;;  %v1460_v20 = vld [vmem:[#allocation3 + $0x110] sm:$0xff] }
 0x266   : > { %4774 = vst [vmem:[#allocation21_spill] sm:$0xff] %v4182_v49  ;;  %v4189_v61 = vmul.f32 %v2984_v46, %v1698_v48  ;;  %2997 = vrsqrt.f32 %v1635_v22  ;;  %v1634_v62 = vadd.f32 0.001, %v1598_v23  ;;  %v1530_v44 = vmul.f32 %v4182_v49, %v4182_v49  ;;  %v1700_v48 = vld [vmem:[%s4742_s3 + $0xb0] sm:$0xff] }
 0x267   : > { %2099 = vperm.xlu1 %2940, %v4161_v6   ;;  %v1601_v56 = vmax.f32 %v1565_v10, 0.0  ;;  %v1564_v1 = vsub.f32 %v1492_v11, %v1528_v41  ;;  %v1567_v19 = vsub.f32 %v1495_v42, %v1531_v0  ;;  %v4197_v39 = vmul.f32 0.001953125, %v1389_v57 }
 0x268   : > { %2094 = vperm.xlu0 %2939, %v4165_v14   ;;  %v2986_v16 = vpop.eup %2985  ;;  %2999 = vrsqrt.f32 %v1634_v62  ;;  %v1566_v46 = vsub.f32 %v1494_v28, %v1530_v44  ;;  %v1497_v22 = vmul.f32 0.001953125, %v1461_v12  ;;  %v4202_v23 = vmul.f32 0.001953125, %v1388_v60  ;;  %v1702_v44 = vld [vmem:[%s4742_s3 + $0xc0] sm:$0xff] }
 0x269   : > { %v4204_v32 = vmul.f32 %v2986_v16, %v1701_v47  ;;  %v1637_v49 = vadd.f32 0.001, %v1601_v56  ;;  %v1600_v54 = vmax.f32 %v1564_v1, 0.0  ;;  %v1603_v10 = vmax.f32 %v1567_v19, 0.0  ;;  %v1703_v16 = vld [vmem:[%s4742_s3 + $0xc8] sm:$0xff] }
 0x26a   : > { %v2988_v41 = vpop.eup %2987  ;;  %v1602_v0 = vmax.f32 %v1566_v46, 0.0  ;;  %v1533_v11 = vmul.f32 %v4197_v39, %v4197_v39  ;;  %v1496_v42 = vmul.f32 0.001953125, %v1460_v20  ;;  %v1532_v57 = vmul.f32 %v4202_v23, %v4202_v23 }
 0x26b   : > { %2109 = vperm.xlu1 %2940, %v4170_v63   ;;  %v2990_v28 = vpop.eup %2989  ;;  %v4212_v60 = vmul.f32 %v2988_v41, %v1700_v48  ;;  %3001 = vrsqrt.f32 %v1637_v49  ;;  %v1636_v12 = vadd.f32 0.001, %v1600_v54  ;;  %v1639_v47 = vadd.f32 0.001, %v1603_v10  ;;  %v1705_v54 = vld [vmem:[%s4742_s3 + $0xd8] sm:$0xff] }
 0x26c   : > { %2104 = vperm.xlu0 %2939, %v4189_v61   ;;  %v2992_v62 = vpop.eup %2991  ;;  %v1638_v56 = vadd.f32 0.001, %v1602_v0  ;;  %v1569_v1 = vsub.f32 %v1497_v22, %v1533_v11  ;;  %v1568_v19 = vsub.f32 %v1496_v42, %v1532_v57  ;;  %v4222_v20 = vmul.f32 %v4014_v43, %v3938_v34  ;;  %v1704_v34 = vld [vmem:[%s4742_s3 + $0xd0] sm:$0xff] }
 0x26d   : > { %3003 = vrsqrt.f32 %v1636_v12  ;;  %v1739_v46 = vmul.f32 %v2990_v28, %v1703_v16  ;;  %v1738_v22 = vmul.f32 %v2992_v62, %v1702_v44  ;;  %v4234_v42 = vmul.f32 %v4049_v50, %v3956_v13  ;;  %v1707_v13 = vld [vmem:[%s4742_s3 + $0xe8] sm:$0xff]  ;;  %v4775_v44 = vld [vmem:[#allocation17_spill] sm:$0xff] }
 0x26e   : > { %v2994_v48 = vpop.eup %2993  ;;  %3005 = vrsqrt.f32 %v1639_v47  ;;  %v1605_v49 = vmax.f32 %v1569_v1, 0.0  ;;  %v1604_v10 = vmax.f32 %v1568_v19, 0.0  ;;  %v4238_v57 = vmul.f32 %v4069_v53, %v3960_v18  ;;  %v1706_v18 = vld [vmem:[%s4742_s3 + $0xe0] sm:$0xff]  ;;  %v4776_v1 = vld [vmem:[#allocation18_spill] sm:$0xff] }
 0x26f   : > { %2119 = vperm.xlu1 %2940, %v4204_v32   ;;  %v2996_v41 = vpop.eup %2995  ;;  %3007 = vrsqrt.f32 %v1638_v56  ;;  %v1741_v11 = vmul.f32 %v2994_v48, %v1705_v54  ;;  %v4242_v28 = vmul.f32 %v4072_v26, %v3962_v27  ;;  %v4246_v16 = vmul.f32 %v4078_v21, %v3966_v33  ;;  %v4777_v48 = vld [vmem:[#allocation19_spill] sm:$0xff]  ;;  %v4778_v54 = vld [vmem:[#allocation20_spill] sm:$0xff] }
 0x270   : > { %2114 = vperm.xlu0 %2939, %v4212_v60   ;;  %v1641_v43 = vadd.f32 0.001, %v1605_v49  ;;  %v1640_v0 = vadd.f32 0.001, %v1604_v10  ;;  %v1740_v47 = vmul.f32 %v2996_v41, %v1704_v34  ;;  %v4256_v27 = vmul.f32 %v4088_v24, %v3972_v3 }
 0x271   : > { %v4260_v33 = vmul.f32 %v4093_v45, %v3974_v51  ;;  %v4264_v53 = vmul.f32 %v4096_v29, %v3978_v55  ;;  %v4268_v21 = vmul.f32 %v4112_v17, %v3990_v30  ;;  %v4272_v62 = vmul.f32 %v4137_v59, %v4021_v52  ;;  %v1709_v55 = vld [vmem:[%s4742_s3 + $0xf8] sm:$0xff]  ;;  %v1708_v52 = vld [vmem:[%s4742_s3 + $0xf0] sm:$0xff]  ;;  %v1711_v17 = vld [vmem:[%s4742_s3 + $0x108] sm:$0xff] }
 0x272   : > { %3009 = vrsqrt.f32 %v1641_v43  ;;  %v4276_v3 = vmul.f32 %v4142_v4, %v4025_v7  ;;  %v4283_v24 = vmul.f32 %v4156_v15, %v4038_v31  ;;  %v4290_v45 = vmul.f32 %v4161_v6, %v4040_v58  ;;  %v1751_v43 = vld [vmem:[%s4743_s4 + $0x8] sm:$0xff] }
 0x273   : > { %2129 = vperm.xlu1 %2940, %v1739_v46   ;;  %v2998_v12 = vpop.eup %2997  ;;  %3011 = vrsqrt.f32 %v1640_v0  ;;  %v4294_v4 = vmul.f32 %v4165_v14, %v4042_v37  ;;  %v4298_v7 = vmul.f32 %v4170_v63, %v4056_v35  ;;  %v4305_v59 = vmul.f32 %v4189_v61, %v4067_v25  ;;  %v1710_v25 = vld [vmem:[%s4742_s3 + $0x100] sm:$0xff] }
 0x274   : > { %2124 = vperm.xlu0 %2939, %v1738_v22   ;;  %v1743_v26 = vmul.f32 %v2998_v12, %v1707_v13  ;;  %v4309_v58 = vmul.f32 %v4204_v32, %v4090_v36  ;;  %v4313_v37 = vmul.f32 %v4212_v60, %v4103_v9  ;;  %v4316_v6 = vmul.f32 %v1739_v46, %v4105_v40  ;;  %v1713_v36 = vld [vmem:[%s4742_s3 + $0x118] sm:$0xff]  ;;  %v1712_v40 = vld [vmem:[%s4742_s3 + $0x110] sm:$0xff]  ;;  %v4781_v13 = vld [vmem:[#allocation12_spill] sm:$0xff] }
 0x275   : > { %v3000_v50 = vpop.eup %2999  ;;  %v4325_v32 = vmul.f32 %v1738_v22, %v4109_v38  ;;  %v4328_v9 = vmul.f32 %v1741_v11, %v4119_v5  ;;  %v4334_v61 = vmul.f32 %v1740_v47, %v4121_v2  ;;  %v1823_v12 = vsub.f32 %v1751_v43, %v4222_v20  ;;  %v4785_v20 = vld [vmem:[#allocation11_spill] sm:$0xff] }
 0x276   : > { %v1742_v51 = vmul.f32 %v3000_v50, %v1706_v18  ;;  %v4337_v60 = vmul.f32 %v1743_v26, %v4134_v8  ;;  %v4779_v8 = vld [vmem:[#allocation21_spill] sm:$0xff] }
 0x277   : > { %2139 = vperm.xlu1 %2940, %v1741_v11   ;;  %v1750_v11 = vld [vmem:[%s4743_s4] sm:$0xff] }
 0x278   : > { %2134 = vperm.xlu0 %2939, %v1740_v47   ;;  %v3002_v30 = vpop.eup %3001  ;;  %v4340_v56 = vmul.f32 %v1742_v51, %v4775_v44  ;;  %v4780_v47 = vld [vmem:[#allocation7_spill] sm:$0xff] }
 0x279   : > { %v1745_v31 = vmul.f32 %v3002_v30, %v1709_v55  ;;  %v1789_v18 = vmul.f32 %v4781_v13, %v4780_v47  ;;  %v4783_v55 = vld [vmem:[#allocation8_spill] sm:$0xff]  ;;  %v4784_v30 = vld [vmem:[#allocation14_spill] sm:$0xff] }
 0x27a   : > { %v3004_v29 = vpop.eup %3003 }
 0x27b   : > { %2149 = vperm.xlu1 %2940, %v1743_v26   ;;  %v3006_v35 = vpop.eup %3005  ;;  %v1744_v15 = vmul.f32 %v3004_v29, %v1708_v52  ;;  %v4343_v38 = vmul.f32 %v1745_v31, %v4776_v1  ;;  %v1753_v26 = vld [vmem:[%s4743_s4 + $0x18] sm:$0xff]  ;;  %v1791_v52 = vmul.f32 %v4784_v30, %v4783_v55 }
 0x27c   : > { %2144 = vperm.xlu0 %2939, %v1742_v51   ;;  %v3008_v14 = vpop.eup %3007  ;;  %v1747_v63 = vmul.f32 %v3006_v35, %v1711_v17  ;;  %v1825_v51 = vsub.f32 %v1753_v26, %v1789_v18  ;;  %v4786_v17 = vld [vmem:[#allocation9_spill] sm:$0xff]  ;;  %v4787_v35 = vld [vmem:[#allocation15_spill] sm:$0xff]  ;;  %v1757_v1 = vld [vmem:[%s4743_s4 + $0x38] sm:$0xff] }
 0x27d   : > { %v1746_v5 = vmul.f32 %v3008_v14, %v1710_v25  ;;  %v4346_v46 = vmul.f32 %v1744_v15, %v4777_v48  ;;  %v1754_v14 = vld [vmem:[%s4743_s4 + $0x20] sm:$0xff] }
 0x27e   : > { %v4349_v49 = vmul.f32 %v1747_v63, %v4778_v54  ;;  %v1759_v54 = vld [vmem:[%s4743_s4 + $0x48] sm:$0xff] }
 0x27f   : > { %2159 = vperm.xlu1 %2940, %v1745_v31   ;;  %v3010_v19 = vpop.eup %3009  ;;  %v4352_v22 = vmul.f32 %v1746_v5, %v4779_v8  ;;  %v1755_v31 = vld [vmem:[%s4743_s4 + $0x28] sm:$0xff]  ;;  %v1761_v8 = vld [vmem:[%s4743_s4 + $0x58] sm:$0xff] }
 0x280   : > { %2154 = vperm.xlu0 %2939, %v1744_v15   ;;  %v3012_v2 = vpop.eup %3011  ;;  %v1749_v10 = vmul.f32 %v3010_v19, %v1713_v36  ;;  %v1790_v15 = vmul.f32 %v4787_v35, %v4786_v17  ;;  %v1827_v25 = vsub.f32 %v1755_v31, %v1791_v52  ;;  %v4789_v36 = vld [vmem:[#allocation16_spill] sm:$0xff]  ;;  %v1756_v19 = vld [vmem:[%s4743_s4 + $0x30] sm:$0xff]  ;;  %v1833_v43 = vsub.f32 %v1761_v8, %v4246_v16  ;;  %v1765_v16 = vld [vmem:[%s4743_s4 + $0x78] sm:$0xff] }
 0x281   : > { %v1748_v41 = vmul.f32 %v3012_v2, %v1712_v40  ;;  %v1828_v48 = vsub.f32 %v1756_v19, %v4234_v42  ;;  %v1758_v2 = vld [vmem:[%s4743_s4 + $0x40] sm:$0xff]  ;;  %v1760_v42 = vld [vmem:[%s4743_s4 + $0x50] sm:$0xff]  ;;  %v1837_v13 = vsub.f32 %v1765_v16, %v4268_v21  ;;  %v1769_v21 = vld [vmem:[%s4743_s4 + $0x98] sm:$0xff] }
 0x282   : > { %v4355_v34 = vmul.f32 %v1749_v10, %v4197_v39  ;;  %v4782_v39 = vld [vmem:[#allocation13_spill] sm:$0xff]  ;;  %v1826_v44 = vsub.f32 %v1754_v14, %v1790_v15  ;;  %v1841_v26 = vsub.f32 %v1769_v21, %v4290_v45  ;;  %v1773_v45 = vld [vmem:[%s4743_s4 + $0xb8] sm:$0xff] }
 0x283   : > { %2169 = vperm.xlu1 %2940, %v1747_v63   ;;  %v4361_v0 = vmul.f32 %v1748_v41, %v4202_v23  ;;  %v1822_v50 = vsub.f32 %v1750_v11, %v4782_v39  ;;  %v1752_v23 = vld [vmem:[%s4743_s4 + $0x10] sm:$0xff]  ;;  %v4788_v63 = vld [vmem:[#allocation10_spill] sm:$0xff]  ;;  %v1832_v11 = vsub.f32 %v1760_v42, %v4256_v27  ;;  %v1845_v30 = vsub.f32 %v1773_v45, %v4309_v58 }
 0x284   : > { %2164 = vperm.xlu0 %2939, %v1746_v5   ;;  %v1824_v29 = vsub.f32 %v1752_v23, %v4785_v20  ;;  %v1793_v40 = vmul.f32 %v4789_v36, %v4788_v63  ;;  %v1764_v27 = vld [vmem:[%s4743_s4 + $0x70] sm:$0xff]  ;;  %v1777_v58 = vld [vmem:[%s4743_s4 + $0xd8] sm:$0xff] }
 0x285   : > { %v1836_v18 = vsub.f32 %v1764_v27, %v4272_v62  ;;  %v1768_v62 = vld [vmem:[%s4743_s4 + $0x90] sm:$0xff]  ;;  %v1849_v31 = vsub.f32 %v1777_v58, %v4328_v9  ;;  %v1861_v45 = vld [vmem:[#allocation4 + $0x18] sm:$0xff]  ;;  %v1862_v58 = vld [vmem:[#allocation4 + $0x20] sm:$0xff] }
 0x286   : > { %v1829_v5 = vsub.f32 %v1757_v1, %v1793_v40  ;;  %v1840_v23 = vsub.f32 %v1768_v62, %v4294_v4  ;;  %v1772_v4 = vld [vmem:[%s4743_s4 + $0xb0] sm:$0xff] }
 0x287   : > { %2179 = vperm.xlu1 %2940, %v1749_v10   ;;  %v1831_v10 = vsub.f32 %v1759_v54, %v4238_v57  ;;  %v1763_v57 = vld [vmem:[%s4743_s4 + $0x68] sm:$0xff]  ;;  %v1844_v52 = vsub.f32 %v1772_v4, %v4313_v37  ;;  %v1776_v37 = vld [vmem:[%s4743_s4 + $0xd0] sm:$0xff] }
 0x288   : > { %2174 = vperm.xlu0 %2939, %v1748_v41   ;;  %v1830_v41 = vsub.f32 %v1758_v2, %v4242_v28  ;;  %v1762_v28 = vld [vmem:[%s4743_s4 + $0x60] sm:$0xff]  ;;  %v1848_v17 = vsub.f32 %v1776_v37, %v4334_v61  ;;  %v1781_v61 = vld [vmem:[%s4743_s4 + $0xf8] sm:$0xff]  ;;  %v1932_v4 = vld [vmem:[#allocation4 + $0x250] sm:$0xff] }
 0x289   : > { %v1834_v47 = vsub.f32 %v1762_v28, %v4264_v53  ;;  %v1766_v53 = vld [vmem:[%s4743_s4 + $0x80] sm:$0xff]  ;;  %v1853_v40 = vsub.f32 %v1781_v61, %v4343_v38  ;;  %v1864_v37 = vld [vmem:[#allocation4 + $0x30] sm:$0xff] }
 0x28b   : > { %2333 = vperm.xlu1 %2940, %v1823_v12   ;;  %v1835_v12 = vsub.f32 %v1763_v57, %v4260_v33  ;;  %v1767_v33 = vld [vmem:[%s4743_s4 + $0x88] sm:$0xff] }
 0x28c   : > { %2328 = vperm.xlu0 %2939, %v1822_v50   ;;  %v1839_v39 = vsub.f32 %v1767_v33, %v4276_v3  ;;  %v1838_v50 = vsub.f32 %v1766_v53, %v4283_v24  ;;  %v1771_v3 = vld [vmem:[%s4743_s4 + $0xa8] sm:$0xff]  ;;  %v1770_v24 = vld [vmem:[%s4743_s4 + $0xa0] sm:$0xff] }
 0x28d   : > { %v1842_v55 = vsub.f32 %v1770_v24, %v4305_v59  ;;  %v1774_v59 = vld [vmem:[%s4743_s4 + $0xc0] sm:$0xff] }
 0x28f   : > { %2343 = vperm.xlu1 %2940, %v1825_v51   ;;  %v1843_v51 = vsub.f32 %v1771_v3, %v4298_v7  ;;  %v1775_v7 = vld [vmem:[%s4743_s4 + $0xc8] sm:$0xff] }
 0x290   : > { %2338 = vperm.xlu0 %2939, %v1824_v29   ;;  %v1847_v20 = vsub.f32 %v1775_v7, %v4316_v6  ;;  %v1846_v29 = vsub.f32 %v1774_v59, %v4325_v32  ;;  %v1779_v6 = vld [vmem:[%s4743_s4 + $0xe8] sm:$0xff]  ;;  %v1778_v32 = vld [vmem:[%s4743_s4 + $0xe0] sm:$0xff] }
 0x291   : > { %v1851_v14 = vsub.f32 %v1779_v6, %v4337_v60  ;;  %v1850_v9 = vsub.f32 %v1778_v32, %v4340_v56  ;;  %v1783_v56 = vld [vmem:[%s4743_s4 + $0x108] sm:$0xff]  ;;  %v1930_v59 = vld [vmem:[#allocation4 + $0x240] sm:$0xff] }
 0x292   : > { %v1859_v7 = vld [vmem:[#allocation4 + $0x8] sm:$0xff] }
 0x293   : > { %2353 = vperm.xlu1 %2940, %v1827_v25   ;;  %v1780_v25 = vld [vmem:[%s4743_s4 + $0xf0] sm:$0xff] }
 0x294   : > { %2348 = vperm.xlu0 %2939, %v1826_v44   ;;  %v1852_v60 = vsub.f32 %v1780_v25, %v4346_v46  ;;  %v1782_v44 = vld [vmem:[%s4743_s4 + $0x100] sm:$0xff]  ;;  %v1785_v46 = vld [vmem:[%s4743_s4 + $0x118] sm:$0xff] }
 0x295   : > { %v1854_v38 = vsub.f32 %v1782_v44, %v4352_v22 }
 0x297   : > { %2363 = vperm.xlu1 %2940, %v1829_v5   ;;  %v1855_v5 = vsub.f32 %v1783_v56, %v4349_v49  ;;  %v1937_v56 = vld [vmem:[#allocation4 + $0x278] sm:$0xff] }
 0x298   : > { %2358 = vperm.xlu0 %2939, %v1828_v48   ;;  %v1784_v48 = vld [vmem:[%s4743_s4 + $0x110] sm:$0xff] }
 0x299   : > { %v1856_v49 = vsub.f32 %v1784_v48, %v4361_v0 }
 0x29b   : > { %2373 = vperm.xlu1 %2940, %v1831_v10   ;;  %v1857_v10 = vsub.f32 %v1785_v46, %v4355_v34  ;;  %v1935_v46 = vld [vmem:[#allocation4 + $0x268] sm:$0xff] }
 0x29c   : > { %2368 = vperm.xlu0 %2939, %v1830_v41  }
 0x29f   : > { %2383 = vperm.xlu1 %2940, %v1833_v43  }
 0x2a0   : > { %2378 = vperm.xlu0 %2939, %v1832_v11  }
 0x2a3   : > { %2393 = vperm.xlu1 %2940, %v1835_v12  }
 0x2a4   : > { %2388 = vperm.xlu0 %2939, %v1834_v47  }
 0x2a7   : > { %2403 = vperm.xlu1 %2940, %v1837_v13  }
 0x2a8   : > { %2398 = vperm.xlu0 %2939, %v1836_v18  }
 0x2ab   : > { %2413 = vperm.xlu1 %2940, %v1839_v39  }
 0x2ac   : > { %2408 = vperm.xlu0 %2939, %v1838_v50  }
 0x2af   : > { %2423 = vperm.xlu1 %2940, %v1841_v26  }
 0x2b0   : > { %2418 = vperm.xlu0 %2939, %v1840_v23  }
 0x2b3   : > { %2433 = vperm.xlu1 %2940, %v1843_v51   ;;  %v1858_v51 = vld [vmem:[#allocation4] sm:$0xff] }
 0x2b4   : > { %2428 = vperm.xlu0 %2939, %v1842_v55   ;;  %v1860_v55 = vld [vmem:[#allocation4 + $0x10] sm:$0xff] }
 0x2b7   : > { %2443 = vperm.xlu1 %2940, %v1845_v30   ;;  %v1933_v30 = vld [vmem:[#allocation4 + $0x258] sm:$0xff] }
 0x2b8   : > { %2438 = vperm.xlu0 %2939, %v1844_v52  }
 0x2bb   : > { %2453 = vperm.xlu1 %2940, %v1847_v20   ;;  %v1931_v20 = vld [vmem:[#allocation4 + $0x248] sm:$0xff] }
 0x2bc   : > { %2448 = vperm.xlu0 %2939, %v1846_v29  }
 0x2be   : > { %v4482_v35 = vpop.permute.xlu1 %2014 }
 0x2bf   : > { %v4484_v15 = vpop.permute.xlu0 %2004  ;;  %2463 = vperm.xlu1 %2940, %v1849_v31  }
 0x2c0   : > { %2458 = vperm.xlu0 %2939, %v1848_v17   ;;  %v2254_v61 = vmul.f32 %v4484_v15, %v1930_v59  ;;  %v2255_v25 = vmul.f32 %v4484_v15, %v1931_v20 }
 0x2c2   : > { %v4494_v63 = vpop.permute.xlu1 %2019 }
 0x2c3   : > { %v4496_v36 = vpop.permute.xlu0 %2009  ;;  %2473 = vperm.xlu1 %2940, %v1851_v14   ;;  %v2182_v14 = vmul.f32 %v4484_v15, %v1858_v51  ;;  %v2261_v20 = vmul.f32 %v4494_v63, %v1937_v56 }
 0x2c4   : > { %2468 = vperm.xlu0 %2939, %v1850_v9   ;;  %v2184_v31 = vmul.f32 %v4496_v36, %v1860_v55  ;;  %v2185_v17 = vmul.f32 %v4496_v36, %v1861_v45  ;;  %v2256_v6 = vmul.f32 %v4496_v36, %v1932_v4  ;;  %v2257_v32 = vmul.f32 %v4496_v36, %v1933_v30 }
 0x2c5   : > { %v2183_v9 = vmul.f32 %v4484_v15, %v1859_v7  ;;  %v2188_v7 = vmul.f32 %v4494_v63, %v1864_v37  ;;  %v2259_v37 = vmul.f32 %v4482_v35, %v1935_v46 }
 0x2c6   : > { %v4506_v1 = vpop.permute.xlu1 %2029 }
 0x2c7   : > { %v4508_v19 = vpop.permute.xlu0 %2024  ;;  %2483 = vperm.xlu1 %2940, %v1853_v40   ;;  %v1865_v40 = vld [vmem:[#allocation4 + $0x38] sm:$0xff] }
 0x2c8   : > { %2478 = vperm.xlu0 %2939, %v1852_v60   ;;  %v1936_v60 = vld [vmem:[#allocation4 + $0x270] sm:$0xff]  ;;  %v2189_v15 = vmul.f32 %v4494_v63, %v1865_v40  ;;  %v1939_v40 = vld [vmem:[#allocation4 + $0x288] sm:$0xff] }
 0x2c9   : > { %v2260_v59 = vmul.f32 %v4494_v63, %v1936_v60 }
 0x2ca   : > { %v4518_v54 = vpop.permute.xlu1 %2039 }
 0x2cb   : > { %v4520_v2 = vpop.permute.xlu0 %2034  ;;  %2493 = vperm.xlu1 %2940, %v1855_v5   ;;  %v1863_v5 = vld [vmem:[#allocation4 + $0x28] sm:$0xff] }
 0x2cc   : > { %2488 = vperm.xlu0 %2939, %v1854_v38   ;;  %v1934_v38 = vld [vmem:[#allocation4 + $0x260] sm:$0xff] }
 0x2ce   : > { %v4524_v41 = vpop.permute.xlu1 %2049 }
 0x2cf   : > { %v4526_v22 = vpop.permute.xlu0 %2044  ;;  %2503 = vperm.xlu1 %2940, %v1857_v10  }
 0x2d0   : > { %2498 = vperm.xlu0 %2939, %v1856_v49  }
 0x2d2   : > { %v4528_v8 = vpop.permute.xlu1 %2059 }
 0x2d3   : > { %v4530_v42 = vpop.permute.xlu0 %2054 }
 0x2d6   : > { %v4532_v43 = vpop.permute.xlu1 %2069 }
 0x2d7   : > { %v4534_v11 = vpop.permute.xlu0 %2064 }
 0x2da   : > { %v4536_v57 = vpop.permute.xlu1 %2079 }
 0x2db   : > { %v4538_v34 = vpop.permute.xlu0 %2074 }
 0x2de   : > { %v4540_v28 = vpop.permute.xlu1 %2089 }
 0x2df   : > { %v4542_v0 = vpop.permute.xlu0 %2084 }
 0x2e2   : > { %v4544_v12 = vpop.permute.xlu1 %2099 }
 0x2e3   : > { %v4546_v47 = vpop.permute.xlu0 %2094 }
 0x2e6   : > { %v4548_v16 = vpop.permute.xlu1 %2109 }
 0x2e7   : > { %v4550_v27 = vpop.permute.xlu0 %2104 }
 0x2ea   : > { %v4552_v13 = vpop.permute.xlu1 %2119 }
 0x2eb   : > { %v4554_v18 = vpop.permute.xlu0 %2114 }
 0x2ee   : > { %v4556_v33 = vpop.permute.xlu1 %2129 }
 0x2ef   : > { %v4558_v53 = vpop.permute.xlu0 %2124 }
 0x2f2   : > { %v4560_v39 = vpop.permute.xlu1 %2139 }
 0x2f3   : > { %v4562_v50 = vpop.permute.xlu0 %2134 }
 0x2f6   : > { %v4564_v21 = vpop.permute.xlu1 %2149 }
 0x2f7   : > { %v4566_v62 = vpop.permute.xlu0 %2144 }
 0x2fa   : > { %v4568_v26 = vpop.permute.xlu1 %2159 }
 0x2fb   : > { %v4570_v23 = vpop.permute.xlu0 %2154 }
 0x2fe   : > { %v4572_v3 = vpop.permute.xlu1 %2169 }
 0x2ff   : > { %v4574_v24 = vpop.permute.xlu0 %2164 }
 0x302   : > { %v4576_v52 = vpop.permute.xlu1 %2179 }
 0x303   : > { %4790 = vst [vmem:[#allocation17_spill] sm:$0xff] %v4576_v52  ;;  %v4578_v29 = vpop.permute.xlu0 %2174  ;;  %v1869_v52 = vld [vmem:[#allocation4 + $0x58] sm:$0xff] }
 0x304   : > { %4791 = vst [vmem:[#allocation18_spill] sm:$0xff] %v4578_v29  ;;  %v1868_v29 = vld [vmem:[#allocation4 + $0x50] sm:$0xff] }
 0x305   : > { %v2192_v46 = vmul.f32 %v4506_v1, %v1868_v29  ;;  %v2263_v29 = vmul.f32 %v4508_v19, %v1939_v40 }
 0x306   : > { %v2334_v44 = vpop.permute.xlu1 %2333 }
 0x307   : > { %v2508_v48 = vadd.f32 %v2334_v44, %v2184_v31  ;;  %v2509_v10 = vadd.f32 %v2334_v44, %v2185_v17  ;;  %v2580_v49 = vadd.f32 %v2334_v44, %v2256_v6  ;;  %v2581_v55 = vadd.f32 %v2334_v44, %v2257_v32  ;;  %v2329_v36 = vpop.permute.xlu0 %2328  ;;  %v1940_v32 = vld [vmem:[#allocation4 + $0x290] sm:$0xff] }
 0x308   : > { %v2506_v45 = vadd.f32 %v2329_v36, %v2182_v14  ;;  %v2507_v51 = vadd.f32 %v2329_v36, %v2183_v9  ;;  %v2578_v4 = vadd.f32 %v2329_v36, %v2254_v61  ;;  %v2579_v30 = vadd.f32 %v2329_v36, %v2255_v25  ;;  %v1941_v14 = vld [vmem:[#allocation4 + $0x298] sm:$0xff]  ;;  %v1866_v9 = vld [vmem:[#allocation4 + $0x40] sm:$0xff]  ;;  %v1867_v61 = vld [vmem:[#allocation4 + $0x48] sm:$0xff] }
 0x309   : > { %2652 = vst [vmem:[#allocation4 + $0x10] sm:$0xff] %v2508_v48  ;;  %2653 = vst [vmem:[#allocation4 + $0x18] sm:$0xff] %v2509_v10  ;;  %v2186_v31 = vmul.f32 %v4482_v35, %v1862_v58  ;;  %v2187_v17 = vmul.f32 %v4482_v35, %v1863_v5  ;;  %v2258_v6 = vmul.f32 %v4482_v35, %v1934_v38  ;;  %v1938_v25 = vld [vmem:[#allocation4 + $0x280] sm:$0xff] }
 0x30a   : > { %2724 = vst [vmem:[#allocation4 + $0x250] sm:$0xff] %v2580_v49  ;;  %2725 = vst [vmem:[#allocation4 + $0x258] sm:$0xff] %v2581_v55  ;;  %v2344_v63 = vpop.permute.xlu1 %2343  ;;  %v2193_v49 = vmul.f32 %v4506_v1, %v1869_v52  ;;  %v2264_v55 = vmul.f32 %v4506_v1, %v1940_v32  ;;  %v2265_v36 = vmul.f32 %v4506_v1, %v1941_v14  ;;  %v1945_v52 = vld [vmem:[#allocation4 + $0x2b8] sm:$0xff] }
 0x30b   : > { %2650 = vst [vmem:[#allocation4] sm:$0xff] %v2506_v45  ;;  %2651 = vst [vmem:[#allocation4 + $0x8] sm:$0xff] %v2507_v51  ;;  %v2512_v60 = vadd.f32 %v2344_v63, %v2188_v7  ;;  %v2513_v56 = vadd.f32 %v2344_v63, %v2189_v15  ;;  %v2584_v58 = vadd.f32 %v2344_v63, %v2260_v59  ;;  %v2339_v5 = vpop.permute.xlu0 %2338  ;;  %v1872_v45 = vld [vmem:[#allocation4 + $0x70] sm:$0xff]  ;;  %v1873_v51 = vld [vmem:[#allocation4 + $0x78] sm:$0xff] }
 0x30c   : > { %2722 = vst [vmem:[#allocation4 + $0x240] sm:$0xff] %v2578_v4  ;;  %2723 = vst [vmem:[#allocation4 + $0x248] sm:$0xff] %v2579_v30  ;;  %v2585_v44 = vadd.f32 %v2344_v63, %v2261_v20  ;;  %v2510_v48 = vadd.f32 %v2339_v5, %v2186_v31  ;;  %v2511_v38 = vadd.f32 %v2339_v5, %v2187_v17  ;;  %v1944_v15 = vld [vmem:[#allocation4 + $0x2b0] sm:$0xff]  ;;  %v1870_v59 = vld [vmem:[#allocation4 + $0x60] sm:$0xff] }
 0x30d   : > { %v2582_v10 = vadd.f32 %v2339_v5, %v2258_v6  ;;  %v2583_v35 = vadd.f32 %v2339_v5, %v2259_v37  ;;  %2656 = vst [vmem:[#allocation4 + $0x30] sm:$0xff] %v2512_v60  ;;  %2657 = vst [vmem:[#allocation4 + $0x38] sm:$0xff] %v2513_v56  ;;  %v2190_v4 = vmul.f32 %v4508_v19, %v1866_v9  ;;  %v1871_v20 = vld [vmem:[#allocation4 + $0x68] sm:$0xff]  ;;  %v1942_v31 = vld [vmem:[#allocation4 + $0x2a0] sm:$0xff] }
 0x30e   : > { %2728 = vst [vmem:[#allocation4 + $0x270] sm:$0xff] %v2584_v58  ;;  %2729 = vst [vmem:[#allocation4 + $0x278] sm:$0xff] %v2585_v44  ;;  %v2191_v30 = vmul.f32 %v4508_v19, %v1867_v61  ;;  %v2262_v7 = vmul.f32 %v4508_v19, %v1938_v25  ;;  %v2354_v1 = vpop.permute.xlu1 %2353  ;;  %v1943_v17 = vld [vmem:[#allocation4 + $0x2a8] sm:$0xff]  ;;  %v2196_v40 = vmul.f32 %v4518_v54, %v1872_v45  ;;  %v1876_v44 = vld [vmem:[#allocation4 + $0x90] sm:$0xff] }
 0x30f   : > { %2654 = vst [vmem:[#allocation4 + $0x20] sm:$0xff] %v2510_v48  ;;  %2655 = vst [vmem:[#allocation4 + $0x28] sm:$0xff] %v2511_v38  ;;  %v2516_v6 = vadd.f32 %v2354_v1, %v2192_v46  ;;  %v2517_v37 = vadd.f32 %v2354_v1, %v2193_v49  ;;  %v2588_v32 = vadd.f32 %v2354_v1, %v2264_v55  ;;  %v2349_v9 = vpop.permute.xlu0 %2348  ;;  %v1877_v5 = vld [vmem:[#allocation4 + $0x98] sm:$0xff]  ;;  %v1948_v46 = vld [vmem:[#allocation4 + $0x2d0] sm:$0xff] }
 0x310   : > { %2726 = vst [vmem:[#allocation4 + $0x260] sm:$0xff] %v2582_v10  ;;  %2727 = vst [vmem:[#allocation4 + $0x268] sm:$0xff] %v2583_v35  ;;  %v2589_v14 = vadd.f32 %v2354_v1, %v2265_v36  ;;  %v2514_v63 = vadd.f32 %v2349_v9, %v2190_v4  ;;  %v2515_v61 = vadd.f32 %v2349_v9, %v2191_v30  ;;  %v1949_v49 = vld [vmem:[#allocation4 + $0x2d8] sm:$0xff]  ;;  %v1874_v55 = vld [vmem:[#allocation4 + $0x80] sm:$0xff] }
 0x311   : > { %v2586_v25 = vadd.f32 %v2349_v9, %v2262_v7  ;;  %v2587_v19 = vadd.f32 %v2349_v9, %v2263_v29  ;;  %v2197_v60 = vmul.f32 %v4518_v54, %v1873_v51  ;;  %v2268_v56 = vmul.f32 %v4518_v54, %v1944_v15  ;;  %2660 = vst [vmem:[#allocation4 + $0x50] sm:$0xff] %v2516_v6  ;;  %v1875_v36 = vld [vmem:[#allocation4 + $0x88] sm:$0xff]  ;;  %v1946_v45 = vld [vmem:[#allocation4 + $0x2c0] sm:$0xff] }
 0x312   : > { %v2269_v58 = vmul.f32 %v4518_v54, %v1945_v52  ;;  %2661 = vst [vmem:[#allocation4 + $0x58] sm:$0xff] %v2517_v37  ;;  %2732 = vst [vmem:[#allocation4 + $0x290] sm:$0xff] %v2588_v32  ;;  %v2194_v48 = vmul.f32 %v4520_v2, %v1870_v59  ;;  %v2195_v38 = vmul.f32 %v4520_v2, %v1871_v20  ;;  %v2364_v54 = vpop.permute.xlu1 %2363  ;;  %v1947_v51 = vld [vmem:[#allocation4 + $0x2c8] sm:$0xff]  ;;  %v1880_v37 = vld [vmem:[#allocation4 + $0xb0] sm:$0xff] }
 0x313   : > { %2733 = vst [vmem:[#allocation4 + $0x298] sm:$0xff] %v2589_v14  ;;  %v2266_v10 = vmul.f32 %v4520_v2, %v1942_v31  ;;  %v2267_v35 = vmul.f32 %v4520_v2, %v1943_v17  ;;  %2658 = vst [vmem:[#allocation4 + $0x40] sm:$0xff] %v2514_v63  ;;  %v2520_v4 = vadd.f32 %v2364_v54, %v2196_v40  ;;  %v2359_v15 = vpop.permute.xlu0 %2358  ;;  %v1881_v32 = vld [vmem:[#allocation4 + $0xb8] sm:$0xff]  ;;  %v1878_v40 = vld [vmem:[#allocation4 + $0xa0] sm:$0xff] }
 0x314   : > { %2659 = vst [vmem:[#allocation4 + $0x48] sm:$0xff] %v2515_v61  ;;  %2730 = vst [vmem:[#allocation4 + $0x280] sm:$0xff] %v2586_v25  ;;  %v2521_v30 = vadd.f32 %v2364_v54, %v2197_v60  ;;  %v2592_v7 = vadd.f32 %v2364_v54, %v2268_v56  ;;  %v2593_v29 = vadd.f32 %v2364_v54, %v2269_v58  ;;  %v1952_v25 = vld [vmem:[#allocation4 + $0x2f0] sm:$0xff]  ;;  %v1879_v60 = vld [vmem:[#allocation4 + $0xa8] sm:$0xff] }
 0x315   : > { %2731 = vst [vmem:[#allocation4 + $0x288] sm:$0xff] %v2587_v19  ;;  %v2518_v52 = vadd.f32 %v2359_v15, %v2194_v48  ;;  %v2519_v59 = vadd.f32 %v2359_v15, %v2195_v38  ;;  %v2590_v1 = vadd.f32 %v2359_v15, %v2266_v10  ;;  %v2591_v2 = vadd.f32 %v2359_v15, %v2267_v35  ;;  %v1953_v19 = vld [vmem:[#allocation4 + $0x2f8] sm:$0xff]  ;;  %v1950_v56 = vld [vmem:[#allocation4 + $0x2e0] sm:$0xff]  ;;  %v1951_v58 = vld [vmem:[#allocation4 + $0x2e8] sm:$0xff] }
 0x316   : > { %v2200_v20 = vmul.f32 %v4524_v41, %v1876_v44  ;;  %v2201_v31 = vmul.f32 %v4524_v41, %v1877_v5  ;;  %v2272_v17 = vmul.f32 %v4524_v41, %v1948_v46  ;;  %v2273_v6 = vmul.f32 %v4524_v41, %v1949_v49  ;;  %2664 = vst [vmem:[#allocation4 + $0x70] sm:$0xff] %v2520_v4  ;;  %v2374_v41 = vpop.permute.xlu1 %2373  ;;  %v1885_v4 = vld [vmem:[#allocation4 + $0xd8] sm:$0xff] }
 0x317   : > { %2665 = vst [vmem:[#allocation4 + $0x78] sm:$0xff] %v2521_v30  ;;  %2736 = vst [vmem:[#allocation4 + $0x2b0] sm:$0xff] %v2592_v7  ;;  %v2198_v14 = vmul.f32 %v4526_v22, %v1874_v55  ;;  %v2199_v9 = vmul.f32 %v4526_v22, %v1875_v36  ;;  %v2270_v63 = vmul.f32 %v4526_v22, %v1946_v45  ;;  %v2369_v10 = vpop.permute.xlu0 %2368 }
 0x318   : > { %2737 = vst [vmem:[#allocation4 + $0x2b8] sm:$0xff] %v2593_v29  ;;  %v2271_v61 = vmul.f32 %v4526_v22, %v1947_v51  ;;  %2662 = vst [vmem:[#allocation4 + $0x60] sm:$0xff] %v2518_v52  ;;  %v2524_v44 = vadd.f32 %v2374_v41, %v2200_v20  ;;  %v2525_v5 = vadd.f32 %v2374_v41, %v2201_v31  ;;  %v1884_v51 = vld [vmem:[#allocation4 + $0xd0] sm:$0xff]  ;;  %v1954_v20 = vld [vmem:[#allocation4 + $0x300] sm:$0xff] }
 0x319   : > { %2663 = vst [vmem:[#allocation4 + $0x68] sm:$0xff] %v2519_v59  ;;  %2734 = vst [vmem:[#allocation4 + $0x2a0] sm:$0xff] %v2590_v1  ;;  %v2596_v48 = vadd.f32 %v2374_v41, %v2272_v17  ;;  %v2597_v38 = vadd.f32 %v2374_v41, %v2273_v6  ;;  %v2522_v35 = vadd.f32 %v2369_v10, %v2198_v14  ;;  %v1956_v52 = vld [vmem:[#allocation4 + $0x310] sm:$0xff]  ;;  %v1957_v59 = vld [vmem:[#allocation4 + $0x318] sm:$0xff] }
 0x31a   : > { %2735 = vst [vmem:[#allocation4 + $0x2a8] sm:$0xff] %v2591_v2  ;;  %v2523_v46 = vadd.f32 %v2369_v10, %v2199_v9  ;;  %v2594_v49 = vadd.f32 %v2369_v10, %v2270_v63  ;;  %v2595_v22 = vadd.f32 %v2369_v10, %v2271_v61  ;;  %v2204_v55 = vmul.f32 %v4528_v8, %v1880_v37  ;;  %v1882_v1 = vld [vmem:[#allocation4 + $0xc0] sm:$0xff]  ;;  %v1883_v2 = vld [vmem:[#allocation4 + $0xc8] sm:$0xff]  ;;  %v1961_v10 = vld [vmem:[#allocation4 + $0x338] sm:$0xff] }
 0x31b   : > { %v2205_v54 = vmul.f32 %v4528_v8, %v1881_v32  ;;  %v2276_v36 = vmul.f32 %v4528_v8, %v1952_v25  ;;  %v2277_v45 = vmul.f32 %v4528_v8, %v1953_v19  ;;  %2668 = vst [vmem:[#allocation4 + $0x90] sm:$0xff] %v2524_v44  ;;  %2669 = vst [vmem:[#allocation4 + $0x98] sm:$0xff] %v2525_v5  ;;  %v2384_v8 = vpop.permute.xlu1 %2383  ;;  %v1955_v31 = vld [vmem:[#allocation4 + $0x308] sm:$0xff]  ;;  %v2379_v14 = vpop.permute.xlu0 %2378 }
 0x31c   : > { %2740 = vst [vmem:[#allocation4 + $0x2d0] sm:$0xff] %v2596_v48  ;;  %2741 = vst [vmem:[#allocation4 + $0x2d8] sm:$0xff] %v2597_v38  ;;  %v2202_v30 = vmul.f32 %v4530_v42, %v1878_v40  ;;  %v2203_v7 = vmul.f32 %v4530_v42, %v1879_v60  ;;  %v2274_v29 = vmul.f32 %v4530_v42, %v1950_v56  ;;  %v1888_v60 = vld [vmem:[#allocation4 + $0xf0] sm:$0xff]  ;;  %v1889_v56 = vld [vmem:[#allocation4 + $0xf8] sm:$0xff] }
 0x31d   : > { %v2275_v15 = vmul.f32 %v4530_v42, %v1951_v58  ;;  %2666 = vst [vmem:[#allocation4 + $0x80] sm:$0xff] %v2522_v35  ;;  %2667 = vst [vmem:[#allocation4 + $0x88] sm:$0xff] %v2523_v46  ;;  %v2528_v17 = vadd.f32 %v2384_v8, %v2204_v55  ;;  %v2529_v6 = vadd.f32 %v2384_v8, %v2205_v54  ;;  %v1960_v38 = vld [vmem:[#allocation4 + $0x330] sm:$0xff]  ;;  %v1886_v35 = vld [vmem:[#allocation4 + $0xe0] sm:$0xff] }
 0x31e   : > { %2738 = vst [vmem:[#allocation4 + $0x2c0] sm:$0xff] %v2594_v49  ;;  %2739 = vst [vmem:[#allocation4 + $0x2c8] sm:$0xff] %v2595_v22  ;;  %v2600_v37 = vadd.f32 %v2384_v8, %v2276_v36  ;;  %v2601_v32 = vadd.f32 %v2384_v8, %v2277_v45  ;;  %v2526_v9 = vadd.f32 %v2379_v14, %v2202_v30  ;;  %v1887_v46 = vld [vmem:[#allocation4 + $0xe8] sm:$0xff]  ;;  %v1958_v49 = vld [vmem:[#allocation4 + $0x320] sm:$0xff] }
 0x31f   : > { %v2527_v63 = vadd.f32 %v2379_v14, %v2203_v7  ;;  %v2598_v61 = vadd.f32 %v2379_v14, %v2274_v29  ;;  %v2599_v42 = vadd.f32 %v2379_v14, %v2275_v15  ;;  %v2208_v25 = vmul.f32 %v4532_v43, %v1884_v51  ;;  %2672 = vst [vmem:[#allocation4 + $0xb0] sm:$0xff] %v2528_v17  ;;  %v1959_v22 = vld [vmem:[#allocation4 + $0x328] sm:$0xff]  ;;  %v2389_v51 = vpop.permute.xlu0 %2388  ;;  %v1893_v8 = vld [vmem:[#allocation4 + $0x118] sm:$0xff] }
 0x320   : > { %v2209_v19 = vmul.f32 %v4532_v43, %v1885_v4  ;;  %v2280_v40 = vmul.f32 %v4532_v43, %v1956_v52  ;;  %v2281_v41 = vmul.f32 %v4532_v43, %v1957_v59  ;;  %2673 = vst [vmem:[#allocation4 + $0xb8] sm:$0xff] %v2529_v6  ;;  %2744 = vst [vmem:[#allocation4 + $0x2f0] sm:$0xff] %v2600_v37  ;;  %v2394_v43 = vpop.permute.xlu1 %2393  ;;  %v1964_v6 = vld [vmem:[#allocation4 + $0x350] sm:$0xff]  ;;  %v1965_v37 = vld [vmem:[#allocation4 + $0x358] sm:$0xff] }
 0x321   : > { %2745 = vst [vmem:[#allocation4 + $0x2f8] sm:$0xff] %v2601_v32  ;;  %v2206_v58 = vmul.f32 %v4534_v11, %v1882_v1  ;;  %v2207_v44 = vmul.f32 %v4534_v11, %v1883_v2  ;;  %v2278_v5 = vmul.f32 %v4534_v11, %v1954_v20  ;;  %v2279_v48 = vmul.f32 %v4534_v11, %v1955_v31  ;;  %v1892_v1 = vld [vmem:[#allocation4 + $0x110] sm:$0xff]  ;;  %v1890_v32 = vld [vmem:[#allocation4 + $0x100] sm:$0xff]  ;;  %v1891_v14 = vld [vmem:[#allocation4 + $0x108] sm:$0xff] }
 0x322   : > { %2670 = vst [vmem:[#allocation4 + $0xa0] sm:$0xff] %v2526_v9  ;;  %2671 = vst [vmem:[#allocation4 + $0xa8] sm:$0xff] %v2527_v63  ;;  %v2532_v55 = vadd.f32 %v2394_v43, %v2208_v25  ;;  %v2533_v54 = vadd.f32 %v2394_v43, %v2209_v19  ;;  %v2604_v36 = vadd.f32 %v2394_v43, %v2280_v40  ;;  %v1962_v9 = vld [vmem:[#allocation4 + $0x340] sm:$0xff]  ;;  %v1963_v63 = vld [vmem:[#allocation4 + $0x348] sm:$0xff] }
 0x323   : > { %2742 = vst [vmem:[#allocation4 + $0x2e0] sm:$0xff] %v2598_v61  ;;  %2743 = vst [vmem:[#allocation4 + $0x2e8] sm:$0xff] %v2599_v42  ;;  %v2605_v45 = vadd.f32 %v2394_v43, %v2281_v41  ;;  %v2530_v4 = vadd.f32 %v2389_v51, %v2206_v58  ;;  %v2531_v30 = vadd.f32 %v2389_v51, %v2207_v44  ;;  %v2399_v40 = vpop.permute.xlu0 %2398 }
 0x324   : > { %v2602_v7 = vadd.f32 %v2389_v51, %v2278_v5  ;;  %v2603_v11 = vadd.f32 %v2389_v51, %v2279_v48  ;;  %v2212_v29 = vmul.f32 %v4536_v57, %v1888_v60  ;;  %v2213_v15 = vmul.f32 %v4536_v57, %v1889_v56  ;;  %2676 = vst [vmem:[#allocation4 + $0xd0] sm:$0xff] %v2532_v55  ;;  %v1969_v55 = vld [vmem:[#allocation4 + $0x378] sm:$0xff]  ;;  %v1967_v51 = vld [vmem:[#allocation4 + $0x368] sm:$0xff] }
 0x325   : > { %v2284_v52 = vmul.f32 %v4536_v57, %v1960_v38  ;;  %v2285_v59 = vmul.f32 %v4536_v57, %v1961_v10  ;;  %2677 = vst [vmem:[#allocation4 + $0xd8] sm:$0xff] %v2533_v54  ;;  %2748 = vst [vmem:[#allocation4 + $0x310] sm:$0xff] %v2604_v36  ;;  %v2210_v2 = vmul.f32 %v4538_v34, %v1886_v35  ;;  %v2404_v57 = vpop.permute.xlu1 %2403  ;;  %v1896_v38 = vld [vmem:[#allocation4 + $0x130] sm:$0xff]  ;;  %v1897_v10 = vld [vmem:[#allocation4 + $0x138] sm:$0xff] }
 0x326   : > { %2749 = vst [vmem:[#allocation4 + $0x318] sm:$0xff] %v2605_v45  ;;  %v2211_v20 = vmul.f32 %v4538_v34, %v1887_v46  ;;  %v2282_v31 = vmul.f32 %v4538_v34, %v1958_v49  ;;  %v2283_v17 = vmul.f32 %v4538_v34, %v1959_v22  ;;  %2674 = vst [vmem:[#allocation4 + $0xc0] sm:$0xff] %v2530_v4  ;;  %v1968_v22 = vld [vmem:[#allocation4 + $0x370] sm:$0xff]  ;;  %v1894_v54 = vld [vmem:[#allocation4 + $0x120] sm:$0xff] }
 0x327   : > { %2675 = vst [vmem:[#allocation4 + $0xc8] sm:$0xff] %v2531_v30  ;;  %2746 = vst [vmem:[#allocation4 + $0x300] sm:$0xff] %v2602_v7  ;;  %v2536_v61 = vadd.f32 %v2404_v57, %v2212_v29  ;;  %v2537_v42 = vadd.f32 %v2404_v57, %v2213_v15  ;;  %v2608_v25 = vadd.f32 %v2404_v57, %v2284_v52  ;;  %v1895_v36 = vld [vmem:[#allocation4 + $0x128] sm:$0xff]  ;;  %v1966_v45 = vld [vmem:[#allocation4 + $0x360] sm:$0xff]  ;;  %v2409_v29 = vpop.permute.xlu0 %2408 }
 0x328   : > { %2747 = vst [vmem:[#allocation4 + $0x308] sm:$0xff] %v2603_v11  ;;  %v2609_v19 = vadd.f32 %v2404_v57, %v2285_v59  ;;  %v2534_v41 = vadd.f32 %v2399_v40, %v2210_v2  ;;  %v2535_v60 = vadd.f32 %v2399_v40, %v2211_v20  ;;  %v2606_v56 = vadd.f32 %v2399_v40, %v2282_v31  ;;  %v1900_v31 = vld [vmem:[#allocation4 + $0x150] sm:$0xff] }
 0x329   : > { %v2607_v34 = vadd.f32 %v2399_v40, %v2283_v17  ;;  %v2216_v58 = vmul.f32 %v4540_v28, %v1892_v1  ;;  %v2217_v44 = vmul.f32 %v4540_v28, %v1893_v8  ;;  %v2288_v5 = vmul.f32 %v4540_v28, %v1964_v6  ;;  %2680 = vst [vmem:[#allocation4 + $0xf0] sm:$0xff] %v2536_v61  ;;  %v1901_v17 = vld [vmem:[#allocation4 + $0x158] sm:$0xff]  ;;  %v1899_v61 = vld [vmem:[#allocation4 + $0x148] sm:$0xff] }
 0x32a   : > { %v2289_v48 = vmul.f32 %v4540_v28, %v1965_v37  ;;  %2681 = vst [vmem:[#allocation4 + $0xf8] sm:$0xff] %v2537_v42  ;;  %2752 = vst [vmem:[#allocation4 + $0x330] sm:$0xff] %v2608_v25  ;;  %v2214_v35 = vmul.f32 %v4542_v0, %v1890_v32  ;;  %v2215_v43 = vmul.f32 %v4542_v0, %v1891_v14  ;;  %v2414_v28 = vpop.permute.xlu1 %2413  ;;  %v1972_v14 = vld [vmem:[#allocation4 + $0x390] sm:$0xff]  ;;  %v1970_v42 = vld [vmem:[#allocation4 + $0x380] sm:$0xff] }
 0x32b   : > { %2753 = vst [vmem:[#allocation4 + $0x338] sm:$0xff] %v2609_v19  ;;  %v2286_v46 = vmul.f32 %v4542_v0, %v1962_v9  ;;  %v2287_v49 = vmul.f32 %v4542_v0, %v1963_v63  ;;  %2678 = vst [vmem:[#allocation4 + $0xe0] sm:$0xff] %v2534_v41  ;;  %v2540_v4 = vadd.f32 %v2414_v28, %v2216_v58  ;;  %v1973_v9 = vld [vmem:[#allocation4 + $0x398] sm:$0xff]  ;;  %v1898_v63 = vld [vmem:[#allocation4 + $0x140] sm:$0xff] }
 0x32c   : > { %2679 = vst [vmem:[#allocation4 + $0xe8] sm:$0xff] %v2535_v60  ;;  %2750 = vst [vmem:[#allocation4 + $0x320] sm:$0xff] %v2606_v56  ;;  %v2541_v30 = vadd.f32 %v2414_v28, %v2217_v44  ;;  %v2612_v7 = vadd.f32 %v2414_v28, %v2288_v5  ;;  %v2613_v11 = vadd.f32 %v2414_v28, %v2289_v48  ;;  %v1971_v25 = vld [vmem:[#allocation4 + $0x388] sm:$0xff]  ;;  %v2419_v56 = vpop.permute.xlu0 %2418  ;;  %v1977_v28 = vld [vmem:[#allocation4 + $0x3b8] sm:$0xff] }
 0x32d   : > { %2751 = vst [vmem:[#allocation4 + $0x328] sm:$0xff] %v2607_v34  ;;  %v2538_v15 = vadd.f32 %v2409_v29, %v2214_v35  ;;  %v2539_v52 = vadd.f32 %v2409_v29, %v2215_v43  ;;  %v2610_v59 = vadd.f32 %v2409_v29, %v2286_v46  ;;  %v2611_v0 = vadd.f32 %v2409_v29, %v2287_v49  ;;  %v1904_v35 = vld [vmem:[#allocation4 + $0x170] sm:$0xff]  ;;  %v1905_v43 = vld [vmem:[#allocation4 + $0x178] sm:$0xff] }
 0x32e   : > { %v2220_v1 = vmul.f32 %v4544_v12, %v1896_v38  ;;  %v2221_v8 = vmul.f32 %v4544_v12, %v1897_v10  ;;  %v2292_v2 = vmul.f32 %v4544_v12, %v1968_v22  ;;  %v2293_v20 = vmul.f32 %v4544_v12, %v1969_v55  ;;  %2684 = vst [vmem:[#allocation4 + $0x110] sm:$0xff] %v2540_v4  ;;  %v2424_v12 = vpop.permute.xlu1 %2423  ;;  %v1975_v4 = vld [vmem:[#allocation4 + $0x3a8] sm:$0xff] }
 0x32f   : > { %2685 = vst [vmem:[#allocation4 + $0x118] sm:$0xff] %v2541_v30  ;;  %2756 = vst [vmem:[#allocation4 + $0x350] sm:$0xff] %v2612_v7  ;;  %v2218_v6 = vmul.f32 %v4546_v47, %v1894_v54  ;;  %v2219_v37 = vmul.f32 %v4546_v47, %v1895_v36  ;;  %v2290_v32 = vmul.f32 %v4546_v47, %v1966_v45  ;;  %v1976_v54 = vld [vmem:[#allocation4 + $0x3b0] sm:$0xff]  ;;  %v1902_v36 = vld [vmem:[#allocation4 + $0x160] sm:$0xff] }
 0x330   : > { %2757 = vst [vmem:[#allocation4 + $0x358] sm:$0xff] %v2613_v11  ;;  %v2291_v57 = vmul.f32 %v4546_v47, %v1967_v51  ;;  %2682 = vst [vmem:[#allocation4 + $0x100] sm:$0xff] %v2538_v15  ;;  %v2544_v19 = vadd.f32 %v2424_v12, %v2220_v1  ;;  %v2545_v40 = vadd.f32 %v2424_v12, %v2221_v8  ;;  %v1903_v45 = vld [vmem:[#allocation4 + $0x168] sm:$0xff]  ;;  %v1974_v51 = vld [vmem:[#allocation4 + $0x3a0] sm:$0xff]  ;;  %v2429_v15 = vpop.permute.xlu0 %2428 }
 0x331   : > { %2683 = vst [vmem:[#allocation4 + $0x108] sm:$0xff] %v2539_v52  ;;  %2754 = vst [vmem:[#allocation4 + $0x340] sm:$0xff] %v2610_v59  ;;  %v2616_v41 = vadd.f32 %v2424_v12, %v2292_v2  ;;  %v2617_v60 = vadd.f32 %v2424_v12, %v2293_v20  ;;  %v2542_v34 = vadd.f32 %v2419_v56, %v2218_v6  ;;  %v1907_v12 = vld [vmem:[#allocation4 + $0x188] sm:$0xff] }
 0x332   : > { %2755 = vst [vmem:[#allocation4 + $0x348] sm:$0xff] %v2611_v0  ;;  %v2543_v58 = vadd.f32 %v2419_v56, %v2219_v37  ;;  %v2614_v44 = vadd.f32 %v2419_v56, %v2290_v32  ;;  %v2615_v47 = vadd.f32 %v2419_v56, %v2291_v57  ;;  %v2224_v5 = vmul.f32 %v4548_v16, %v1900_v31  ;;  %v1908_v31 = vld [vmem:[#allocation4 + $0x190] sm:$0xff] }
 0x333   : > { %v2225_v48 = vmul.f32 %v4548_v16, %v1901_v17  ;;  %v2296_v38 = vmul.f32 %v4548_v16, %v1972_v14  ;;  %v2297_v10 = vmul.f32 %v4548_v16, %v1973_v9  ;;  %2688 = vst [vmem:[#allocation4 + $0x130] sm:$0xff] %v2544_v19  ;;  %2689 = vst [vmem:[#allocation4 + $0x138] sm:$0xff] %v2545_v40  ;;  %v2434_v16 = vpop.permute.xlu1 %2433  ;;  %v1909_v17 = vld [vmem:[#allocation4 + $0x198] sm:$0xff]  ;;  %v1980_v14 = vld [vmem:[#allocation4 + $0x3d0] sm:$0xff] }
 0x334   : > { %2760 = vst [vmem:[#allocation4 + $0x370] sm:$0xff] %v2616_v41  ;;  %2761 = vst [vmem:[#allocation4 + $0x378] sm:$0xff] %v2617_v60  ;;  %v2222_v46 = vmul.f32 %v4550_v27, %v1898_v63  ;;  %v2223_v49 = vmul.f32 %v4550_v27, %v1899_v61  ;;  %v2294_v22 = vmul.f32 %v4550_v27, %v1970_v42  ;;  %v1981_v9 = vld [vmem:[#allocation4 + $0x3d8] sm:$0xff]  ;;  %v1906_v63 = vld [vmem:[#allocation4 + $0x180] sm:$0xff]  ;;  %v2439_v60 = vpop.permute.xlu0 %2438 }
 0x335   : > { %v2295_v55 = vmul.f32 %v4550_v27, %v1971_v25  ;;  %2686 = vst [vmem:[#allocation4 + $0x120] sm:$0xff] %v2542_v34  ;;  %2687 = vst [vmem:[#allocation4 + $0x128] sm:$0xff] %v2543_v58  ;;  %v2548_v30 = vadd.f32 %v2434_v16, %v2224_v5  ;;  %v2549_v7 = vadd.f32 %v2434_v16, %v2225_v48  ;;  %v1978_v61 = vld [vmem:[#allocation4 + $0x3c0] sm:$0xff]  ;;  %v1979_v42 = vld [vmem:[#allocation4 + $0x3c8] sm:$0xff] }
 0x336   : > { %2758 = vst [vmem:[#allocation4 + $0x360] sm:$0xff] %v2614_v44  ;;  %2759 = vst [vmem:[#allocation4 + $0x368] sm:$0xff] %v2615_v47  ;;  %v2620_v11 = vadd.f32 %v2434_v16, %v2296_v38  ;;  %v2621_v29 = vadd.f32 %v2434_v16, %v2297_v10  ;;  %v2546_v52 = vadd.f32 %v2429_v15, %v2222_v46  ;;  %v1912_v38 = vld [vmem:[#allocation4 + $0x1b0] sm:$0xff]  ;;  %v1913_v10 = vld [vmem:[#allocation4 + $0x1b8] sm:$0xff] }
 0x337   : > { %v2547_v59 = vadd.f32 %v2429_v15, %v2223_v49  ;;  %v2618_v0 = vadd.f32 %v2429_v15, %v2294_v22  ;;  %v2619_v27 = vadd.f32 %v2429_v15, %v2295_v55  ;;  %v2228_v1 = vmul.f32 %v4552_v13, %v1904_v35  ;;  %2692 = vst [vmem:[#allocation4 + $0x150] sm:$0xff] %v2548_v30  ;;  %v1984_v22 = vld [vmem:[#allocation4 + $0x3f0] sm:$0xff]  ;;  %v1985_v55 = vld [vmem:[#allocation4 + $0x3f8] sm:$0xff]  ;;  %v1983_v16 = vld [vmem:[#allocation4 + $0x3e8] sm:$0xff] }
 0x338   : > { %v2229_v8 = vmul.f32 %v4552_v13, %v1905_v43  ;;  %v2300_v2 = vmul.f32 %v4552_v13, %v1976_v54  ;;  %v2301_v20 = vmul.f32 %v4552_v13, %v1977_v28  ;;  %2693 = vst [vmem:[#allocation4 + $0x158] sm:$0xff] %v2549_v7  ;;  %2764 = vst [vmem:[#allocation4 + $0x390] sm:$0xff] %v2620_v11  ;;  %v2444_v13 = vpop.permute.xlu1 %2443  ;;  %v1910_v54 = vld [vmem:[#allocation4 + $0x1a0] sm:$0xff]  ;;  %v1911_v28 = vld [vmem:[#allocation4 + $0x1a8] sm:$0xff]  ;;  %v2449_v7 = vpop.permute.xlu0 %2448 }
 0x339   : > { %2765 = vst [vmem:[#allocation4 + $0x398] sm:$0xff] %v2621_v29  ;;  %v2226_v6 = vmul.f32 %v4554_v18, %v1902_v36  ;;  %v2227_v37 = vmul.f32 %v4554_v18, %v1903_v45  ;;  %v2298_v32 = vmul.f32 %v4554_v18, %v1974_v51  ;;  %v2299_v57 = vmul.f32 %v4554_v18, %v1975_v4  ;;  %v1982_v36 = vld [vmem:[#allocation4 + $0x3e0] sm:$0xff] }
 0x33a   : > { %2690 = vst [vmem:[#allocation4 + $0x140] sm:$0xff] %v2546_v52  ;;  %2691 = vst [vmem:[#allocation4 + $0x148] sm:$0xff] %v2547_v59  ;;  %v2552_v25 = vadd.f32 %v2444_v13, %v2228_v1  ;;  %v2553_v19 = vadd.f32 %v2444_v13, %v2229_v8  ;;  %v2624_v40 = vadd.f32 %v2444_v13, %v2300_v2  ;;  %v1916_v1 = vld [vmem:[#allocation4 + $0x1d0] sm:$0xff]  ;;  %v1917_v8 = vld [vmem:[#allocation4 + $0x1d8] sm:$0xff] }
 0x33b   : > { %2762 = vst [vmem:[#allocation4 + $0x380] sm:$0xff] %v2618_v0  ;;  %2763 = vst [vmem:[#allocation4 + $0x388] sm:$0xff] %v2619_v27  ;;  %v2625_v41 = vadd.f32 %v2444_v13, %v2301_v20  ;;  %v2550_v56 = vadd.f32 %v2439_v60, %v2226_v6  ;;  %v2551_v34 = vadd.f32 %v2439_v60, %v2227_v37  ;;  %v1988_v6 = vld [vmem:[#allocation4 + $0x410] sm:$0xff]  ;;  %v1989_v37 = vld [vmem:[#allocation4 + $0x418] sm:$0xff] }
 0x33c   : > { %v2622_v58 = vadd.f32 %v2439_v60, %v2298_v32  ;;  %v2623_v18 = vadd.f32 %v2439_v60, %v2299_v57  ;;  %v2232_v44 = vmul.f32 %v4556_v33, %v1908_v31  ;;  %v2233_v47 = vmul.f32 %v4556_v33, %v1909_v17  ;;  %2696 = vst [vmem:[#allocation4 + $0x170] sm:$0xff] %v2552_v25  ;;  %v1914_v32 = vld [vmem:[#allocation4 + $0x1c0] sm:$0xff]  ;;  %v1915_v57 = vld [vmem:[#allocation4 + $0x1c8] sm:$0xff] }
 0x33d   : > { %v2304_v5 = vmul.f32 %v4556_v33, %v1980_v14  ;;  %v2305_v48 = vmul.f32 %v4556_v33, %v1981_v9  ;;  %2697 = vst [vmem:[#allocation4 + $0x178] sm:$0xff] %v2553_v19  ;;  %2768 = vst [vmem:[#allocation4 + $0x3b0] sm:$0xff] %v2624_v40  ;;  %v2230_v35 = vmul.f32 %v4558_v53, %v1906_v63  ;;  %v2454_v33 = vpop.permute.xlu1 %2453  ;;  %v1986_v14 = vld [vmem:[#allocation4 + $0x400] sm:$0xff]  ;;  %v1987_v9 = vld [vmem:[#allocation4 + $0x408] sm:$0xff] }
 0x33e   : > { %2769 = vst [vmem:[#allocation4 + $0x3b8] sm:$0xff] %v2625_v41  ;;  %v2231_v43 = vmul.f32 %v4558_v53, %v1907_v12  ;;  %v2302_v46 = vmul.f32 %v4558_v53, %v1978_v61  ;;  %v2303_v49 = vmul.f32 %v4558_v53, %v1979_v42  ;;  %2694 = vst [vmem:[#allocation4 + $0x160] sm:$0xff] %v2550_v56  ;;  %v2459_v42 = vpop.permute.xlu0 %2458 }
 0x33f   : > { %2695 = vst [vmem:[#allocation4 + $0x168] sm:$0xff] %v2551_v34  ;;  %2766 = vst [vmem:[#allocation4 + $0x3a0] sm:$0xff] %v2622_v58  ;;  %v2556_v45 = vadd.f32 %v2454_v33, %v2232_v44  ;;  %v2557_v51 = vadd.f32 %v2454_v33, %v2233_v47  ;;  %v2628_v4 = vadd.f32 %v2454_v33, %v2304_v5  ;;  %v1920_v58 = vld [vmem:[#allocation4 + $0x1f0] sm:$0xff] }
 0x340   : > { %2767 = vst [vmem:[#allocation4 + $0x3a8] sm:$0xff] %v2623_v18  ;;  %v2629_v30 = vadd.f32 %v2454_v33, %v2305_v48  ;;  %v2554_v11 = vadd.f32 %v2449_v7, %v2230_v35  ;;  %v2555_v29 = vadd.f32 %v2449_v7, %v2231_v43  ;;  %v2626_v15 = vadd.f32 %v2449_v7, %v2302_v46  ;;  %v1921_v18 = vld [vmem:[#allocation4 + $0x1f8] sm:$0xff]  ;;  %v1918_v35 = vld [vmem:[#allocation4 + $0x1e0] sm:$0xff]  ;;  %v1919_v43 = vld [vmem:[#allocation4 + $0x1e8] sm:$0xff] }
 0x341   : > { %v2627_v53 = vadd.f32 %v2449_v7, %v2303_v49  ;;  %v2236_v52 = vmul.f32 %v4560_v39, %v1912_v38  ;;  %v2237_v59 = vmul.f32 %v4560_v39, %v1913_v10  ;;  %v2308_v0 = vmul.f32 %v4560_v39, %v1984_v22  ;;  %2700 = vst [vmem:[#allocation4 + $0x190] sm:$0xff] %v2556_v45  ;;  %v1992_v38 = vld [vmem:[#allocation4 + $0x430] sm:$0xff]  ;;  %v1993_v10 = vld [vmem:[#allocation4 + $0x438] sm:$0xff]  ;;  %v1990_v46 = vld [vmem:[#allocation4 + $0x420] sm:$0xff] }
 0x342   : > { %v2309_v27 = vmul.f32 %v4560_v39, %v1985_v55  ;;  %2701 = vst [vmem:[#allocation4 + $0x198] sm:$0xff] %v2557_v51  ;;  %2772 = vst [vmem:[#allocation4 + $0x3d0] sm:$0xff] %v2628_v4  ;;  %v2234_v2 = vmul.f32 %v4562_v50, %v1910_v54  ;;  %v2235_v20 = vmul.f32 %v4562_v50, %v1911_v28  ;;  %v2464_v39 = vpop.permute.xlu1 %2463  ;;  %v1991_v49 = vld [vmem:[#allocation4 + $0x428] sm:$0xff]  ;;  %v2469_v28 = vpop.permute.xlu0 %2468 }
 0x343   : > { %2773 = vst [vmem:[#allocation4 + $0x3d8] sm:$0xff] %v2629_v30  ;;  %v2306_v31 = vmul.f32 %v4562_v50, %v1982_v36  ;;  %v2307_v17 = vmul.f32 %v4562_v50, %v1983_v16  ;;  %2698 = vst [vmem:[#allocation4 + $0x180] sm:$0xff] %v2554_v11  ;;  %v2560_v63 = vadd.f32 %v2464_v39, %v2236_v52  ;;  %v1924_v11 = vld [vmem:[#allocation4 + $0x210] sm:$0xff] }
 0x344   : > { %2699 = vst [vmem:[#allocation4 + $0x188] sm:$0xff] %v2555_v29  ;;  %2770 = vst [vmem:[#allocation4 + $0x3c0] sm:$0xff] %v2626_v15  ;;  %v2561_v13 = vadd.f32 %v2464_v39, %v2237_v59  ;;  %v2632_v12 = vadd.f32 %v2464_v39, %v2308_v0  ;;  %v2633_v61 = vadd.f32 %v2464_v39, %v2309_v27  ;;  %v1925_v29 = vld [vmem:[#allocation4 + $0x218] sm:$0xff]  ;;  %v1996_v0 = vld [vmem:[#allocation4 + $0x450] sm:$0xff] }
 0x345   : > { %2771 = vst [vmem:[#allocation4 + $0x3c8] sm:$0xff] %v2627_v53  ;;  %v2558_v25 = vadd.f32 %v2459_v42, %v2234_v2  ;;  %v2559_v19 = vadd.f32 %v2459_v42, %v2235_v20  ;;  %v2630_v40 = vadd.f32 %v2459_v42, %v2306_v31  ;;  %v2631_v50 = vadd.f32 %v2459_v42, %v2307_v17  ;;  %v1997_v27 = vld [vmem:[#allocation4 + $0x458] sm:$0xff]  ;;  %v1994_v2 = vld [vmem:[#allocation4 + $0x440] sm:$0xff]  ;;  %v1995_v20 = vld [vmem:[#allocation4 + $0x448] sm:$0xff] }
 0x346   : > { %v2240_v41 = vmul.f32 %v4564_v21, %v1916_v1  ;;  %v2241_v60 = vmul.f32 %v4564_v21, %v1917_v8  ;;  %v2312_v56 = vmul.f32 %v4564_v21, %v1988_v6  ;;  %v2313_v34 = vmul.f32 %v4564_v21, %v1989_v37  ;;  %2704 = vst [vmem:[#allocation4 + $0x1b0] sm:$0xff] %v2560_v63  ;;  %v2474_v21 = vpop.permute.xlu1 %2473  ;;  %v1922_v1 = vld [vmem:[#allocation4 + $0x200] sm:$0xff]  ;;  %v1923_v8 = vld [vmem:[#allocation4 + $0x208] sm:$0xff]  ;;  %v1929_v42 = vld [vmem:[#allocation4 + $0x238] sm:$0xff] }
 0x347   : > { %2705 = vst [vmem:[#allocation4 + $0x1b8] sm:$0xff] %v2561_v13  ;;  %2776 = vst [vmem:[#allocation4 + $0x3f0] sm:$0xff] %v2632_v12  ;;  %v2238_v44 = vmul.f32 %v4566_v62, %v1914_v32  ;;  %v2239_v47 = vmul.f32 %v4566_v62, %v1915_v57  ;;  %v2310_v5 = vmul.f32 %v4566_v62, %v1986_v14  ;;  %v2479_v32 = vpop.permute.xlu0 %2478 }
 0x348   : > { %2777 = vst [vmem:[#allocation4 + $0x3f8] sm:$0xff] %v2633_v61  ;;  %v2311_v48 = vmul.f32 %v4566_v62, %v1987_v9  ;;  %2702 = vst [vmem:[#allocation4 + $0x1a0] sm:$0xff] %v2558_v25  ;;  %v2564_v22 = vadd.f32 %v2474_v21, %v2240_v41  ;;  %v2565_v55 = vadd.f32 %v2474_v21, %v2241_v60  ;;  %v1928_v61 = vld [vmem:[#allocation4 + $0x230] sm:$0xff]  ;;  %v2001_v60 = vld [vmem:[#allocation4 + $0x478] sm:$0xff] }
 0x349   : > { %2703 = vst [vmem:[#allocation4 + $0x1a8] sm:$0xff] %v2559_v19  ;;  %2774 = vst [vmem:[#allocation4 + $0x3e0] sm:$0xff] %v2630_v40  ;;  %v2636_v54 = vadd.f32 %v2474_v21, %v2312_v56  ;;  %v2637_v33 = vadd.f32 %v2474_v21, %v2313_v34  ;;  %v2562_v36 = vadd.f32 %v2469_v28, %v2238_v44  ;;  %v1926_v56 = vld [vmem:[#allocation4 + $0x220] sm:$0xff] }
 0x34a   : > { %2775 = vst [vmem:[#allocation4 + $0x3e8] sm:$0xff] %v2631_v50  ;;  %v2563_v16 = vadd.f32 %v2469_v28, %v2239_v47  ;;  %v2634_v45 = vadd.f32 %v2469_v28, %v2310_v5  ;;  %v2635_v62 = vadd.f32 %v2469_v28, %v2311_v48  ;;  %v2244_v51 = vmul.f32 %v4568_v26, %v1920_v58  ;;  %v1927_v5 = vld [vmem:[#allocation4 + $0x228] sm:$0xff]  ;;  %v1998_v48 = vld [vmem:[#allocation4 + $0x460] sm:$0xff] }
 0x34b   : > { %v2245_v4 = vmul.f32 %v4568_v26, %v1921_v18  ;;  %v2316_v30 = vmul.f32 %v4568_v26, %v1992_v38  ;;  %v2317_v7 = vmul.f32 %v4568_v26, %v1993_v10  ;;  %2708 = vst [vmem:[#allocation4 + $0x1d0] sm:$0xff] %v2564_v22  ;;  %2709 = vst [vmem:[#allocation4 + $0x1d8] sm:$0xff] %v2565_v55  ;;  %v2484_v26 = vpop.permute.xlu1 %2483  ;;  %v2489_v47 = vpop.permute.xlu0 %2488  ;;  %v1999_v38 = vld [vmem:[#allocation4 + $0x468] sm:$0xff] }
 0x34c   : > { %2780 = vst [vmem:[#allocation4 + $0x410] sm:$0xff] %v2636_v54  ;;  %2781 = vst [vmem:[#allocation4 + $0x418] sm:$0xff] %v2637_v33  ;;  %v2242_v15 = vmul.f32 %v4570_v23, %v1918_v35  ;;  %v2243_v53 = vmul.f32 %v4570_v23, %v1919_v43  ;;  %v2314_v52 = vmul.f32 %v4570_v23, %v1990_v46  ;;  %v4792_v43 = vld [vmem:[#allocation17_spill] sm:$0xff]  ;;  %v4793_v33 = vld [vmem:[#allocation18_spill] sm:$0xff] }
 0x34d   : > { %v2315_v59 = vmul.f32 %v4570_v23, %v1991_v49  ;;  %2706 = vst [vmem:[#allocation4 + $0x1c0] sm:$0xff] %v2562_v36  ;;  %2707 = vst [vmem:[#allocation4 + $0x1c8] sm:$0xff] %v2563_v16  ;;  %v2568_v31 = vadd.f32 %v2484_v26, %v2244_v51  ;;  %v2569_v17 = vadd.f32 %v2484_v26, %v2245_v4 }
 0x34e   : > { %2778 = vst [vmem:[#allocation4 + $0x400] sm:$0xff] %v2634_v45  ;;  %2779 = vst [vmem:[#allocation4 + $0x408] sm:$0xff] %v2635_v62  ;;  %v2640_v6 = vadd.f32 %v2484_v26, %v2316_v30  ;;  %v2641_v37 = vadd.f32 %v2484_v26, %v2317_v7  ;;  %v2566_v39 = vadd.f32 %v2479_v32, %v2242_v15 }
 0x34f   : > { %v2567_v57 = vadd.f32 %v2479_v32, %v2243_v53  ;;  %v2638_v14 = vadd.f32 %v2479_v32, %v2314_v52  ;;  %v2639_v23 = vadd.f32 %v2479_v32, %v2315_v59  ;;  %v2248_v9 = vmul.f32 %v4572_v3, %v1924_v11  ;;  %2712 = vst [vmem:[#allocation4 + $0x1f0] sm:$0xff] %v2568_v31  ;;  %v2494_v41 = vpop.permute.xlu1 %2493  ;;  %v2499_v7 = vpop.permute.xlu0 %2498 }
 0x350   : > { %v2249_v63 = vmul.f32 %v4572_v3, %v1925_v29  ;;  %v2320_v13 = vmul.f32 %v4572_v3, %v1996_v0  ;;  %v2321_v12 = vmul.f32 %v4572_v3, %v1997_v27  ;;  %2713 = vst [vmem:[#allocation4 + $0x1f8] sm:$0xff] %v2569_v17  ;;  %2784 = vst [vmem:[#allocation4 + $0x430] sm:$0xff] %v2640_v6  ;;  %v2000_v3 = vld [vmem:[#allocation4 + $0x470] sm:$0xff] }
 0x351   : > { %2785 = vst [vmem:[#allocation4 + $0x438] sm:$0xff] %v2641_v37  ;;  %v2246_v25 = vmul.f32 %v4574_v24, %v1922_v1  ;;  %v2247_v19 = vmul.f32 %v4574_v24, %v1923_v8  ;;  %v2318_v40 = vmul.f32 %v4574_v24, %v1994_v2  ;;  %v2319_v50 = vmul.f32 %v4574_v24, %v1995_v20 }
 0x352   : > { %2710 = vst [vmem:[#allocation4 + $0x1e0] sm:$0xff] %v2566_v39  ;;  %2711 = vst [vmem:[#allocation4 + $0x1e8] sm:$0xff] %v2567_v57  ;;  %v2572_v34 = vadd.f32 %v2494_v41, %v2248_v9  ;;  %v2573_v58 = vadd.f32 %v2494_v41, %v2249_v63  ;;  %v2644_v18 = vadd.f32 %v2494_v41, %v2320_v13 }
 0x353   : > { %2782 = vst [vmem:[#allocation4 + $0x420] sm:$0xff] %v2638_v14  ;;  %2783 = vst [vmem:[#allocation4 + $0x428] sm:$0xff] %v2639_v23  ;;  %v2645_v44 = vadd.f32 %v2494_v41, %v2321_v12  ;;  %v2570_v10 = vadd.f32 %v2489_v47, %v2246_v25  ;;  %v2571_v35 = vadd.f32 %v2489_v47, %v2247_v19  ;;  %v2504_v54 = vpop.permute.xlu1 %2503 }
 0x354   : > { %v2642_v21 = vadd.f32 %v2489_v47, %v2318_v40  ;;  %v2643_v24 = vadd.f32 %v2489_v47, %v2319_v50  ;;  %2716 = vst [vmem:[#allocation4 + $0x210] sm:$0xff] %v2572_v34  ;;  %2717 = vst [vmem:[#allocation4 + $0x218] sm:$0xff] %v2573_v58  ;;  %v2252_v46 = vmul.f32 %v4792_v43, %v1928_v61 }
 0x355   : > { %2788 = vst [vmem:[#allocation4 + $0x450] sm:$0xff] %v2644_v18  ;;  %2789 = vst [vmem:[#allocation4 + $0x458] sm:$0xff] %v2645_v44  ;;  %v2253_v49 = vmul.f32 %v4792_v43, %v1929_v42  ;;  %v2324_v22 = vmul.f32 %v4792_v43, %v2000_v3  ;;  %v2325_v55 = vmul.f32 %v4792_v43, %v2001_v60 }
 0x356   : > { %2714 = vst [vmem:[#allocation4 + $0x200] sm:$0xff] %v2570_v10  ;;  %2715 = vst [vmem:[#allocation4 + $0x208] sm:$0xff] %v2571_v35  ;;  %v2250_v28 = vmul.f32 %v4793_v33, %v1926_v56  ;;  %v2251_v36 = vmul.f32 %v4793_v33, %v1927_v5  ;;  %v2322_v16 = vmul.f32 %v4793_v33, %v1998_v48 }
 0x357   : > { %2786 = vst [vmem:[#allocation4 + $0x440] sm:$0xff] %v2642_v21  ;;  %2787 = vst [vmem:[#allocation4 + $0x448] sm:$0xff] %v2643_v24  ;;  %v2323_v45 = vmul.f32 %v4793_v33, %v1999_v38  ;;  %v2576_v62 = vadd.f32 %v2504_v54, %v2252_v46  ;;  %v2577_v51 = vadd.f32 %v2504_v54, %v2253_v49 }
 0x358   : > { %v2648_v4 = vadd.f32 %v2504_v54, %v2324_v22  ;;  %v2649_v30 = vadd.f32 %v2504_v54, %v2325_v55  ;;  %v2574_v11 = vadd.f32 %v2499_v7, %v2250_v28  ;;  %v2575_v29 = vadd.f32 %v2499_v7, %v2251_v36 }
 0x359   : > { %v2646_v15 = vadd.f32 %v2499_v7, %v2322_v16  ;;  %v2647_v53 = vadd.f32 %v2499_v7, %v2323_v45  ;;  %2720 = vst [vmem:[#allocation4 + $0x230] sm:$0xff] %v2576_v62  ;;  %2721 = vst [vmem:[#allocation4 + $0x238] sm:$0xff] %v2577_v51 }
 0x35a   : > { %2792 = vst [vmem:[#allocation4 + $0x470] sm:$0xff] %v2648_v4  ;;  %2793 = vst [vmem:[#allocation4 + $0x478] sm:$0xff] %v2649_v30 }
 0x35b   : > { %2718 = vst [vmem:[#allocation4 + $0x220] sm:$0xff] %v2574_v11  ;;  %2719 = vst [vmem:[#allocation4 + $0x228] sm:$0xff] %v2575_v29 }
 0x35c   : > { %2790 = vst [vmem:[#allocation4 + $0x460] sm:$0xff] %v2646_v15  ;;  %2791 = vst [vmem:[#allocation4 + $0x468] sm:$0xff] %v2647_v53 }
 0x35d PF: > { %p2923_p6 = scmp.eq.s32.totalorder %s3091_s19, 1  ;;  %s3052_s14 = smov [#allocation4]  }
 0x35e   : > { %s2800_s15 = sshll.u32 %s3052_s14, 4  ;;  %s2801_s15 = int_to_ptr.vmem [resolvable:$true] %s2800_s15 }
 0x35f   : > { %s3013_s16 = scalar_lea.vmem %s2801_s15, 18432  ;;  %p3020_p10 = scmp.lt.s32.totalorder %s2801_s15, %s2801_s15 }
 0x360   : > { %p3014_p7 = scmp.ne.s32.totalorder %s2801_s15, %s3013_s16  ;;  %p3021_p11 = scmp.lt.s32.totalorder %s3013_s16, %s3013_s16 }
 0x362   : > { %p3015_p8 = pnand %p3014_p7, %p2923_p6  ;;  %p3022_p12 = por %p3021_p11, %p3020_p10 }
 0x364   : > { %p3016_p9 = pneg %p3015_p8 }
 0x366   : > { %p3023_p13 = pnand %p3022_p12, %p3016_p9 }
 0x368   : > { %3026 = shalt.err (!%p3023_p13)
}
 0x369   : > { %s3053_s17 = smov 256   ;;  %s3054_s20 = smov 16  }
 0x36a   : > { %2920 = dma.vmem_to_hbm [thread:$0]  (%p2923_p6), %s2801_s15, 18432, %s4744_s5, [#allocation5], %s3053_s17, %s3053_s17, %s3054_s20  }
 0x36b   : > { %3042 = dma.done.wait (%p2923_p6), [#allocation5], 18432  }
 0x36c   : > { %3044 = vsyncadd (%p2923_p6), [#allocation5], 4294948864 }
 0x36d PF: > { %s16_s18 = sadd.s32 1, %s3047_s18  }
 0x36e   : > { %p13_p0 = scmp.ge.s32.totalorder %s16_s18, 4  }
 0x370   :  { %15 = sbr.rel (!%p13_p0) target bundleno = 1 (0x1), region = 79 }
 0x375   :  { %2816 = vsyncpa [#allocation5], 1 }
 0x376   :  { %2818 = vsyncpa [#allocation5 + $0x1], 1 }

</bundles_post_ra>
